<compile_context>
chip_gen: v7x
topology: tpu7x:2x2x1
jax: 0.10.0
libtpu: 0.0.40
codegen_flags: <defaults>
</compile_context>

<pallas_src>
import jax
import jax.numpy as jnp
from jax.experimental import pallas as pl
from jax.experimental.pallas import tpu as pltpu

TEXT_HIDDEN = 768      # BERT-base pooler_output size
IMAGE_HIDDEN = 2048    # ResNet50 feature size (fc = Identity)
IMAGE_GAP_DIM = 3      # channels after global-average-pool (surrogate image encoder)
IMAGE_GAP_PAD = 128    # GAP features zero-padded to a lane-dense contracting dim
FUSION_DIM = 512
NUM_CLASSES = 10
PADDED_CLASSES = 128   # lane-dense classifier / output width
BATCH_TILE = 256       # M tile for large B: fills the 256-row MXU on v6e/v7x


# ---------------------------------------------------------------------------
# Pallas kernel: encoder projections + fusion Linear + ReLU + classifier Linear
# ---------------------------------------------------------------------------
def fusion_head_kernel(pool_ref, gap_ref,              # batch-tiled activations (bf16)
                       wp_ref, bp_ref,                 # text pooler  (VMEM-resident)
                       wim_ref, bim_ref,               # image proj   (VMEM-resident)
                       wt_ref, wi_ref, bf_ref,         # fusion layer (VMEM-resident)
                       wc_ref, bc_ref,                 # classifier   (VMEM-resident)
                       out_ref):
    # Folded text-encoder output projection: tanh pooler (tanh lowers to the EUP).
    txt = jnp.tanh(
        jnp.dot(pool_ref[...], wp_ref[...], preferred_element_type=jnp.float32)
        + bp_ref[...])
    # Folded image-encoder output projection (fc = Identity -> no activation).
    img = (jnp.dot(gap_ref[...], wim_ref[...], preferred_element_type=jnp.float32)
           + bim_ref[...])
    # Fusion Linear + ReLU:  cat(txt, img) @ W_fusion == txt @ W_t + img @ W_i
    fused = (
        jnp.dot(txt.astype(jnp.bfloat16), wt_ref[...],
                preferred_element_type=jnp.float32)
        + jnp.dot(img.astype(jnp.bfloat16), wi_ref[...],
                  preferred_element_type=jnp.float32)
        + bf_ref[...])
    fused = jnp.maximum(fused, 0.0)                     # ReLU (f32)
    # Dropout(0.3): identity in eval mode.
    # TODO(synk): training-mode dropout (pltpu.prng_seed + prng_random_bits mask).
    out_ref[...] = (
        jnp.dot(fused.astype(jnp.bfloat16), wc_ref[...],
                preferred_element_type=jnp.float32)
        + bc_ref[...])                                  # padded classifier cols are 0


def fusion_head(pooled, gap, kw, *, num_classes=NUM_CLASSES):
    """pooled: [B, 768] bf16 masked-mean token embedding; gap: [B, 3] bf16 image GAP."""
    B = pooled.shape[0]
    if B < 2 * BATCH_TILE:
        # Small batch: no batch padding, single grid step (a block equal to the full
        # array dim bypasses the (8,128) divisibility rule). Avoids materializing a
        # padded activation copy and wasted MXU rows at tiny B.
        tb, b_pad = B, B
    else:
        tb = BATCH_TILE
        b_pad = tb * pl.cdiv(B, tb)     # >=2 parallel steps -> v7x megacore sharding

    if b_pad != B:
        pooled = jnp.pad(pooled, ((0, b_pad - B), (0, 0)))
        gap = jnp.pad(gap, ((0, b_pad - B), (0, 0)))
    # Pad the tiny GAP contracting dim (3 -> 128); the padded W_img rows are zero.
    gap = jnp.pad(gap, ((0, 0), (0, IMAGE_GAP_PAD - gap.shape[1])))

    wp, bp = kw["w_pool"], kw["b_pool"]
    wim, bim = kw["w_img"], kw["b_img"]
    wt, wi, bf = kw["w_fuse_t"], kw["w_fuse_i"], kw["b_fuse"]
    wc, bc = kw["w_cls"], kw["b_cls"]

    flops = 2 * b_pad * (TEXT_HIDDEN * TEXT_HIDDEN
                         + IMAGE_GAP_PAD * IMAGE_HIDDEN
                         + (TEXT_HIDDEN + IMAGE_HIDDEN) * FUSION_DIM
                         + FUSION_DIM * PADDED_CLASSES)
    bytes_accessed = (
        2 * (pooled.size + gap.size + wp.size + wim.size + wt.size + wi.size + wc.size)
        + 4 * (bp.size + bim.size + bf.size + bc.size + b_pad * PADDED_CLASSES))

    batched = lambda i: (i, 0)      # batch-tiled operands
    resident = lambda i: (0, 0)     # weights/biases stay VMEM-resident across steps

    out = pl.pallas_call(
        fusion_head_kernel,
        out_shape=jax.ShapeDtypeStruct((b_pad, PADDED_CLASSES), jnp.float32),
        grid=(b_pad // tb,),
        in_specs=[
            pl.BlockSpec((tb, TEXT_HIDDEN), batched),
            pl.BlockSpec((tb, IMAGE_GAP_PAD), batched),
            pl.BlockSpec((TEXT_HIDDEN, TEXT_HIDDEN), resident),
            pl.BlockSpec((1, TEXT_HIDDEN), resident),
            pl.BlockSpec((IMAGE_GAP_PAD, IMAGE_HIDDEN), resident),
            pl.BlockSpec((1, IMAGE_HIDDEN), resident),
            pl.BlockSpec((TEXT_HIDDEN, FUSION_DIM), resident),
            pl.BlockSpec((IMAGE_HIDDEN, FUSION_DIM), resident),
            pl.BlockSpec((1, FUSION_DIM), resident),
            pl.BlockSpec((FUSION_DIM, PADDED_CLASSES), resident),
            pl.BlockSpec((1, PADDED_CLASSES), resident),
        ],
        out_specs=pl.BlockSpec((tb, PADDED_CLASSES), batched),
        compiler_params=pltpu.CompilerParams(
            dimension_semantics=("parallel",),        # megacore sharding on v7x
            vmem_limit_bytes=32 * 1024 * 1024),       # safe for tb<=256 on v5e/v6e/v7x
        cost_estimate=pl.CostEstimate(
            flops=flops, transcendentals=b_pad * TEXT_HIDDEN,
            bytes_accessed=bytes_accessed),
    )(pooled, gap, wp, bp, wim, bim, wt, wi, bf, wc, bc)

    return out[:B, :num_classes]


# ---------------------------------------------------------------------------
# Surrogate encoder front halves (plain JAX; output projections live in the kernel)
# ---------------------------------------------------------------------------
def text_encoder_front(params, input_ids, attention_mask):
    # TODO(synk): full BERT transformer stack not reproduced; embedding lookup +
    # masked mean pool. The tanh pooler (768x768) is folded into the Pallas kernel.
    emb = params["tok_emb"][input_ids]                             # [B, S, 768]
    mask = attention_mask[..., None].astype(jnp.float32)           # [B, S, 1]
    pooled = (emb * mask).sum(axis=1) / jnp.maximum(mask.sum(axis=1), 1.0)
    return pooled.astype(jnp.bfloat16)                             # [B, 768] bf16


def image_encoder_front(images):
    # TODO(synk): full ResNet50 not reproduced; global-average-pool over HxW.
    # The [B,3] -> [B,2048] projection (fc = Identity) is folded into the kernel.
    return images.mean(axis=(2, 3)).astype(jnp.bfloat16)           # [B, 3] bf16


# ---------------------------------------------------------------------------
# Deterministic parameter init + one-time kernel-weight preparation + forward
# ---------------------------------------------------------------------------
def init_params(key, vocab=1000, num_classes=NUM_CLASSES):
    ks = jax.random.split(key, 8)
    s = 0.02
    return {
        "tok_emb": s * jax.random.normal(ks[0], (vocab, TEXT_HIDDEN), jnp.float32),
        # surrogate BERT pooler: Linear(768 -> 768) + tanh
        "w_pool": s * jax.random.normal(ks[1], (TEXT_HIDDEN, TEXT_HIDDEN), jnp.float32),
        "b_pool": jnp.zeros((TEXT_HIDDEN,), jnp.float32),
        # surrogate ResNet head: Linear(3 -> 2048) after GAP
        "w_img": s * jax.random.normal(ks[2], (IMAGE_GAP_DIM, IMAGE_HIDDEN), jnp.float32),
        "b_img": jnp.zeros((IMAGE_HIDDEN,), jnp.float32),
        # fusion Linear(768+2048 -> 512), stored split along the input axis
        "w_fuse_t": s * jax.random.normal(ks[3], (TEXT_HIDDEN, FUSION_DIM), jnp.float32),
        "w_fuse_i": s * jax.random.normal(ks[4], (IMAGE_HIDDEN, FUSION_DIM), jnp.float32),
        "b_fuse": s * jax.random.normal(ks[5], (1, FUSION_DIM), jnp.float32),
        # classifier Linear(512 -> num_classes)
        "w_cls": s * jax.random.normal(ks[6], (FUSION_DIM, num_classes), jnp.float32),
        "b_cls": s * jax.random.normal(ks[7], (1, num_classes), jnp.float32),
    }


def prepare_fusion_weights(params, num_classes=NUM_CLASSES):
    """One-time cast/pad of kernel operands (bf16 weights, f32 biases, padded dims)."""
    return {
        "w_pool": params["w_pool"].astype(jnp.bfloat16),
        "b_pool": params["b_pool"].reshape(1, TEXT_HIDDEN),
        "w_img": jnp.pad(params["w_img"],
                         ((0, IMAGE_GAP_PAD - IMAGE_GAP_DIM), (0, 0))).astype(jnp.bfloat16),
        "b_img": params["b_img"].reshape(1, IMAGE_HIDDEN),
        "w_fuse_t": params["w_fuse_t"].astype(jnp.bfloat16),
        "w_fuse_i": params["w_fuse_i"].astype(jnp.bfloat16),
        "b_fuse": params["b_fuse"],
        "w_cls": jnp.pad(params["w_cls"],
                         ((0, 0), (0, PADDED_CLASSES - num_classes))).astype(jnp.bfloat16),
        "b_cls": jnp.pad(params["b_cls"],
                         ((0, 0), (0, PADDED_CLASSES - num_classes))),
    }


def multimodal_classifier_forward(params, kweights, input_ids, attention_mask, images):
    pooled = text_encoder_front(params, input_ids, attention_mask)   # [B, 768] bf16
    gap = image_encoder_front(images)                                # [B, 3]   bf16
    return fusion_head(pooled, gap, kweights)


def reference_forward(params, input_ids, attention_mask, images):
    # Same precision recipe as the kernel (bf16 operands, f32 accumulation, f32
    # biases/tanh/ReLU) in plain JAX, with the explicit concat of the PyTorch module.
    pooled = text_encoder_front(params, input_ids, attention_mask)
    gap = image_encoder_front(images)
    txt = jnp.tanh(jnp.dot(pooled, params["w_pool"].astype(jnp.bfloat16),
                           preferred_element_type=jnp.float32) + params["b_pool"])
    img = (jnp.dot(gap, params["w_img"].astype(jnp.bfloat16),
                   preferred_element_type=jnp.float32) + params["b_img"])
    combined = jnp.concatenate([txt.astype(jnp.bfloat16), img.astype(jnp.bfloat16)],
                               axis=1)
    w_fuse = jnp.concatenate([params["w_fuse_t"], params["w_fuse_i"]],
                             axis=0).astype(jnp.bfloat16)
    fused = jnp.maximum(
        jnp.dot(combined, w_fuse, preferred_element_type=jnp.float32)
        + params["b_fuse"], 0.0)
    return (jnp.dot(fused.astype(jnp.bfloat16), params["w_cls"].astype(jnp.bfloat16),
                    preferred_element_type=jnp.float32) + params["b_cls"])


if __name__ == "__main__":
    key = jax.random.PRNGKey(0)
    kp, k_ids, k_img = jax.random.split(key, 3)

    B, S, H, W = 2, 8, 16, 16
    params = init_params(kp)
    kweights = prepare_fusion_weights(params)        # one-time cast/pad of weights
    input_ids = jax.random.randint(k_ids, (B, S), 0, 1000, dtype=jnp.int32)
    attention_mask = jnp.ones((B, S), dtype=jnp.int32)
    images = jax.random.normal(k_img, (B, 3, H, W), jnp.float32)   # NCHW

    fwd = jax.jit(multimodal_classifier_forward)
    logits = jax.block_until_ready(
        fwd(params, kweights, input_ids, attention_mask, images))

    ref = reference_forward(params, input_ids, attention_mask, images)
    assert logits.shape == (B, NUM_CLASSES)
    assert jnp.allclose(logits, ref, atol=1e-3, rtol=1e-2), (
        float(jnp.max(jnp.abs(logits - ref))))

    print("KERNEL_OK")
</pallas_src>

<mosaic_0001>
module attributes {stable_mosaic.version = 11 : i64} {
  func.func @fusion_head_kernel(%arg0: i32, %arg1: memref<2x768xbf16, #tpu.memory_space<vmem>>, %arg2: memref<2x128xbf16, #tpu.memory_space<vmem>>, %arg3: memref<768x768xbf16, #tpu.memory_space<vmem>>, %arg4: memref<1x768xf32, #tpu.memory_space<vmem>>, %arg5: memref<128x2048xbf16, #tpu.memory_space<vmem>>, %arg6: memref<1x2048xf32, #tpu.memory_space<vmem>>, %arg7: memref<768x512xbf16, #tpu.memory_space<vmem>>, %arg8: memref<2048x512xbf16, #tpu.memory_space<vmem>>, %arg9: memref<1x512xf32, #tpu.memory_space<vmem>>, %arg10: memref<512x128xbf16, #tpu.memory_space<vmem>>, %arg11: memref<1x128xf32, #tpu.memory_space<vmem>>, %arg12: memref<2x128xf32, #tpu.memory_space<vmem>>) attributes {dimension_semantics = [#tpu.dimension_semantics<parallel>], iteration_bounds = array<i64: 1>, scalar_prefetch = 0 : i64, scratch_operands = 0 : i64, tpu.core_type = #tpu.core_type<tc>, window_params = [{transform_indices = @transform_0, window_bounds = array<i64: 2, 768>}, {transform_indices = @transform_1, window_bounds = array<i64: 2, 128>}, {pipeline_mode = #tpu.pipeline_mode<synchronous>, transform_indices = @transform_2, window_bounds = array<i64: 768, 768>}, {pipeline_mode = #tpu.pipeline_mode<synchronous>, transform_indices = @transform_3, window_bounds = array<i64: 1, 768>}, {pipeline_mode = #tpu.pipeline_mode<synchronous>, transform_indices = @transform_4, window_bounds = array<i64: 128, 2048>}, {pipeline_mode = #tpu.pipeline_mode<synchronous>, transform_indices = @transform_5, window_bounds = array<i64: 1, 2048>}, {pipeline_mode = #tpu.pipeline_mode<synchronous>, transform_indices = @transform_6, window_bounds = array<i64: 768, 512>}, {pipeline_mode = #tpu.pipeline_mode<synchronous>, transform_indices = @transform_7, window_bounds = array<i64: 2048, 512>}, {pipeline_mode = #tpu.pipeline_mode<synchronous>, transform_indices = @transform_8, window_bounds = array<i64: 1, 512>}, {pipeline_mode = #tpu.pipeline_mode<synchronous>, transform_indices = @transform_9, window_bounds = array<i64: 512, 128>}, {pipeline_mode = #tpu.pipeline_mode<synchronous>, transform_indices = @transform_10, window_bounds = array<i64: 1, 128>}, {transform_indices = @transform_11, window_bounds = array<i64: 2, 128>}]} {
    %c0 = arith.constant 0 : index
    %c0_0 = arith.constant 0 : index
    %0 = vector.load %arg1[%c0, %c0_0] : memref<2x768xbf16, #tpu.memory_space<vmem>>, vector<2x768xbf16>
    %c0_1 = arith.constant 0 : index
    %c0_2 = arith.constant 0 : index
    %1 = vector.load %arg3[%c0_1, %c0_2] : memref<768x768xbf16, #tpu.memory_space<vmem>>, vector<768x768xbf16>
    %cst = arith.constant dense<0.000000e+00> : vector<2x768xf32>
    %2 = tpu.matmul %0, %1, %cst {dimension_numbers = #tpu.dot_dimension_numbers<[1], [0], [0], [1], [0, 0, 1, 1], [], []>} : vector<2x768xbf16>, vector<768x768xbf16>, vector<2x768xf32> -> vector<2x768xf32>
    %c0_3 = arith.constant 0 : index
    %c0_4 = arith.constant 0 : index
    %3 = vector.load %arg4[%c0_3, %c0_4] : memref<1x768xf32, #tpu.memory_space<vmem>>, vector<1x768xf32>
    %4 = vector.broadcast %3 : vector<1x768xf32> to vector<2x768xf32>
    %5 = arith.addf %2, %4 : vector<2x768xf32>
    %6 = math.tanh %5 : vector<2x768xf32>
    %c0_5 = arith.constant 0 : index
    %c0_6 = arith.constant 0 : index
    %7 = vector.load %arg2[%c0_5, %c0_6] : memref<2x128xbf16, #tpu.memory_space<vmem>>, vector<2x128xbf16>
    %c0_7 = arith.constant 0 : index
    %c0_8 = arith.constant 0 : index
    %8 = vector.load %arg5[%c0_7, %c0_8] : memref<128x2048xbf16, #tpu.memory_space<vmem>>, vector<128x2048xbf16>
    %cst_9 = arith.constant dense<0.000000e+00> : vector<2x2048xf32>
    %9 = tpu.matmul %7, %8, %cst_9 {dimension_numbers = #tpu.dot_dimension_numbers<[1], [0], [0], [1], [0, 0, 1, 1], [], []>} : vector<2x128xbf16>, vector<128x2048xbf16>, vector<2x2048xf32> -> vector<2x2048xf32>
    %c0_10 = arith.constant 0 : index
    %c0_11 = arith.constant 0 : index
    %10 = vector.load %arg6[%c0_10, %c0_11] : memref<1x2048xf32, #tpu.memory_space<vmem>>, vector<1x2048xf32>
    %11 = vector.broadcast %10 : vector<1x2048xf32> to vector<2x2048xf32>
    %12 = arith.addf %9, %11 : vector<2x2048xf32>
    %13 = arith.truncf %6 : vector<2x768xf32> to vector<2x768xbf16>
    %c0_12 = arith.constant 0 : index
    %c0_13 = arith.constant 0 : index
    %14 = vector.load %arg7[%c0_12, %c0_13] : memref<768x512xbf16, #tpu.memory_space<vmem>>, vector<768x512xbf16>
    %cst_14 = arith.constant dense<0.000000e+00> : vector<2x512xf32>
    %15 = tpu.matmul %13, %14, %cst_14 {dimension_numbers = #tpu.dot_dimension_numbers<[1], [0], [0], [1], [0, 0, 1, 1], [], []>} : vector<2x768xbf16>, vector<768x512xbf16>, vector<2x512xf32> -> vector<2x512xf32>
    %16 = arith.truncf %12 : vector<2x2048xf32> to vector<2x2048xbf16>
    %c0_15 = arith.constant 0 : index
    %c0_16 = arith.constant 0 : index
    %17 = vector.load %arg8[%c0_15, %c0_16] : memref<2048x512xbf16, #tpu.memory_space<vmem>>, vector<2048x512xbf16>
    %cst_17 = arith.constant dense<0.000000e+00> : vector<2x512xf32>
    %18 = tpu.matmul %16, %17, %cst_17 {dimension_numbers = #tpu.dot_dimension_numbers<[1], [0], [0], [1], [0, 0, 1, 1], [], []>} : vector<2x2048xbf16>, vector<2048x512xbf16>, vector<2x512xf32> -> vector<2x512xf32>
    %19 = arith.addf %15, %18 : vector<2x512xf32>
    %c0_18 = arith.constant 0 : index
    %c0_19 = arith.constant 0 : index
    %20 = vector.load %arg9[%c0_18, %c0_19] : memref<1x512xf32, #tpu.memory_space<vmem>>, vector<1x512xf32>
    %21 = vector.broadcast %20 : vector<1x512xf32> to vector<2x512xf32>
    %22 = arith.addf %19, %21 : vector<2x512xf32>
    %cst_20 = arith.constant 0.000000e+00 : f32
    %23 = vector.broadcast %cst_20 : f32 to vector<2x512xf32>
    %24 = arith.maximumf %22, %23 : vector<2x512xf32>
    %25 = arith.truncf %24 : vector<2x512xf32> to vector<2x512xbf16>
    %c0_21 = arith.constant 0 : index
    %c0_22 = arith.constant 0 : index
    %26 = vector.load %arg10[%c0_21, %c0_22] : memref<512x128xbf16, #tpu.memory_space<vmem>>, vector<512x128xbf16>
    %cst_23 = arith.constant dense<0.000000e+00> : vector<2x128xf32>
    %27 = tpu.matmul %25, %26, %cst_23 {dimension_numbers = #tpu.dot_dimension_numbers<[1], [0], [0], [1], [0, 0, 1, 1], [], []>} : vector<2x512xbf16>, vector<512x128xbf16>, vector<2x128xf32> -> vector<2x128xf32>
    %c0_24 = arith.constant 0 : index
    %c0_25 = arith.constant 0 : index
    %28 = vector.load %arg11[%c0_24, %c0_25] : memref<1x128xf32, #tpu.memory_space<vmem>>, vector<1x128xf32>
    %29 = vector.broadcast %28 : vector<1x128xf32> to vector<2x128xf32>
    %30 = arith.addf %27, %29 : vector<2x128xf32>
    %c0_26 = arith.constant 0 : index
    %c0_27 = arith.constant 0 : index
    %31 = vector.load %arg12[%c0_26, %c0_27] : memref<2x128xf32, #tpu.memory_space<vmem>>, vector<2x128xf32>
    tpu.vector_store %arg12[%c0_26, %c0_27], %30 {strides = array<i32>} : memref<2x128xf32, #tpu.memory_space<vmem>>, vector<2x128xf32>,
    return
  }
  func.func @transform_0(%arg0: i32) -> (i32, i32) {
    %c0_i32 = arith.constant 0 : i32
    %c0_i32_0 = arith.constant 0 : i32
    return %arg0, %c0_i32 : i32, i32
  }
  func.func @transform_1(%arg0: i32) -> (i32, i32) {
    %c0_i32 = arith.constant 0 : i32
    %c0_i32_0 = arith.constant 0 : i32
    return %arg0, %c0_i32 : i32, i32
  }
  func.func @transform_2(%arg0: i32) -> (i32, i32) {
    %c0_i32 = arith.constant 0 : i32
    %c0_i32_0 = arith.constant 0 : i32
    %c0_i32_1 = arith.constant 0 : i32
    return %c0_i32, %c0_i32_0 : i32, i32
  }
  func.func @transform_3(%arg0: i32) -> (i32, i32) {
    %c0_i32 = arith.constant 0 : i32
    %c0_i32_0 = arith.constant 0 : i32
    %c0_i32_1 = arith.constant 0 : i32
    return %c0_i32, %c0_i32_0 : i32, i32
  }
  func.func @transform_4(%arg0: i32) -> (i32, i32) {
    %c0_i32 = arith.constant 0 : i32
    %c0_i32_0 = arith.constant 0 : i32
    %c0_i32_1 = arith.constant 0 : i32
    return %c0_i32, %c0_i32_0 : i32, i32
  }
  func.func @transform_5(%arg0: i32) -> (i32, i32) {
    %c0_i32 = arith.constant 0 : i32
    %c0_i32_0 = arith.constant 0 : i32
    %c0_i32_1 = arith.constant 0 : i32
    return %c0_i32, %c0_i32_0 : i32, i32
  }
  func.func @transform_6(%arg0: i32) -> (i32, i32) {
    %c0_i32 = arith.constant 0 : i32
    %c0_i32_0 = arith.constant 0 : i32
    %c0_i32_1 = arith.constant 0 : i32
    return %c0_i32, %c0_i32_0 : i32, i32
  }
  func.func @transform_7(%arg0: i32) -> (i32, i32) {
    %c0_i32 = arith.constant 0 : i32
    %c0_i32_0 = arith.constant 0 : i32
    %c0_i32_1 = arith.constant 0 : i32
    return %c0_i32, %c0_i32_0 : i32, i32
  }
  func.func @transform_8(%arg0: i32) -> (i32, i32) {
    %c0_i32 = arith.constant 0 : i32
    %c0_i32_0 = arith.constant 0 : i32
    %c0_i32_1 = arith.constant 0 : i32
    return %c0_i32, %c0_i32_0 : i32, i32
  }
  func.func @transform_9(%arg0: i32) -> (i32, i32) {
    %c0_i32 = arith.constant 0 : i32
    %c0_i32_0 = arith.constant 0 : i32
    %c0_i32_1 = arith.constant 0 : i32
    return %c0_i32, %c0_i32_0 : i32, i32
  }
  func.func @transform_10(%arg0: i32) -> (i32, i32) {
    %c0_i32 = arith.constant 0 : i32
    %c0_i32_0 = arith.constant 0 : i32
    %c0_i32_1 = arith.constant 0 : i32
    return %c0_i32, %c0_i32_0 : i32, i32
  }
  func.func @transform_11(%arg0: i32) -> (i32, i32) {
    %c0_i32 = arith.constant 0 : i32
    %c0_i32_0 = arith.constant 0 : i32
    return %arg0, %c0_i32 : i32, i32
  }
}

</mosaic_0001>

<bundles_post_ra>
// kernel: multimodal_classifier_forward.1
= control target key start
LH: loop header
LB: loop body
LE: loop exit
PB: predicated region body
PF: predicated region fallthrough
CT: control target
= control target key end

     0   :  { %16 = vsyncpa [#allocation3], 0  ;;  %s12603_s0 = inlined_call_operand.vmem [shape: bf16[2,768], index: 0, kind: input, shape index: {}]   ;;  %s12604_s1 = inlined_call_operand.vmem [shape: bf16[2,128], index: 1, kind: input, shape index: {}]   ;;  %s12605_s2 = inlined_call_operand.hbm [shape: bf16[768,768], index: 2, kind: input, shape index: {}]   ;;  %s12606_s3 = inlined_call_operand.hbm [shape: f32[1,768], index: 3, kind: input, shape index: {}]   ;;  %s12607_s4 = inlined_call_operand.hbm [shape: bf16[128,2048], index: 4, kind: input, shape index: {}]   ;;  %s12608_s5 = inlined_call_operand.hbm [shape: f32[1,2048], index: 5, kind: input, shape index: {}]   ;;  %s12609_s6 = inlined_call_operand.hbm [shape: bf16[768,512], index: 6, kind: input, shape index: {}]   ;;  %s12610_s7 = inlined_call_operand.hbm [shape: bf16[2048,512], index: 7, kind: input, shape index: {}]   ;;  %s12611_s8 = inlined_call_operand.hbm [shape: f32[1,512], index: 8, kind: input, shape index: {}]   ;;  %s12612_s9 = inlined_call_operand.hbm [shape: bf16[512,128], index: 9, kind: input, shape index: {}]   ;;  %s12613_s10 = inlined_call_operand.hbm [shape: f32[1,128], index: 10, kind: input, shape index: {}]   ;;  %s12614_s11 = inlined_call_operand.hbm [shape: f32[2,128], index: 11, kind: output, shape index: {}]  }
   0x1   :  { %17 = vsyncpa [#allocation6], 0 }
   0x2   :  { %18 = vsyncpa [#allocation9], 0 }
   0x3   :  { %19 = vsyncpa [#allocation12], 0 }
   0x4   :  { %20 = vsyncpa [#allocation15], 0 }
   0x5   :  { %21 = vsyncpa [#allocation4], 0  ;;  %s12082_s17 = smov [#allocation5]   ;;  %s12083_s19 = smov [#allocation8]  }
   0x6   :  { %s44_s18 = sshll.u32 %s12082_s17, 4  ;;  %s66_s20 = sshll.u32 %s12083_s19, 4  ;;  %s45_s18 = int_to_ptr.vmem [resolvable:$true] %s44_s18  ;;  %s67_s20 = int_to_ptr.vmem [resolvable:$true] %s66_s20 }
   0x7   :  { %s11850_s23 = scalar_lea.hbm %s12606_s3, 96 }
   0x8   :  { %p11851_p0 = scmp.ne.s32.totalorder %s12606_s3, %s11850_s23  ;;  %p11854_p1 = scmp.lt.u32.totalorder %s11850_s23, %s12606_s3 }
   0xa   :  { %p11856_p2 = pnand %p11854_p1, %p11851_p0 }
   0xc   :  { %11859 = shalt.err (!%p11856_p2)
}
   0xd   :  { %s11860_s28 = scalar_lea.vmem %s45_s18, 96  ;;  %p11865_p4 = scmp.lt.s32.totalorder %s45_s18, %s45_s18 }
   0xe   :  { %p11861_p3 = scmp.ne.s32.totalorder %s45_s18, %s11860_s28  ;;  %p11866_p5 = scmp.lt.s32.totalorder %s11860_s28, %s11860_s28 }
  0x10   :  { %p11867_p6 = por %p11866_p5, %p11865_p4 }
  0x12   :  { %p11868_p7 = pnand %p11867_p6, %p11861_p3 }
  0x14   :  { %11871 = shalt.err (!%p11868_p7)
}
  0x15   :  { %47 = dma.hbm_to_vmem [thread:$0]  %s12606_s3, 96, %s45_s18, [#allocation6]  }
  0x16   :  { %s11872_s14 = scalar_lea.hbm %s12608_s5, 256 }
  0x17   :  { %p11873_p8 = scmp.ne.s32.totalorder %s12608_s5, %s11872_s14  ;;  %p11876_p9 = scmp.lt.u32.totalorder %s11872_s14, %s12608_s5 }
  0x19   :  { %p11878_p10 = pnand %p11876_p9, %p11873_p8 }
  0x1b   :  { %11881 = shalt.err (!%p11878_p10)
}
  0x1c   :  { %s11882_s21 = scalar_lea.vmem %s67_s20, 256  ;;  %p11887_p12 = scmp.lt.s32.totalorder %s67_s20, %s67_s20 }
  0x1d   :  { %p11883_p11 = scmp.ne.s32.totalorder %s67_s20, %s11882_s21  ;;  %p11888_p13 = scmp.lt.s32.totalorder %s11882_s21, %s11882_s21 }
  0x1f   :  { %p11889_p0 = por %p11888_p13, %p11887_p12 }
  0x21   :  { %p11890_p1 = pnand %p11889_p0, %p11883_p11 }
  0x23   :  { %11893 = shalt.err (!%p11890_p1)
}
  0x24   :  { %69 = dma.hbm_to_vmem [thread:$0]  %s12608_s5, 256, %s67_s20, [#allocation9]  }
  0x25   :  { %s12084_s22 = smov [#allocation11]   ;;  %s12085_s24 = smov [#allocation14]  }
  0x26   :  { %s87_s23 = sshll.u32 %s12084_s22, 4  ;;  %s109_s25 = sshll.u32 %s12085_s24, 4  ;;  %s88_s23 = int_to_ptr.vmem [resolvable:$true] %s87_s23  ;;  %s110_s25 = int_to_ptr.vmem [resolvable:$true] %s109_s25 }
  0x27   :  { %s11894_s28 = scalar_lea.hbm %s12610_s7, 65536 }
  0x28   :  { %p11895_p2 = scmp.ne.s32.totalorder %s12610_s7, %s11894_s28  ;;  %p11898_p3 = scmp.lt.u32.totalorder %s11894_s28, %s12610_s7 }
  0x2a   :  { %p11900_p4 = pnand %p11898_p3, %p11895_p2 }
  0x2c   :  { %11903 = shalt.err (!%p11900_p4)
}
  0x2d   :  { %s11904_s5 = scalar_lea.vmem %s88_s23, 65536  ;;  %p11909_p6 = scmp.lt.s32.totalorder %s88_s23, %s88_s23 }
  0x2e   :  { %p11905_p5 = scmp.ne.s32.totalorder %s88_s23, %s11904_s5  ;;  %p11910_p7 = scmp.lt.s32.totalorder %s11904_s5, %s11904_s5 }
  0x30   :  { %p11911_p8 = por %p11910_p7, %p11909_p6 }
  0x32   :  { %p11912_p9 = pnand %p11911_p8, %p11905_p5 }
  0x34   :  { %11915 = shalt.err (!%p11912_p9)
}
  0x35   :  { %s12086_s20 = smov 256   ;;  %s12087_s14 = smov 16  }
  0x36   :  { %93 = dma.hbm_to_vmem [thread:$0]  %s12610_s7, 65536, %s88_s23, [#allocation12], %s12086_s20, %s12086_s20, %s12087_s14  }
  0x37   :  { %s11916_s21 = scalar_lea.hbm %s12612_s9, 4096 }
  0x38   :  { %p11917_p10 = scmp.ne.s32.totalorder %s12612_s9, %s11916_s21  ;;  %p11920_p11 = scmp.lt.u32.totalorder %s11916_s21, %s12612_s9 }
  0x3a   :  { %p11922_p12 = pnand %p11920_p11, %p11917_p10 }
  0x3c   :  { %11925 = shalt.err (!%p11922_p12)
}
  0x3d   :  { %s11926_s26 = scalar_lea.vmem %s110_s25, 4096  ;;  %p11931_p0 = scmp.lt.s32.totalorder %s110_s25, %s110_s25 }
  0x3e   :  { %p11927_p13 = scmp.ne.s32.totalorder %s110_s25, %s11926_s26  ;;  %p11932_p1 = scmp.lt.s32.totalorder %s11926_s26, %s11926_s26 }
  0x40   :  { %p11933_p2 = por %p11932_p1, %p11931_p0 }
  0x42   :  { %p11934_p3 = pnand %p11933_p2, %p11927_p13 }
  0x44   :  { %11937 = shalt.err (!%p11934_p3)
}
  0x45   :  { %s12088_s7 = smov 64   ;;  %s12089_s23 = smov 4  }
  0x46   :  { %115 = dma.hbm_to_vmem [thread:$0]  %s12612_s9, 4096, %s110_s25, [#allocation15], %s12088_s7, %s12088_s7, %s12089_s23  }
  0x47   :  { %s12090_s29 = smov [#allocation2]   ;;  %s11938_s5 = scalar_lea.hbm %s12605_s2, 36864 }
  0x48   :  { %s31_s30 = sshll.u32 %s12090_s29, 4  ;;  %p11939_p4 = scmp.ne.s32.totalorder %s12605_s2, %s11938_s5  ;;  %s32_s30 = int_to_ptr.vmem [resolvable:$true] %s31_s30 }
  0x49   :  { %p11942_p5 = scmp.lt.u32.totalorder %s11938_s5, %s12605_s2 }
  0x4b   :  { %p11944_p6 = pnand %p11942_p5, %p11939_p4 }
  0x4d   :  { %11947 = shalt.err (!%p11944_p6)
}
  0x4e   :  { %s11948_s21 = scalar_lea.vmem %s32_s30, 36864  ;;  %p11953_p8 = scmp.lt.s32.totalorder %s32_s30, %s32_s30 }
  0x4f   :  { %p11949_p7 = scmp.ne.s32.totalorder %s32_s30, %s11948_s21  ;;  %p11954_p9 = scmp.lt.s32.totalorder %s11948_s21, %s11948_s21 }
  0x51   :  { %p11955_p10 = por %p11954_p9, %p11953_p8 }
  0x53   :  { %p11956_p11 = pnand %p11955_p10, %p11949_p7 }
  0x55   :  { %11959 = shalt.err (!%p11956_p11)
}
  0x56   :  { %s12091_s9 = smov 384   ;;  %s12092_s25 = smov 24  }
  0x57   :  { %37 = dma.hbm_to_vmem [thread:$0]  %s12605_s2, 36864, %s32_s30, [#allocation3], %s12091_s9, %s12091_s9, %s12092_s25  }
  0x58   :  { %s12093_s22 = smov [#allocation7]   ;;  %s11960_s27 = scalar_lea.hbm %s12607_s4, 16384 }
  0x59   :  { %s53_s24 = sshll.u32 %s12093_s22, 4  ;;  %p11961_p12 = scmp.ne.s32.totalorder %s12607_s4, %s11960_s27  ;;  %s54_s24 = int_to_ptr.vmem [resolvable:$true] %s53_s24 }
  0x5a   :  { %p11964_p13 = scmp.lt.u32.totalorder %s11960_s27, %s12607_s4 }
  0x5c   :  { %p11966_p0 = pnand %p11964_p13, %p11961_p12 }
  0x5e   :  { %11969 = shalt.err (!%p11966_p0)
}
  0x5f   :  { %s11970_s5 = scalar_lea.vmem %s54_s24, 16384  ;;  %p11975_p2 = scmp.lt.s32.totalorder %s54_s24, %s54_s24 }
  0x60   :  { %p11971_p1 = scmp.ne.s32.totalorder %s54_s24, %s11970_s5  ;;  %p11976_p3 = scmp.lt.s32.totalorder %s11970_s5, %s11970_s5 }
  0x62   :  { %p11977_p4 = por %p11976_p3, %p11975_p2 }
  0x64   :  { %p11978_p5 = pnand %p11977_p4, %p11971_p1 }
  0x66   :  { %11981 = shalt.err (!%p11978_p5)
}
  0x67   :  { %s12094_s2 = smov 1024   ;;  %s12095_s16 = smov [#allocation10]  }
  0x68   :  { %59 = dma.hbm_to_vmem [thread:$0]  %s12607_s4, 16384, %s54_s24, [#allocation6], %s12094_s2, %s12094_s2, %s12088_s7  }
  0x69   :  { %s75_s17 = sshll.u32 %s12095_s16, 4  ;;  %s12096_s19 = smov [#allocation13]   ;;  %s76_s17 = int_to_ptr.vmem [resolvable:$true] %s75_s17 }
  0x6a   :  { %s100_s21 = sshll.u32 %s12096_s19, 4  ;;  %s11982_s3 = scalar_lea.hbm %s12609_s6, 24576  ;;  %s101_s21 = int_to_ptr.vmem [resolvable:$true] %s100_s21 }
  0x6b   :  { %p11983_p6 = scmp.ne.s32.totalorder %s12609_s6, %s11982_s3  ;;  %p11986_p7 = scmp.lt.u32.totalorder %s11982_s3, %s12609_s6 }
  0x6d   :  { %p11988_p8 = pnand %p11986_p7, %p11983_p6 }
  0x6f   :  { %11991 = shalt.err (!%p11988_p8)
}
  0x70   :  { %s11992_s4 = scalar_lea.vmem %s76_s17, 24576  ;;  %p11997_p10 = scmp.lt.s32.totalorder %s76_s17, %s76_s17 }
  0x71   :  { %p11993_p9 = scmp.ne.s32.totalorder %s76_s17, %s11992_s4  ;;  %p11998_p11 = scmp.lt.s32.totalorder %s11992_s4, %s11992_s4 }
  0x73   :  { %p11999_p12 = por %p11998_p11, %p11997_p10 }
  0x75   :  { %p12000_p13 = pnand %p11999_p12, %p11993_p9 }
  0x77   :  { %12003 = shalt.err (!%p12000_p13)
}
  0x78   :  { %81 = dma.hbm_to_vmem [thread:$0]  %s12609_s6, 24576, %s76_s17, [#allocation9], %s12086_s20, %s12086_s20, %s12087_s14  }
  0x79   :  { %s12004_s29 = scalar_lea.hbm %s12611_s8, 64 }
  0x7a   :  { %p12005_p0 = scmp.ne.s32.totalorder %s12611_s8, %s12004_s29  ;;  %p12008_p1 = scmp.lt.u32.totalorder %s12004_s29, %s12611_s8 }
  0x7c   :  { %p12010_p2 = pnand %p12008_p1, %p12005_p0 }
  0x7e   :  { %12013 = shalt.err (!%p12010_p2)
}
  0x7f   :  { %s12014_s30 = scalar_lea.vmem %s101_s21, 64  ;;  %p12019_p4 = scmp.lt.s32.totalorder %s101_s21, %s101_s21 }
  0x80   :  { %p12015_p3 = scmp.ne.s32.totalorder %s101_s21, %s12014_s30  ;;  %p12020_p5 = scmp.lt.s32.totalorder %s12014_s30, %s12014_s30 }
  0x82   :  { %p12021_p6 = por %p12020_p5, %p12019_p4 }
  0x84   :  { %p12022_p7 = pnand %p12021_p6, %p12015_p3 }
  0x86   :  { %12025 = shalt.err (!%p12022_p7)
}
  0x87   :  { %103 = dma.hbm_to_vmem [thread:$0]  %s12611_s8, 64, %s101_s21, [#allocation12]  }
  0x88   :  { %s12097_s14 = smov [#allocation16]   ;;  %s12026_s19 = scalar_lea.hbm %s12613_s10, 16 }
  0x89   :  { %s122_s15 = sshll.u32 %s12097_s14, 4  ;;  %p12027_p8 = scmp.ne.s32.totalorder %s12613_s10, %s12026_s19  ;;  %s123_s15 = int_to_ptr.vmem [resolvable:$true] %s122_s15 }
  0x8a   :  { %p12030_p9 = scmp.lt.u32.totalorder %s12026_s19, %s12613_s10 }
  0x8c   :  { %p12032_p10 = pnand %p12030_p9, %p12027_p8 }
  0x8e   :  { %12035 = shalt.err (!%p12032_p10)
}
  0x8f   :  { %s12036_s22 = scalar_lea.vmem %s123_s15, 16  ;;  %s12040_s8 = scalar_lea.vmem %s123_s15, 32 }
  0x90   :  { %p12037_p11 = scmp.ne.s32.totalorder %s123_s15, %s12036_s22  ;;  %p12041_p12 = scmp.lt.s32.totalorder %s123_s15, %s123_s15 }
  0x91   :  { %p12042_p13 = scmp.lt.s32.totalorder %s12040_s8, %s12036_s22 }
  0x93   :  { %p12043_p0 = por %p12042_p13, %p12041_p12 }
  0x95   :  { %p12044_p1 = pnand %p12043_p0, %p12037_p11 }
  0x97   :  { %12047 = shalt.err (!%p12044_p1)
}
  0x98   :  { %125 = dma.hbm_to_vmem [thread:$0]  %s12613_s10, 16, %s123_s15, [#allocation15]  }
  0x99   :  { %12070 = dma.done.wait [#allocation3], 36864  }
  0x9a   :  { %12071 = vsyncadd [#allocation3], 4294930432 }
  0x9b   :  { %12072 = dma.done.wait [#allocation6], 16480  }
  0x9c   :  { %12073 = vsyncadd [#allocation6], 4294950816 }
  0x9d   :  { %12074 = dma.done.wait [#allocation9], 24832  }
  0x9e   :  { %12075 = vsyncadd [#allocation9], 4294942464 }
  0x9f   :  { %12076 = dma.done.wait [#allocation12], 65600  }
  0xa0   :  { %12077 = vsyncadd [#allocation12], 4294901696 }
  0xa1   :  { %12078 = dma.done.wait [#allocation15], 4112  }
  0xa2   :  { %12079 = vsyncadd [#allocation15], 4294963184  ;;  %v10316_v0 = vld [vmem:[#allocation2 + $0x4] ss:$24 sps:$4 sm:$0xff]   ;;  %v10320_v2 = vld [vmem:[#allocation2] ss:$24 sps:$4 sm:$0xff]   ;;  %v445_v36 = vlaneseq }
  0xa3   :  { %v10318_v1 = vld [vmem:[#allocation2 + $0xc] ss:$24 sps:$4 sm:$0xff]   ;;  %1969 = vmatprep.subr.bf16.mxu0 %v10316_v0  ;;  %v10321_v3 = vld [vmem:[#allocation2 + $0x8] ss:$24 sps:$4 sm:$0xff]   ;;  %v10324_v5 = vld [vmem:[#allocation2 + $0x3c] ss:$24 sps:$4 sm:$0xff]  }
  0xa4   :  { %2092 = vmatprep.subr.bf16.mxu1 %v10318_v1  ;;  %v10322_v4 = vld [vmem:[#allocation2 + $0x34] ss:$24 sps:$4 sm:$0xff]   ;;  %1970 = vmatpush1.bf16.msra.mxu0 %v10320_v2  ;;  %v10326_v6 = vld [vmem:[#allocation2 + $0x30] ss:$24 sps:$4 sm:$0xff]   ;;  %v10328_v8 = vld [vmem:[#allocation2 + $0x64] ss:$24 sps:$4 sm:$0xff]  }
  0xa5   :  { %2093 = vmatpush1.bf16.msra.mxu1 %v10321_v3  ;;  %1971 = vmatprep.subr.bf16.mxu0 %v10322_v4  ;;  %v10327_v7 = vld [vmem:[#allocation2 + $0x38] ss:$24 sps:$4 sm:$0xff]   ;;  %v10330_v9 = vld [vmem:[#allocation2 + $0x6c] ss:$24 sps:$4 sm:$0xff]   ;;  %v10333_v11 = vld [vmem:[#allocation2 + $0x68] ss:$24 sps:$4 sm:$0xff]  }
  0xa6   :  { %2094 = vmatprep.subr.bf16.mxu1 %v10324_v5  ;;  %v10332_v10 = vld [vmem:[#allocation2 + $0x60] ss:$24 sps:$4 sm:$0xff]   ;;  %v10334_v12 = vld [vmem:[#allocation2 + $0x94] ss:$24 sps:$4 sm:$0xff]   ;;  %v10338_v14 = vld [vmem:[#allocation2 + $0x90] ss:$24 sps:$4 sm:$0xff]  }
  0xa7   :  { %v10336_v13 = vld [vmem:[#allocation2 + $0x9c] ss:$24 sps:$4 sm:$0xff]   ;;  %v10339_v15 = vld [vmem:[#allocation2 + $0x98] ss:$24 sps:$4 sm:$0xff]   ;;  %v10342_v17 = vld [vmem:[#allocation2 + $0xcc] ss:$24 sps:$4 sm:$0xff]  }
  0xa8   :  { %1972 = vmatpush1.bf16.msra.mxu0 %v10326_v6  ;;  %v10340_v16 = vld [vmem:[#allocation2 + $0xc4] ss:$24 sps:$4 sm:$0xff]   ;;  %v10344_v18 = vld [vmem:[#allocation2 + $0xc0] ss:$24 sps:$4 sm:$0xff]   ;;  %v10346_v20 = vld [vmem:[#allocation2 + $0xf4] ss:$24 sps:$4 sm:$0xff]  }
  0xa9   :  { %2095 = vmatpush1.bf16.msra.mxu1 %v10327_v7  ;;  %1973 = vmatprep.subr.bf16.mxu0 %v10328_v8  ;;  %v10345_v19 = vld [vmem:[#allocation2 + $0xc8] ss:$24 sps:$4 sm:$0xff]   ;;  %v10348_v21 = vld [vmem:[#allocation2 + $0xfc] ss:$24 sps:$4 sm:$0xff]   ;;  %v10351_v23 = vld [vmem:[#allocation2 + $0xf8] ss:$24 sps:$4 sm:$0xff]  }
  0xaa   :  { %2096 = vmatprep.subr.bf16.mxu1 %v10330_v9  ;;  %v10350_v22 = vld [vmem:[#allocation2 + $0xf0] ss:$24 sps:$4 sm:$0xff]   ;;  %v10352_v24 = vld [vmem:[#allocation2 + $0x124] ss:$24 sps:$4 sm:$0xff]   ;;  %v10356_v26 = vld [vmem:[#allocation2 + $0x120] ss:$24 sps:$4 sm:$0xff]  }
  0xab   :  { %v10354_v25 = vld [vmem:[#allocation2 + $0x12c] ss:$24 sps:$4 sm:$0xff]   ;;  %v10357_v27 = vld [vmem:[#allocation2 + $0x128] ss:$24 sps:$4 sm:$0xff]   ;;  %v10360_v29 = vld [vmem:[#allocation2 + $0x15c] ss:$24 sps:$4 sm:$0xff]  }
  0xac   :  { %1974 = vmatpush1.bf16.msra.mxu0 %v10332_v10  ;;  %v10358_v28 = vld [vmem:[#allocation2 + $0x154] ss:$24 sps:$4 sm:$0xff]   ;;  %v10362_v30 = vld [vmem:[#allocation2 + $0x150] ss:$24 sps:$4 sm:$0xff]   ;;  %v10364_v32 = vld [vmem:[#allocation2 + $0x184] ss:$24 sps:$4 sm:$0xff]  }
  0xad   :  { %2097 = vmatpush1.bf16.msra.mxu1 %v10333_v11  ;;  %1975 = vmatprep.subr.bf16.mxu0 %v10334_v12  ;;  %v10363_v31 = vld [vmem:[#allocation2 + $0x158] ss:$24 sps:$4 sm:$0xff]   ;;  %v10366_v33 = vld [vmem:[#allocation2 + $0x18c] ss:$24 sps:$4 sm:$0xff]   ;;  %v10369_v35 = vld [vmem:[#allocation2 + $0x188] ss:$24 sps:$4 sm:$0xff]  }
  0xae   :  { %2098 = vmatprep.subr.bf16.mxu1 %v10336_v13  ;;  %v10368_v34 = vld [vmem:[#allocation2 + $0x180] ss:$24 sps:$4 sm:$0xff]   ;;  %v12098_v37 = vmov 1966171168   ;;  %v10370_v39 = vld [vmem:[#allocation2 + $0x1b4] ss:$24 sps:$4 sm:$0xff]  }
  0xaf   :  { %v478_v38 = vunpack.c.l.s4 %v12098_v37  ;;  %v10372_v40 = vld [vmem:[#allocation2 + $0x1bc] ss:$24 sps:$4 sm:$0xff]   ;;  %v10374_v41 = vld [vmem:[#allocation2 + $0x1b0] ss:$24 sps:$4 sm:$0xff]   ;;  %v12278_v42 = vshrl.u32 %v445_v36, 7 }
  0xb0   :  { %1976 = vmatpush1.bf16.msra.mxu0 %v10338_v14  ;;  %v10375_v44 = vld [vmem:[#allocation2 + $0x1b8] ss:$24 sps:$4 sm:$0xff]   ;;  %v10376_v45 = vld [vmem:[#allocation2 + $0x1e4] ss:$24 sps:$4 sm:$0xff]   ;;  %v10381_v48 = vld [vmem:[#allocation2 + $0x1e8] ss:$24 sps:$4 sm:$0xff]  }
  0xb1   :  { %2099 = vmatpush1.bf16.msra.mxu1 %v10339_v15  ;;  %1977 = vmatprep.subr.bf16.mxu0 %v10340_v16  ;;  %v479_v43 = vunpack.c.0.s8 %v478_v38  ;;  %v10378_v46 = vld [vmem:[#allocation2 + $0x1ec] ss:$24 sps:$4 sm:$0xff]   ;;  %v10380_v47 = vld [vmem:[#allocation2 + $0x1e0] ss:$24 sps:$4 sm:$0xff]   ;;  %v10384_v51 = vld [vmem:[#allocation2 + $0x21c] ss:$24 sps:$4 sm:$0xff]  }
  0xb2   :  { %2100 = vmatprep.subr.bf16.mxu1 %v10342_v17  ;;  %v10382_v50 = vld [vmem:[#allocation2 + $0x214] ss:$24 sps:$4 sm:$0xff]   ;;  %v154_v52 = vld [vmem:[%s12603_s0] sm:$0x3f]  ;;  %v10386_v53 = vld [vmem:[#allocation2 + $0x210] ss:$24 sps:$4 sm:$0xff]  }
  0xb3   :  { %v482_v49 = vsub.s32 %v479_v43, %v12278_v42  ;;  %v10387_v55 = vld [vmem:[#allocation2 + $0x218] ss:$24 sps:$4 sm:$0xff]   ;;  %v10388_v56 = vld [vmem:[#allocation2 + $0x244] ss:$24 sps:$4 sm:$0xff]   ;;  %v10393_v61 = vld [vmem:[#allocation2 + $0x248] ss:$24 sps:$4 sm:$0xff]   ;;  %v476_v8 = vcombine.high %v154_v52, %v154_v52 }
  0xb4   :  { %1978 = vmatpush1.bf16.msra.mxu0 %v10344_v18  ;;  %v10390_v57 = vld [vmem:[#allocation2 + $0x24c] ss:$24 sps:$4 sm:$0xff]   ;;  %v10392_v59 = vld [vmem:[#allocation2 + $0x240] ss:$24 sps:$4 sm:$0xff]   ;;  %v10396_v63 = vld [vmem:[#allocation2 + $0x27c] ss:$24 sps:$4 sm:$0xff]  }
  0xb5   :  { %2101 = vmatpush1.bf16.msra.mxu1 %v10345_v19  ;;  %1979 = vmatprep.subr.bf16.mxu0 %v10346_v20  ;;  %v483_v54 = vrot.slane %v154_v52, %v482_v49  ;;  %v10394_v62 = vld [vmem:[#allocation2 + $0x274] ss:$24 sps:$4 sm:$0xff]   ;;  %v10398_v0 = vld [vmem:[#allocation2 + $0x270] ss:$24 sps:$4 sm:$0xff]   ;;  %v10400_v2 = vld [vmem:[#allocation2 + $0x2a4] ss:$24 sps:$4 sm:$0xff]   ;;  %v490_v11 = vrot.slane %v476_v8, %v482_v49 }
  0xb6   :  { %2102 = vmatprep.subr.bf16.mxu1 %v10348_v21  ;;  %v10399_v1 = vld [vmem:[#allocation2 + $0x278] ss:$24 sps:$4 sm:$0xff]   ;;  %v10402_v3 = vld [vmem:[#allocation2 + $0x2ac] ss:$24 sps:$4 sm:$0xff]   ;;  %v10405_v5 = vld [vmem:[#allocation2 + $0x2a8] ss:$24 sps:$4 sm:$0xff]  }
  0xb7   :  { %v491_v58 = vcombine.high %v483_v54, %v483_v54  ;;  %v10404_v4 = vld [vmem:[#allocation2 + $0x2a0] ss:$24 sps:$4 sm:$0xff]   ;;  %v10406_v6 = vld [vmem:[#allocation2 + $0x2d4] ss:$24 sps:$4 sm:$0xff]   ;;  %v10410_v9 = vld [vmem:[#allocation2 + $0x2d0] ss:$24 sps:$4 sm:$0xff]   ;;  %v492_v14 = vcombine.high %v490_v11, %v490_v11  ;;  %v12288_v16 = vrot.slane %v483_v54, %v482_v49  ;;  %v12292_v19 = vrot.slane %v490_v11, %v482_v49 }
  0xb8   :  { %1980 = vmatpush1.bf16.msra.mxu0 %v10350_v22  ;;  %v10408_v7 = vld [vmem:[#allocation2 + $0x2dc] ss:$24 sps:$4 sm:$0xff]   ;;  %v10411_v10 = vld [vmem:[#allocation2 + $0x2d8] ss:$24 sps:$4 sm:$0xff]   ;;  %v10417_v13 = vld [vmem:[#allocation2 + $0x30c] ss:$24 sps:$4 sm:$0xff]  }
  0xb9   :  { %2103 = vmatpush1.bf16.msra.mxu1 %v10351_v23  ;;  %1981 = vmatprep.subr.bf16.mxu0 %v10352_v24  ;;  %v12284_v60 = vrot.slane %v491_v58, %v482_v49  ;;  %v10414_v12 = vld [vmem:[#allocation2 + $0x304] ss:$24 sps:$4 sm:$0xff]   ;;  %v10412_v15 = vld [vmem:[#allocation2 + $0x300] ss:$24 sps:$4 sm:$0xff]   ;;  %v12290_v18 = vrot.slane %v492_v14, %v482_v49  ;;  %v10420_v20 = vld [vmem:[#allocation2 + $0x334] ss:$24 sps:$4 sm:$0xff]  }
  0xba   :  { %2104 = vmatprep.subr.bf16.mxu1 %v10354_v25  ;;  %v10415_v17 = vld [vmem:[#allocation2 + $0x308] ss:$24 sps:$4 sm:$0xff]   ;;  %v10423_v21 = vld [vmem:[#allocation2 + $0x33c] ss:$24 sps:$4 sm:$0xff]   ;;  %v10421_v24 = vld [vmem:[#allocation2 + $0x338] ss:$24 sps:$4 sm:$0xff]  }
  0xbb   :  { %2001 = vmatprep.mubr.bf16.mxu0 %v12284_v60  ;;  %2124 = vmatprep.mubr.bf16.mxu1 %v12284_v60  ;;  %v12296_v22 = vcombine.high %v12284_v60, %v12284_v60  ;;  %v10418_v23 = vld [vmem:[#allocation2 + $0x330] ss:$24 sps:$4 sm:$0xff]   ;;  %v10426_v25 = vld [vmem:[#allocation2 + $0x364] ss:$24 sps:$4 sm:$0xff]   ;;  %v10444_v37 = vld [vmem:[#allocation2 + $0x3f4] ss:$24 sps:$4 sm:$0xff]  }
  0xbc   :  { %1982 = vmatpush1.bf16.msra.mxu0 %v10356_v26  ;;  %v10429_v26 = vld [vmem:[#allocation2 + $0x36c] ss:$24 sps:$4 sm:$0xff]   ;;  %v10439_v36 = vld [vmem:[#allocation2 + $0x3c8] ss:$24 sps:$4 sm:$0xff]   ;;  %v10447_v38 = vld [vmem:[#allocation2 + $0x3fc] ss:$24 sps:$4 sm:$0xff]  }
  0xbd   :  { %2105 = vmatpush1.bf16.msra.mxu1 %v10357_v27  ;;  %1983 = vmatprep.subr.bf16.mxu0 %v10358_v28  ;;  %v10424_v27 = vld [vmem:[#allocation2 + $0x360] ss:$24 sps:$4 sm:$0xff]   ;;  %v10453_v43 = vld [vmem:[#allocation2 + $0x42c] ss:$24 sps:$4 sm:$0xff]   ;;  %v10495_v8 = vld [vmem:[#allocation2 + $0x57c] ss:$24 sps:$4 sm:$0xff]  }
  0xbe   :  { %2106 = vmatprep.subr.bf16.mxu1 %v10360_v29  ;;  %v10427_v28 = vld [vmem:[#allocation2 + $0x368] ss:$24 sps:$4 sm:$0xff]   ;;  %v10432_v29 = vld [vmem:[#allocation2 + $0x394] ss:$24 sps:$4 sm:$0xff]   ;;  %v10457_v49 = vld [vmem:[#allocation2 + $0x458] ss:$24 sps:$4 sm:$0xff]  }
  0xbf   :  { %v10460_v52 = vld [vmem:[#allocation2 + $0x480] ss:$24 sps:$4 sm:$0xff]   ;;  %v10468_v54 = vld [vmem:[#allocation2 + $0x4b4] ss:$24 sps:$4 sm:$0xff]   ;;  %v10474_v58 = vld [vmem:[#allocation2 + $0x4e4] ss:$24 sps:$4 sm:$0xff]  }
  0xc0   :  { %1984 = vmatpush1.bf16.msra.mxu0 %v10362_v30  ;;  %v10435_v30 = vld [vmem:[#allocation2 + $0x39c] ss:$24 sps:$4 sm:$0xff]   ;;  %v10499_v14 = vld [vmem:[#allocation2 + $0x5a8] ss:$24 sps:$4 sm:$0xff]  }
  0xc1   :  { %2107 = vmatpush1.bf16.msra.mxu1 %v10363_v31  ;;  %1985 = vmatprep.subr.bf16.mxu0 %v10364_v32  ;;  %v10430_v31 = vld [vmem:[#allocation2 + $0x390] ss:$24 sps:$4 sm:$0xff]   ;;  %v10498_v11 = vld [vmem:[#allocation2 + $0x5a4] ss:$24 sps:$4 sm:$0xff]  }
  0xc2   :  { %2108 = vmatprep.subr.bf16.mxu1 %v10366_v33  ;;  %v10433_v32 = vld [vmem:[#allocation2 + $0x398] ss:$24 sps:$4 sm:$0xff]   ;;  %v10438_v33 = vld [vmem:[#allocation2 + $0x3c4] ss:$24 sps:$4 sm:$0xff]  }
  0xc4   :  { %1986 = vmatpush1.bf16.msra.mxu0 %v10368_v34  ;;  %v10441_v34 = vld [vmem:[#allocation2 + $0x3cc] ss:$24 sps:$4 sm:$0xff]  }
  0xc5   :  { %2109 = vmatpush1.bf16.msra.mxu1 %v10369_v35  ;;  %1987 = vmatprep.subr.bf16.mxu0 %v10370_v39  ;;  %v10436_v35 = vld [vmem:[#allocation2 + $0x3c0] ss:$24 sps:$4 sm:$0xff]   ;;  %v10442_v39 = vld [vmem:[#allocation2 + $0x3f0] ss:$24 sps:$4 sm:$0xff]  }
  0xc6   :  { %2110 = vmatprep.subr.bf16.mxu1 %v10372_v40  ;;  %v10445_v40 = vld [vmem:[#allocation2 + $0x3f8] ss:$24 sps:$4 sm:$0xff]  }
  0xc8   :  { %1988 = vmatpush1.bf16.msra.mxu0 %v10374_v41  ;;  %v10450_v41 = vld [vmem:[#allocation2 + $0x424] ss:$24 sps:$4 sm:$0xff]  }
  0xc9   :  { %2111 = vmatpush1.bf16.msra.mxu1 %v10375_v44  ;;  %1989 = vmatprep.subr.bf16.mxu0 %v10376_v45  ;;  %v10448_v44 = vld [vmem:[#allocation2 + $0x420] ss:$24 sps:$4 sm:$0xff]  }
  0xca   :  { %2112 = vmatprep.subr.bf16.mxu1 %v10378_v46  ;;  %v10451_v45 = vld [vmem:[#allocation2 + $0x428] ss:$24 sps:$4 sm:$0xff]   ;;  %v10456_v46 = vld [vmem:[#allocation2 + $0x454] ss:$24 sps:$4 sm:$0xff]  }
  0xcc   :  { %1990 = vmatpush1.bf16.msra.mxu0 %v10380_v47  ;;  %v10459_v47 = vld [vmem:[#allocation2 + $0x45c] ss:$24 sps:$4 sm:$0xff]  }
  0xcd   :  { %2113 = vmatpush1.bf16.msra.mxu1 %v10381_v48  ;;  %1991 = vmatprep.subr.bf16.mxu0 %v10382_v50  ;;  %v10454_v48 = vld [vmem:[#allocation2 + $0x450] ss:$24 sps:$4 sm:$0xff]   ;;  %v10462_v50 = vld [vmem:[#allocation2 + $0x484] ss:$24 sps:$4 sm:$0xff]  }
  0xce   :  { %2114 = vmatprep.subr.bf16.mxu1 %v10384_v51  ;;  %v10465_v51 = vld [vmem:[#allocation2 + $0x48c] ss:$24 sps:$4 sm:$0xff]  }
  0xd0   :  { %1992 = vmatpush1.bf16.msra.mxu0 %v10386_v53  ;;  %v10463_v53 = vld [vmem:[#allocation2 + $0x488] ss:$24 sps:$4 sm:$0xff]  }
  0xd1   :  { %2115 = vmatpush1.bf16.msra.mxu1 %v10387_v55  ;;  %1993 = vmatprep.subr.bf16.mxu0 %v10388_v56  ;;  %v10471_v55 = vld [vmem:[#allocation2 + $0x4bc] ss:$24 sps:$4 sm:$0xff]   ;;  %v10466_v56 = vld [vmem:[#allocation2 + $0x4b0] ss:$24 sps:$4 sm:$0xff]  }
  0xd2   :  { %2116 = vmatprep.subr.bf16.mxu1 %v10390_v57  ;;  %v10469_v57 = vld [vmem:[#allocation2 + $0x4b8] ss:$24 sps:$4 sm:$0xff]  }
  0xd4   :  { %1994 = vmatpush1.bf16.msra.mxu0 %v10392_v59  ;;  %v10477_v59 = vld [vmem:[#allocation2 + $0x4ec] ss:$24 sps:$4 sm:$0xff]  }
  0xd5   :  { %2117 = vmatpush1.bf16.msra.mxu1 %v10393_v61  ;;  %1995 = vmatprep.subr.bf16.mxu0 %v10394_v62  ;;  %v10472_v61 = vld [vmem:[#allocation2 + $0x4e0] ss:$24 sps:$4 sm:$0xff]  }
  0xd6   :  { %2118 = vmatprep.subr.bf16.mxu1 %v10396_v63  ;;  %v10475_v62 = vld [vmem:[#allocation2 + $0x4e8] ss:$24 sps:$4 sm:$0xff]   ;;  %v10480_v63 = vld [vmem:[#allocation2 + $0x514] ss:$24 sps:$4 sm:$0xff]  }
  0xd8   :  { %1996 = vmatpush1.bf16.msra.mxu0 %v10398_v0  ;;  %v10483_v0 = vld [vmem:[#allocation2 + $0x51c] ss:$24 sps:$4 sm:$0xff]  }
  0xd9   :  { %2119 = vmatpush1.bf16.msra.mxu1 %v10399_v1  ;;  %1997 = vmatprep.subr.bf16.mxu0 %v10400_v2  ;;  %v10478_v1 = vld [vmem:[#allocation2 + $0x510] ss:$24 sps:$4 sm:$0xff]  }
  0xda   :  { %2120 = vmatprep.subr.bf16.mxu1 %v10402_v3  ;;  %v10481_v2 = vld [vmem:[#allocation2 + $0x518] ss:$24 sps:$4 sm:$0xff]   ;;  %v10486_v3 = vld [vmem:[#allocation2 + $0x544] ss:$24 sps:$4 sm:$0xff]  }
  0xdc   :  { %1998 = vmatpush1.bf16.msra.mxu0 %v10404_v4  ;;  %v10489_v4 = vld [vmem:[#allocation2 + $0x54c] ss:$24 sps:$4 sm:$0xff]  }
  0xdd   :  { %2121 = vmatpush1.bf16.msra.mxu1 %v10405_v5  ;;  %1999 = vmatprep.subr.bf16.mxu0 %v10406_v6  ;;  %v10484_v5 = vld [vmem:[#allocation2 + $0x540] ss:$24 sps:$4 sm:$0xff]  }
  0xde   :  { %2122 = vmatprep.subr.bf16.mxu1 %v10408_v7  ;;  %v10487_v6 = vld [vmem:[#allocation2 + $0x548] ss:$24 sps:$4 sm:$0xff]   ;;  %v10492_v7 = vld [vmem:[#allocation2 + $0x574] ss:$24 sps:$4 sm:$0xff]  }
  0xe0   :  { %2000 = vmatpush1.bf16.msra.mxu0 %v10410_v9  ;;  %v10490_v9 = vld [vmem:[#allocation2 + $0x570] ss:$24 sps:$4 sm:$0xff]  }
  0xe1   :  { %2123 = vmatpush1.bf16.msra.mxu1 %v10411_v10  ;;  %2010 = vmatprep.subr.bf16.mxu0 %v10414_v12  ;;  %v10493_v10 = vld [vmem:[#allocation2 + $0x578] ss:$24 sps:$4 sm:$0xff]   ;;  %v10501_v12 = vld [vmem:[#allocation2 + $0x5ac] ss:$24 sps:$4 sm:$0xff]  }
  0xe2   :  { %2133 = vmatprep.subr.bf16.mxu1 %v10417_v13  ;;  %v10496_v13 = vld [vmem:[#allocation2 + $0x5a0] ss:$24 sps:$4 sm:$0xff]  }
  0xe3   :  { %2002 = vmatmul.mubr.bf16.vlgmr.msra.gmra.mrb[0].mxu0 %v12288_v16 }
  0xe4   :  { %2125 = vmatmul.mubr.bf16.vlgmr.msra.gmra.mrb[0].mxu1 %v12288_v16  ;;  %2011 = vmatpush1.bf16.msra.mxu0 %v10412_v15  ;;  %v10504_v15 = vld [vmem:[#allocation2 + $0x5d4] ss:$24 sps:$4 sm:$0xff]  }
  0xe5   :  { %2134 = vmatpush1.bf16.msra.mxu1 %v10415_v17  ;;  %2012 = vmatprep.subr.bf16.mxu0 %v10420_v20  ;;  %v10507_v17 = vld [vmem:[#allocation2 + $0x5dc] ss:$24 sps:$4 sm:$0xff]   ;;  %v10502_v20 = vld [vmem:[#allocation2 + $0x5d0] ss:$24 sps:$4 sm:$0xff]  }
  0xe6   :  { %2135 = vmatprep.subr.bf16.mxu1 %v10423_v21  ;;  %2042 = vmatprep.mubr.bf16.mxu0 %v12296_v22  ;;  %v10505_v21 = vld [vmem:[#allocation2 + $0x5d8] ss:$24 sps:$4 sm:$0xff]  }
  0xe7   :  { %2165 = vmatprep.mubr.bf16.mxu1 %v12296_v22 }
  0xe8   :  { %2013 = vmatpush1.bf16.msra.mxu0 %v10418_v23  ;;  %v10510_v23 = vld [vmem:[#allocation2 + $0x604] ss:$24 sps:$4 sm:$0xff]  }
  0xe9   :  { %2136 = vmatpush1.bf16.msra.mxu1 %v10421_v24  ;;  %2014 = vmatprep.subr.bf16.mxu0 %v10426_v25  ;;  %v10513_v24 = vld [vmem:[#allocation2 + $0x60c] ss:$24 sps:$4 sm:$0xff]   ;;  %v10508_v25 = vld [vmem:[#allocation2 + $0x600] ss:$24 sps:$4 sm:$0xff]  }
  0xea   :  { %2137 = vmatprep.subr.bf16.mxu1 %v10429_v26  ;;  %v12304_v26 = vcombine.high %v12288_v16, %v12288_v16 }
  0xec   :  { %2015 = vmatpush1.bf16.msra.mxu0 %v10424_v27  ;;  %v10511_v27 = vld [vmem:[#allocation2 + $0x608] ss:$24 sps:$4 sm:$0xff]  }
  0xed   :  { %2138 = vmatpush1.bf16.msra.mxu1 %v10427_v28  ;;  %2016 = vmatprep.subr.bf16.mxu0 %v10432_v29  ;;  %v10516_v28 = vld [vmem:[#allocation2 + $0x634] ss:$24 sps:$4 sm:$0xff]  }
  0xee   :  { %2139 = vmatprep.subr.bf16.mxu1 %v10435_v30  ;;  %v10519_v29 = vld [vmem:[#allocation2 + $0x63c] ss:$24 sps:$4 sm:$0xff]   ;;  %v10514_v30 = vld [vmem:[#allocation2 + $0x630] ss:$24 sps:$4 sm:$0xff]  }
  0xf0   :  { %2017 = vmatpush1.bf16.msra.mxu0 %v10430_v31  ;;  %v10517_v31 = vld [vmem:[#allocation2 + $0x638] ss:$24 sps:$4 sm:$0xff]  }
  0xf1   :  { %2140 = vmatpush1.bf16.msra.mxu1 %v10433_v32  ;;  %2018 = vmatprep.subr.bf16.mxu0 %v10438_v33  ;;  %v10522_v32 = vld [vmem:[#allocation2 + $0x664] ss:$24 sps:$4 sm:$0xff]  }
  0xf2   :  { %2141 = vmatprep.subr.bf16.mxu1 %v10441_v34  ;;  %v10525_v33 = vld [vmem:[#allocation2 + $0x66c] ss:$24 sps:$4 sm:$0xff]   ;;  %v10520_v34 = vld [vmem:[#allocation2 + $0x660] ss:$24 sps:$4 sm:$0xff]  }
  0xf4   :  { %2019 = vmatpush1.bf16.msra.mxu0 %v10436_v35  ;;  %v10523_v35 = vld [vmem:[#allocation2 + $0x668] ss:$24 sps:$4 sm:$0xff]  }
  0xf5   :  { %2142 = vmatpush1.bf16.msra.mxu1 %v10439_v36  ;;  %2020 = vmatprep.subr.bf16.mxu0 %v10444_v37  ;;  %v10528_v36 = vld [vmem:[#allocation2 + $0x694] ss:$24 sps:$4 sm:$0xff]  }
  0xf6   :  { %2143 = vmatprep.subr.bf16.mxu1 %v10447_v38  ;;  %v10531_v37 = vld [vmem:[#allocation2 + $0x69c] ss:$24 sps:$4 sm:$0xff]   ;;  %v10526_v38 = vld [vmem:[#allocation2 + $0x690] ss:$24 sps:$4 sm:$0xff]  }
  0xf8   :  { %2021 = vmatpush1.bf16.msra.mxu0 %v10442_v39  ;;  %v10529_v39 = vld [vmem:[#allocation2 + $0x698] ss:$24 sps:$4 sm:$0xff]  }
  0xf9   :  { %2144 = vmatpush1.bf16.msra.mxu1 %v10445_v40  ;;  %2022 = vmatprep.subr.bf16.mxu0 %v10450_v41  ;;  %v10534_v40 = vld [vmem:[#allocation2 + $0x6c4] ss:$24 sps:$4 sm:$0xff]  }
  0xfa   :  { %2145 = vmatprep.subr.bf16.mxu1 %v10453_v43  ;;  %v10537_v41 = vld [vmem:[#allocation2 + $0x6cc] ss:$24 sps:$4 sm:$0xff]   ;;  %v10532_v43 = vld [vmem:[#allocation2 + $0x6c0] ss:$24 sps:$4 sm:$0xff]  }
  0xfc   :  { %2023 = vmatpush1.bf16.msra.mxu0 %v10448_v44  ;;  %v10535_v44 = vld [vmem:[#allocation2 + $0x6c8] ss:$24 sps:$4 sm:$0xff]  }
  0xfd   :  { %2146 = vmatpush1.bf16.msra.mxu1 %v10451_v45  ;;  %2024 = vmatprep.subr.bf16.mxu0 %v10456_v46  ;;  %v10540_v45 = vld [vmem:[#allocation2 + $0x6f4] ss:$24 sps:$4 sm:$0xff]  }
  0xfe   :  { %2147 = vmatprep.subr.bf16.mxu1 %v10459_v47  ;;  %v10543_v46 = vld [vmem:[#allocation2 + $0x6fc] ss:$24 sps:$4 sm:$0xff]   ;;  %v10538_v47 = vld [vmem:[#allocation2 + $0x6f0] ss:$24 sps:$4 sm:$0xff]  }
 0x100   :  { %2025 = vmatpush1.bf16.msra.mxu0 %v10454_v48  ;;  %v10541_v48 = vld [vmem:[#allocation2 + $0x6f8] ss:$24 sps:$4 sm:$0xff]  }
 0x101   :  { %2148 = vmatpush1.bf16.msra.mxu1 %v10457_v49  ;;  %2026 = vmatprep.subr.bf16.mxu0 %v10462_v50  ;;  %v10546_v49 = vld [vmem:[#allocation2 + $0x724] ss:$24 sps:$4 sm:$0xff]  }
 0x102   :  { %2149 = vmatprep.subr.bf16.mxu1 %v10465_v51  ;;  %v10549_v50 = vld [vmem:[#allocation2 + $0x72c] ss:$24 sps:$4 sm:$0xff]   ;;  %v10544_v51 = vld [vmem:[#allocation2 + $0x720] ss:$24 sps:$4 sm:$0xff]  }
 0x104   :  { %2027 = vmatpush1.bf16.msra.mxu0 %v10460_v52  ;;  %v10547_v52 = vld [vmem:[#allocation2 + $0x728] ss:$24 sps:$4 sm:$0xff]  }
 0x105   :  { %2150 = vmatpush1.bf16.msra.mxu1 %v10463_v53  ;;  %2028 = vmatprep.subr.bf16.mxu0 %v10468_v54  ;;  %v10552_v53 = vld [vmem:[#allocation2 + $0x754] ss:$24 sps:$4 sm:$0xff]  }
 0x106   :  { %2151 = vmatprep.subr.bf16.mxu1 %v10471_v55  ;;  %v10555_v54 = vld [vmem:[#allocation2 + $0x75c] ss:$24 sps:$4 sm:$0xff]   ;;  %v10550_v55 = vld [vmem:[#allocation2 + $0x750] ss:$24 sps:$4 sm:$0xff]  }
 0x108   :  { %2029 = vmatpush1.bf16.msra.mxu0 %v10466_v56  ;;  %v10553_v56 = vld [vmem:[#allocation2 + $0x758] ss:$24 sps:$4 sm:$0xff]  }
 0x109   :  { %2152 = vmatpush1.bf16.msra.mxu1 %v10469_v57  ;;  %2030 = vmatprep.subr.bf16.mxu0 %v10474_v58  ;;  %v10558_v57 = vld [vmem:[#allocation2 + $0x784] ss:$24 sps:$4 sm:$0xff]  }
 0x10a   :  { %2153 = vmatprep.subr.bf16.mxu1 %v10477_v59  ;;  %v10561_v58 = vld [vmem:[#allocation2 + $0x78c] ss:$24 sps:$4 sm:$0xff]   ;;  %v10556_v59 = vld [vmem:[#allocation2 + $0x780] ss:$24 sps:$4 sm:$0xff]  }
 0x10c   :  { %2031 = vmatpush1.bf16.msra.mxu0 %v10472_v61  ;;  %v10559_v61 = vld [vmem:[#allocation2 + $0x788] ss:$24 sps:$4 sm:$0xff]  }
 0x10d   :  { %2154 = vmatpush1.bf16.msra.mxu1 %v10475_v62  ;;  %2032 = vmatprep.subr.bf16.mxu0 %v10480_v63  ;;  %v10564_v62 = vld [vmem:[#allocation2 + $0x7b4] ss:$24 sps:$4 sm:$0xff]  }
 0x10e   :  { %2155 = vmatprep.subr.bf16.mxu1 %v10483_v0  ;;  %v10567_v63 = vld [vmem:[#allocation2 + $0x7bc] ss:$24 sps:$4 sm:$0xff]   ;;  %v10562_v0 = vld [vmem:[#allocation2 + $0x7b0] ss:$24 sps:$4 sm:$0xff]  }
 0x110   :  { %2033 = vmatpush1.bf16.msra.mxu0 %v10478_v1  ;;  %v10565_v1 = vld [vmem:[#allocation2 + $0x7b8] ss:$24 sps:$4 sm:$0xff]  }
 0x111   :  { %2156 = vmatpush1.bf16.msra.mxu1 %v10481_v2  ;;  %2034 = vmatprep.subr.bf16.mxu0 %v10486_v3  ;;  %v10570_v2 = vld [vmem:[#allocation2 + $0x7e4] ss:$24 sps:$4 sm:$0xff]  }
 0x112   :  { %2157 = vmatprep.subr.bf16.mxu1 %v10489_v4  ;;  %v10573_v3 = vld [vmem:[#allocation2 + $0x7ec] ss:$24 sps:$4 sm:$0xff]   ;;  %v10568_v4 = vld [vmem:[#allocation2 + $0x7e0] ss:$24 sps:$4 sm:$0xff]  }
 0x114   :  { %2035 = vmatpush1.bf16.msra.mxu0 %v10484_v5  ;;  %v10571_v5 = vld [vmem:[#allocation2 + $0x7e8] ss:$24 sps:$4 sm:$0xff]  }
 0x115   :  { %2158 = vmatpush1.bf16.msra.mxu1 %v10487_v6  ;;  %2036 = vmatprep.subr.bf16.mxu0 %v10492_v7  ;;  %v10576_v6 = vld [vmem:[#allocation2 + $0x814] ss:$24 sps:$4 sm:$0xff]  }
 0x116   :  { %2159 = vmatprep.subr.bf16.mxu1 %v10495_v8  ;;  %v10579_v7 = vld [vmem:[#allocation2 + $0x81c] ss:$24 sps:$4 sm:$0xff]   ;;  %v10574_v8 = vld [vmem:[#allocation2 + $0x810] ss:$24 sps:$4 sm:$0xff]  }
 0x118   :  { %2037 = vmatpush1.bf16.msra.mxu0 %v10490_v9  ;;  %v10577_v9 = vld [vmem:[#allocation2 + $0x818] ss:$24 sps:$4 sm:$0xff]  }
 0x119   :  { %2160 = vmatpush1.bf16.msra.mxu1 %v10493_v10  ;;  %2038 = vmatprep.subr.bf16.mxu0 %v10498_v11  ;;  %v10582_v10 = vld [vmem:[#allocation2 + $0x844] ss:$24 sps:$4 sm:$0xff]  }
 0x11a   :  { %2161 = vmatprep.subr.bf16.mxu1 %v10501_v12  ;;  %v10585_v11 = vld [vmem:[#allocation2 + $0x84c] ss:$24 sps:$4 sm:$0xff]   ;;  %v10580_v12 = vld [vmem:[#allocation2 + $0x840] ss:$24 sps:$4 sm:$0xff]  }
 0x11c   :  { %2039 = vmatpush1.bf16.msra.mxu0 %v10496_v13  ;;  %v10583_v13 = vld [vmem:[#allocation2 + $0x848] ss:$24 sps:$4 sm:$0xff]  }
 0x11d   :  { %2162 = vmatpush1.bf16.msra.mxu1 %v10499_v14  ;;  %2040 = vmatprep.subr.bf16.mxu0 %v10504_v15  ;;  %v10588_v14 = vld [vmem:[#allocation2 + $0x874] ss:$24 sps:$4 sm:$0xff]  }
 0x11e   :  { %2163 = vmatprep.subr.bf16.mxu1 %v10507_v17  ;;  %v10591_v15 = vld [vmem:[#allocation2 + $0x87c] ss:$24 sps:$4 sm:$0xff]   ;;  %v10586_v17 = vld [vmem:[#allocation2 + $0x870] ss:$24 sps:$4 sm:$0xff]  }
 0x120   :  { %2041 = vmatpush1.bf16.msra.mxu0 %v10502_v20  ;;  %v10589_v20 = vld [vmem:[#allocation2 + $0x878] ss:$24 sps:$4 sm:$0xff]  }
 0x121   :  { %2164 = vmatpush1.bf16.msra.mxu1 %v10505_v21  ;;  %2051 = vmatprep.subr.bf16.mxu0 %v10510_v23  ;;  %v10594_v21 = vld [vmem:[#allocation2 + $0x8a4] ss:$24 sps:$4 sm:$0xff]  }
 0x122   :  { %2174 = vmatprep.subr.bf16.mxu1 %v10513_v24  ;;  %v10597_v23 = vld [vmem:[#allocation2 + $0x8ac] ss:$24 sps:$4 sm:$0xff]   ;;  %v10592_v24 = vld [vmem:[#allocation2 + $0x8a0] ss:$24 sps:$4 sm:$0xff]  }
 0x123   :  { %2043 = vmatmul.mubr.bf16.vlgmr.msra.gmra.mrb[0].mxu0 %v12304_v26 }
 0x124   :  { %2166 = vmatmul.mubr.bf16.vlgmr.msra.gmra.mrb[0].mxu1 %v12304_v26  ;;  %2052 = vmatpush1.bf16.msra.mxu0 %v10508_v25  ;;  %v10595_v25 = vld [vmem:[#allocation2 + $0x8a8] ss:$24 sps:$4 sm:$0xff]  }
 0x125   :  { %2175 = vmatpush1.bf16.msra.mxu1 %v10511_v27  ;;  %2053 = vmatprep.subr.bf16.mxu0 %v10516_v28  ;;  %v10600_v27 = vld [vmem:[#allocation2 + $0x8d4] ss:$24 sps:$4 sm:$0xff]  }
 0x126   :  { %2176 = vmatprep.subr.bf16.mxu1 %v10519_v29  ;;  %2083 = vmatprep.mubr.bf16.mxu0 %v12290_v18  ;;  %v10603_v28 = vld [vmem:[#allocation2 + $0x8dc] ss:$24 sps:$4 sm:$0xff]   ;;  %v2345_v29 = vld [vmem:[#allocation7] sm:$0xff] }
 0x127   :  { %2206 = vmatprep.mubr.bf16.mxu1 %v12290_v18 }
 0x128   :  { %2054 = vmatpush1.bf16.msra.mxu0 %v10514_v30  ;;  %v2353_v30 = vld [vmem:[#allocation7 + $0x40] sm:$0xff] }
 0x129   :  { %2177 = vmatpush1.bf16.msra.mxu1 %v10517_v31  ;;  %2055 = vmatprep.subr.bf16.mxu0 %v10522_v32  ;;  %v10598_v31 = vld [vmem:[#allocation2 + $0x8d0] ss:$24 sps:$4 sm:$0xff]  }
 0x12a   :  { %2178 = vmatprep.subr.bf16.mxu1 %v10525_v33  ;;  %v10601_v32 = vld [vmem:[#allocation2 + $0x8d8] ss:$24 sps:$4 sm:$0xff]   ;;  %v10607_v33 = vld [vmem:[#allocation2 + $0x14] ss:$24 sps:$4 sm:$0xff]  }
 0x12c   :  { %2056 = vmatpush1.bf16.msra.mxu0 %v10520_v34  ;;  %v9359_v34 = vcombine.high %v2345_v29, %v2353_v30 }
 0x12d   :  { %2179 = vmatpush1.bf16.msra.mxu1 %v10523_v35  ;;  %2057 = vmatprep.subr.bf16.mxu0 %v10528_v36  ;;  %v2361_v35 = vld [vmem:[#allocation7 + $0x80] sm:$0xff] }
 0x12e   :  { %2180 = vmatprep.subr.bf16.mxu1 %v10531_v37  ;;  %v2369_v36 = vld [vmem:[#allocation7 + $0xc0] sm:$0xff] }
 0x12f   :  { %v10605_v37 = vld [vmem:[#allocation2 + $0x10] ss:$24 sps:$4 sm:$0xff]  }
 0x130   :  { %2058 = vmatpush1.bf16.msra.mxu0 %v10526_v38  ;;  %v9358_v38 = vcombine.low %v2345_v29, %v2353_v30  ;;  %v12317_v29 = vld [vmem:[%s12604_s1] sm:$0x1] }
 0x131   :  { %2181 = vmatpush1.bf16.msra.mxu1 %v10529_v39  ;;  %2059 = vmatprep.subr.bf16.mxu0 %v10534_v40  ;;  %v10610_v39 = vld [vmem:[#allocation2 + $0x44] ss:$24 sps:$4 sm:$0xff]   ;;  %v9375_v40 = vcombine.high %v2361_v35, %v2369_v36 }
 0x132   :  { %2182 = vmatprep.subr.bf16.mxu1 %v10537_v41  ;;  %v2377_v41 = vld [vmem:[#allocation7 + $0x100] sm:$0xff] }
 0x134   :  { %2060 = vmatpush1.bf16.msra.mxu0 %v10532_v43  ;;  %v2385_v43 = vld [vmem:[#allocation7 + $0x140] sm:$0xff] }
 0x135   :  { %2183 = vmatpush1.bf16.msra.mxu1 %v10535_v44  ;;  %2061 = vmatprep.subr.bf16.mxu0 %v10540_v45  ;;  %v10608_v44 = vld [vmem:[#allocation2 + $0x40] ss:$24 sps:$4 sm:$0xff]   ;;  %v9374_v45 = vcombine.low %v2361_v35, %v2369_v36 }
 0x136   :  { %2184 = vmatprep.subr.bf16.mxu1 %v10543_v46  ;;  %v10613_v46 = vld [vmem:[#allocation2 + $0x74] ss:$24 sps:$4 sm:$0xff]   ;;  %v10632_v35 = vld [vmem:[#allocation2 + $0x1c0] ss:$24 sps:$4 sm:$0xff]  }
 0x138   :  { %2062 = vmatpush1.bf16.msra.mxu0 %v10538_v47  ;;  %v2393_v47 = vld [vmem:[#allocation7 + $0x180] sm:$0xff] }
 0x139   :  { %2185 = vmatpush1.bf16.msra.mxu1 %v10541_v48  ;;  %2063 = vmatprep.subr.bf16.mxu0 %v10546_v49  ;;  %v9391_v48 = vcombine.high %v2377_v41, %v2385_v43  ;;  %v2401_v49 = vld [vmem:[#allocation7 + $0x1c0] sm:$0xff] }
 0x13a   :  { %2186 = vmatprep.subr.bf16.mxu1 %v10549_v50  ;;  %v12099_v50 = vmov 0  }
 0x13c   :  { %2064 = vmatpush1.bf16.msra.mxu0 %v10544_v51  ;;  %v10611_v51 = vld [vmem:[#allocation2 + $0x70] ss:$24 sps:$4 sm:$0xff]  }
 0x13d   :  { %2187 = vmatpush1.bf16.msra.mxu1 %v10547_v52  ;;  %2065 = vmatprep.subr.bf16.mxu0 %v10552_v53  ;;  %v9390_v52 = vcombine.low %v2377_v41, %v2385_v43  ;;  %v10616_v53 = vld [vmem:[#allocation2 + $0xa4] ss:$24 sps:$4 sm:$0xff]   ;;  %v10635_v41 = vld [vmem:[#allocation2 + $0x1f0] ss:$24 sps:$4 sm:$0xff]  }
 0x13e   :  { %2188 = vmatprep.subr.bf16.mxu1 %v10555_v54  ;;  %v2409_v54 = vld [vmem:[#allocation7 + $0x200] sm:$0xff] }
 0x140   :  { %2066 = vmatpush1.bf16.msra.mxu0 %v10550_v55  ;;  %v9407_v55 = vcombine.high %v2393_v47, %v2401_v49 }
 0x141   :  { %2189 = vmatpush1.bf16.msra.mxu1 %v10553_v56  ;;  %2067 = vmatprep.subr.bf16.mxu0 %v10558_v57  ;;  %v2417_v56 = vld [vmem:[#allocation7 + $0x240] sm:$0xff]  ;;  %v10614_v57 = vld [vmem:[#allocation2 + $0xa0] ss:$24 sps:$4 sm:$0xff]  }
 0x142   :  { %2190 = vmatprep.subr.bf16.mxu1 %v10561_v58  ;;  %v9406_v58 = vcombine.low %v2393_v47, %v2401_v49  ;;  %v2418_v47 = vld [vmem:[#allocation7 + $0x248] sm:$0xff] }
 0x144   :  { %2068 = vmatpush1.bf16.msra.mxu0 %v10556_v59  ;;  %v10619_v59 = vld [vmem:[#allocation2 + $0xd4] ss:$24 sps:$4 sm:$0xff]  }
 0x145   :  { %2191 = vmatpush1.bf16.msra.mxu1 %v10559_v61  ;;  %2069 = vmatprep.subr.bf16.mxu0 %v10564_v62  ;;  %v2425_v61 = vld [vmem:[#allocation7 + $0x280] sm:$0xff]  ;;  %v9423_v62 = vcombine.high %v2409_v54, %v2417_v56 }
 0x146   :  { %2192 = vmatprep.subr.bf16.mxu1 %v10567_v63  ;;  %v10617_v63 = vld [vmem:[#allocation2 + $0xd0] ss:$24 sps:$4 sm:$0xff]  }
 0x148   :  { %2070 = vmatpush1.bf16.msra.mxu0 %v10562_v0  ;;  %v9422_v0 = vcombine.low %v2409_v54, %v2417_v56  ;;  %v2434_v54 = vld [vmem:[#allocation7 + $0x2c8] sm:$0xff] }
 0x149   :  { %2193 = vmatpush1.bf16.msra.mxu1 %v10565_v1  ;;  %2071 = vmatprep.subr.bf16.mxu0 %v10570_v2  ;;  %v10622_v1 = vld [vmem:[#allocation2 + $0x104] ss:$24 sps:$4 sm:$0xff]  }
 0x14a   :  { %2194 = vmatprep.subr.bf16.mxu1 %v10573_v3  ;;  %v2441_v2 = vld [vmem:[#allocation7 + $0x300] sm:$0xff] }
 0x14c   :  { %2072 = vmatpush1.bf16.msra.mxu0 %v10568_v4  ;;  %v2449_v4 = vld [vmem:[#allocation7 + $0x340] sm:$0xff] }
 0x14d   :  { %2195 = vmatpush1.bf16.msra.mxu1 %v10571_v5  ;;  %2073 = vmatprep.subr.bf16.mxu0 %v10576_v6  ;;  %v10620_v5 = vld [vmem:[#allocation2 + $0x100] ss:$24 sps:$4 sm:$0xff]  }
 0x14e   :  { %2196 = vmatprep.subr.bf16.mxu1 %v10579_v7  ;;  %v10625_v7 = vld [vmem:[#allocation2 + $0x134] ss:$24 sps:$4 sm:$0xff]  }
 0x150   :  { %2074 = vmatpush1.bf16.msra.mxu0 %v10574_v8  ;;  %v2457_v8 = vld [vmem:[#allocation7 + $0x380] sm:$0xff] }
 0x151   :  { %2197 = vmatpush1.bf16.msra.mxu1 %v10577_v9  ;;  %2075 = vmatprep.subr.bf16.mxu0 %v10582_v10  ;;  %v9455_v9 = vcombine.high %v2441_v2, %v2449_v4  ;;  %v2465_v10 = vld [vmem:[#allocation7 + $0x3c0] sm:$0xff] }
 0x152   :  { %2198 = vmatprep.subr.bf16.mxu1 %v10585_v11  ;;  %v10623_v11 = vld [vmem:[#allocation2 + $0x130] ss:$24 sps:$4 sm:$0xff]  }
 0x154   :  { %2076 = vmatpush1.bf16.msra.mxu0 %v10580_v12  ;;  %v9454_v12 = vcombine.low %v2441_v2, %v2449_v4  ;;  %v2466_v2 = vld [vmem:[#allocation7 + $0x3c8] sm:$0xff] }
 0x155   :  { %2199 = vmatpush1.bf16.msra.mxu1 %v10583_v13  ;;  %2077 = vmatprep.subr.bf16.mxu0 %v10588_v14  ;;  %v10628_v13 = vld [vmem:[#allocation2 + $0x164] ss:$24 sps:$4 sm:$0xff]   ;;  %v2346_v14 = vld [vmem:[#allocation7 + $0x8] sm:$0xff] }
 0x156   :  { %2200 = vmatprep.subr.bf16.mxu1 %v10591_v15  ;;  %v9471_v15 = vcombine.high %v2457_v8, %v2465_v10 }
 0x158   :  { %2078 = vmatpush1.bf16.msra.mxu0 %v10586_v17  ;;  %v2354_v17 = vld [vmem:[#allocation7 + $0x48] sm:$0xff] }
 0x159   :  { %2201 = vmatpush1.bf16.msra.mxu1 %v10589_v20  ;;  %2079 = vmatprep.subr.bf16.mxu0 %v10594_v21  ;;  %v10626_v20 = vld [vmem:[#allocation2 + $0x160] ss:$24 sps:$4 sm:$0xff]   ;;  %v9470_v21 = vcombine.low %v2457_v8, %v2465_v10  ;;  %v9360_v30 = vcombine.low %v2346_v14, %v2354_v17 }
 0x15a   :  { %2202 = vmatprep.subr.bf16.mxu1 %v10597_v23  ;;  %v10631_v23 = vld [vmem:[#allocation2 + $0x194] ss:$24 sps:$4 sm:$0xff]  }
 0x15b   :  { %v2355_v8 = vld [vmem:[#allocation7 + $0x50] sm:$0xff] }
 0x15c   :  { %2080 = vmatpush1.bf16.msra.mxu0 %v10592_v24  ;;  %v2362_v24 = vld [vmem:[#allocation7 + $0x88] sm:$0xff] }
 0x15d   :  { %2203 = vmatpush1.bf16.msra.mxu1 %v10595_v25  ;;  %2081 = vmatprep.subr.bf16.mxu0 %v10600_v27  ;;  %v9361_v25 = vcombine.high %v2346_v14, %v2354_v17  ;;  %v2370_v27 = vld [vmem:[#allocation7 + $0xc8] sm:$0xff]  ;;  %v2371_v14 = vld [vmem:[#allocation7 + $0xd0] sm:$0xff] }
 0x15e   :  { %2204 = vmatprep.subr.bf16.mxu1 %v10603_v28  ;;  %v10629_v28 = vld [vmem:[#allocation2 + $0x190] ss:$24 sps:$4 sm:$0xff]   ;;  %v9376_v36 = vcombine.low %v2362_v24, %v2370_v27 }
 0x160   :  { %2082 = vmatpush1.bf16.msra.mxu0 %v10598_v31  ;;  %v10634_v31 = vld [vmem:[#allocation2 + $0x1c4] ss:$24 sps:$4 sm:$0xff]  }
 0x161   :  { %2205 = vmatpush1.bf16.msra.mxu1 %v10601_v32  ;;  %2215 = vmatprep.subr.bf16.mxu0 %v10607_v33  ;;  %v2378_v32 = vld [vmem:[#allocation7 + $0x108] sm:$0xff]  ;;  %v9377_v33 = vcombine.high %v2362_v24, %v2370_v27  ;;  %v2387_v24 = vld [vmem:[#allocation7 + $0x150] sm:$0xff] }
 0x162   :  { %3197 = vmatprep.subr.bf16.mxu1 %v9359_v34  ;;  %v2386_v34 = vld [vmem:[#allocation7 + $0x148] sm:$0xff] }
 0x163   :  { %2084 = vmatmul.mubr.bf16.vlgmr.msra.gmra.mrb[0].mxu0 %v12292_v19  ;;  %v9392_v43 = vcombine.low %v2378_v32, %v2386_v34 }
 0x164   :  { %2207 = vmatmul.mubr.bf16.vlgmr.msra.gmra.mrb[0].mxu1 %v12292_v19  ;;  %2216 = vmatpush1.bf16.msra.mxu0 %v10605_v37  ;;  %v10637_v37 = vld [vmem:[#allocation2 + $0x1f4] ss:$24 sps:$4 sm:$0xff]  }
 0x165   :  { %3198 = vmatpush1.bf16.msra.mxu1 %v9358_v38  ;;  %2217 = vmatprep.subr.bf16.mxu0 %v10610_v39  ;;  %v2394_v38 = vld [vmem:[#allocation7 + $0x188] sm:$0xff]  ;;  %v9393_v39 = vcombine.high %v2378_v32, %v2386_v34  ;;  %v2403_v32 = vld [vmem:[#allocation7 + $0x1d0] sm:$0xff] }
 0x166   :  { %3199 = vmatprep.subr.bf16.mxu1 %v9375_v40  ;;  %3229 = vmatprep.mubr.bf16.mxu1 %v12099_v50  ;;  %v2402_v40 = vld [vmem:[#allocation7 + $0x1c8] sm:$0xff] }
 0x167   :  { %2247 = vmatprep.mubr.bf16.mxu0 %v12284_v60  ;;  %v2433_v60 = vld [vmem:[#allocation7 + $0x2c0] sm:$0xff]  ;;  %v9408_v49 = vcombine.low %v2394_v38, %v2402_v40 }
 0x168   :  { %2218 = vmatpush1.bf16.msra.mxu0 %v10608_v44  ;;  %v9439_v3 = vcombine.high %v2425_v61, %v2433_v60  ;;  %v9438_v6 = vcombine.low %v2425_v61, %v2433_v60  ;;  %v10640_v44 = vld [vmem:[#allocation2 + $0x224] ss:$24 sps:$4 sm:$0xff]   ;;  %v2450_v61 = vld [vmem:[#allocation7 + $0x348] sm:$0xff] }
 0x169   :  { %3200 = vmatpush1.bf16.msra.mxu1 %v9374_v45  ;;  %2219 = vmatprep.subr.bf16.mxu0 %v10613_v46  ;;  %v2410_v45 = vld [vmem:[#allocation7 + $0x208] sm:$0xff]  ;;  %v9409_v46 = vcombine.high %v2394_v38, %v2402_v40  ;;  %v10662_v38 = vld [vmem:[#allocation2 + $0x3a0] ss:$24 sps:$4 sm:$0xff]  }
 0x16a   :  { %3201 = vmatprep.subr.bf16.mxu1 %v9391_v48  ;;  %v10638_v48 = vld [vmem:[#allocation2 + $0x220] ss:$24 sps:$4 sm:$0xff]   ;;  %v9424_v56 = vcombine.low %v2410_v45, %v2418_v47  ;;  %v10667_v40 = vld [vmem:[#allocation2 + $0x3d4] ss:$24 sps:$4 sm:$0xff]  }
 0x16c   :  { %2220 = vmatpush1.bf16.msra.mxu0 %v10611_v51  ;;  %v10643_v51 = vld [vmem:[#allocation2 + $0x254] ss:$24 sps:$4 sm:$0xff]  }
 0x16d   :  { %3202 = vmatpush1.bf16.msra.mxu1 %v9390_v52  ;;  %2221 = vmatprep.subr.bf16.mxu0 %v10616_v53  ;;  %v2426_v52 = vld [vmem:[#allocation7 + $0x288] sm:$0xff]  ;;  %v9425_v53 = vcombine.high %v2410_v45, %v2418_v47  ;;  %v2443_v47 = vld [vmem:[#allocation7 + $0x310] sm:$0xff] }
 0x16e   :  { %3203 = vmatprep.subr.bf16.mxu1 %v9407_v55  ;;  %v10641_v55 = vld [vmem:[#allocation2 + $0x250] ss:$24 sps:$4 sm:$0xff]   ;;  %v9440_v60 = vcombine.low %v2426_v52, %v2434_v54 }
 0x170   :  { %2222 = vmatpush1.bf16.msra.mxu0 %v10614_v57  ;;  %v10646_v57 = vld [vmem:[#allocation2 + $0x284] ss:$24 sps:$4 sm:$0xff]  }
 0x171   :  { %3204 = vmatpush1.bf16.msra.mxu1 %v9406_v58  ;;  %2223 = vmatprep.subr.bf16.mxu0 %v10619_v59  ;;  %v2442_v58 = vld [vmem:[#allocation7 + $0x308] sm:$0xff]  ;;  %v9441_v59 = vcombine.high %v2426_v52, %v2434_v54 }
 0x172   :  { %3205 = vmatprep.subr.bf16.mxu1 %v9423_v62  ;;  %v10644_v62 = vld [vmem:[#allocation2 + $0x280] ss:$24 sps:$4 sm:$0xff]   ;;  %v9456_v4 = vcombine.low %v2442_v58, %v2450_v61 }
 0x174   :  { %2224 = vmatpush1.bf16.msra.mxu0 %v10617_v63  ;;  %v10649_v63 = vld [vmem:[#allocation2 + $0x2b4] ss:$24 sps:$4 sm:$0xff]  }
 0x175   :  { %3206 = vmatpush1.bf16.msra.mxu1 %v9422_v0  ;;  %2225 = vmatprep.subr.bf16.mxu0 %v10622_v1  ;;  %v2458_v0 = vld [vmem:[#allocation7 + $0x388] sm:$0xff]  ;;  %v9457_v1 = vcombine.high %v2442_v58, %v2450_v61  ;;  %v10676_v58 = vld [vmem:[#allocation2 + $0x464] ss:$24 sps:$4 sm:$0xff]  }
 0x176   :  { %3207 = vmatprep.subr.bf16.mxu1 %v9439_v3  ;;  %v10647_v3 = vld [vmem:[#allocation2 + $0x2b0] ss:$24 sps:$4 sm:$0xff]   ;;  %v9472_v10 = vcombine.low %v2458_v0, %v2466_v2 }
 0x178   :  { %2226 = vmatpush1.bf16.msra.mxu0 %v10620_v5  ;;  %v10652_v5 = vld [vmem:[#allocation2 + $0x2e4] ss:$24 sps:$4 sm:$0xff]  }
 0x179   :  { %3208 = vmatpush1.bf16.msra.mxu1 %v9438_v6  ;;  %2227 = vmatprep.subr.bf16.mxu0 %v10625_v7  ;;  %v2347_v6 = vld [vmem:[#allocation7 + $0x10] sm:$0xff]  ;;  %v9473_v7 = vcombine.high %v2458_v0, %v2466_v2 }
 0x17a   :  { %3209 = vmatprep.subr.bf16.mxu1 %v9455_v9  ;;  %v10650_v9 = vld [vmem:[#allocation2 + $0x2e0] ss:$24 sps:$4 sm:$0xff]   ;;  %v9362_v17 = vcombine.low %v2347_v6, %v2355_v8  ;;  %v10679_v0 = vld [vmem:[#allocation2 + $0x494] ss:$24 sps:$4 sm:$0xff]  }
 0x17c   :  { %2228 = vmatpush1.bf16.msra.mxu0 %v10623_v11  ;;  %v10655_v11 = vld [vmem:[#allocation2 + $0x314] ss:$24 sps:$4 sm:$0xff]  }
 0x17d   :  { %3210 = vmatpush1.bf16.msra.mxu1 %v9454_v12  ;;  %2229 = vmatprep.subr.bf16.mxu0 %v10628_v13  ;;  %v2363_v12 = vld [vmem:[#allocation7 + $0x90] sm:$0xff]  ;;  %v9363_v13 = vcombine.high %v2347_v6, %v2355_v8  ;;  %v2380_v8 = vld [vmem:[#allocation7 + $0x118] sm:$0xff] }
 0x17e   :  { %3211 = vmatprep.subr.bf16.mxu1 %v9471_v15  ;;  %v10653_v15 = vld [vmem:[#allocation2 + $0x310] ss:$24 sps:$4 sm:$0xff]   ;;  %v9378_v27 = vcombine.low %v2363_v12, %v2371_v14  ;;  %v10682_v6 = vld [vmem:[#allocation2 + $0x4c4] ss:$24 sps:$4 sm:$0xff]  }
 0x180   :  { %2230 = vmatpush1.bf16.msra.mxu0 %v10626_v20  ;;  %v10658_v20 = vld [vmem:[#allocation2 + $0x344] ss:$24 sps:$4 sm:$0xff]  }
 0x181   :  { %3212 = vmatpush1.bf16.msra.mxu1 %v9470_v21  ;;  %2231 = vmatprep.subr.bf16.mxu0 %v10631_v23  ;;  %v2379_v21 = vld [vmem:[#allocation7 + $0x110] sm:$0xff]  ;;  %v9379_v23 = vcombine.high %v2363_v12, %v2371_v14  ;;  %v2396_v14 = vld [vmem:[#allocation7 + $0x198] sm:$0xff] }
 0x182   :  { %3238 = vmatprep.subr.bf16.mxu1 %v9361_v25  ;;  %v10656_v25 = vld [vmem:[#allocation2 + $0x340] ss:$24 sps:$4 sm:$0xff]   ;;  %v9394_v34 = vcombine.low %v2379_v21, %v2387_v24  ;;  %v10685_v12 = vld [vmem:[#allocation2 + $0x4f4] ss:$24 sps:$4 sm:$0xff]  }
 0x184   :  { %3230 = vmatmul.mubr.bf16.vlgmr.msra.gmra.mrb[4].mxu1 %v12317_v29  ;;  %2232 = vmatpush1.bf16.msra.mxu0 %v10629_v28  ;;  %v10661_v28 = vld [vmem:[#allocation2 + $0x374] ss:$24 sps:$4 sm:$0xff]  }
 0x185   :  { %3239 = vmatpush1.bf16.msra.mxu1 %v9360_v30  ;;  %2233 = vmatprep.subr.bf16.mxu0 %v10634_v31  ;;  %v2395_v30 = vld [vmem:[#allocation7 + $0x190] sm:$0xff]  ;;  %v9395_v31 = vcombine.high %v2379_v21, %v2387_v24 }
 0x186   :  { %3240 = vmatprep.subr.bf16.mxu1 %v9377_v33  ;;  %3270 = vmatprep.mubr.bf16.mxu1 %v12099_v50  ;;  %v10659_v33 = vld [vmem:[#allocation2 + $0x370] ss:$24 sps:$4 sm:$0xff]  }
 0x188   :  { %2234 = vmatpush1.bf16.msra.mxu0 %v10632_v35  ;;  %v10664_v35 = vld [vmem:[#allocation2 + $0x3a4] ss:$24 sps:$4 sm:$0xff]  }
 0x189   :  { %3241 = vmatpush1.bf16.msra.mxu1 %v9376_v36  ;;  %2235 = vmatprep.subr.bf16.mxu0 %v10637_v37  ;;  %v9411_v36 = vcombine.high %v2395_v30, %v2403_v32  ;;  %v2419_v37 = vld [vmem:[#allocation7 + $0x250] sm:$0xff] }
 0x18a   :  { %3242 = vmatprep.subr.bf16.mxu1 %v9393_v39  ;;  %v9410_v39 = vcombine.low %v2395_v30, %v2403_v32 }
 0x18c   :  { %2236 = vmatpush1.bf16.msra.mxu0 %v10635_v41  ;;  %v2427_v41 = vld [vmem:[#allocation7 + $0x290] sm:$0xff] }
 0x18d   :  { %3243 = vmatpush1.bf16.msra.mxu1 %v9392_v43  ;;  %2237 = vmatprep.subr.bf16.mxu0 %v10640_v44  ;;  %v10665_v44 = vld [vmem:[#allocation2 + $0x3d0] ss:$24 sps:$4 sm:$0xff]  }
 0x18e   :  { %3244 = vmatprep.subr.bf16.mxu1 %v9409_v46  ;;  %v10670_v46 = vld [vmem:[#allocation2 + $0x404] ss:$24 sps:$4 sm:$0xff]  }
 0x190   :  { %2238 = vmatpush1.bf16.msra.mxu0 %v10638_v48 }
 0x191   :  { %3245 = vmatpush1.bf16.msra.mxu1 %v9408_v49  ;;  %2239 = vmatprep.subr.bf16.mxu0 %v10643_v51  ;;  %v2451_v49 = vld [vmem:[#allocation7 + $0x350] sm:$0xff] }
 0x192   :  { %3246 = vmatprep.subr.bf16.mxu1 %v9425_v53  ;;  %v10668_v51 = vld [vmem:[#allocation2 + $0x400] ss:$24 sps:$4 sm:$0xff]   ;;  %v10673_v53 = vld [vmem:[#allocation2 + $0x434] ss:$24 sps:$4 sm:$0xff]   ;;  %v9459_v54 = vcombine.high %v2443_v47, %v2451_v49 }
 0x194   :  { %2240 = vmatpush1.bf16.msra.mxu0 %v10641_v55  ;;  %v10671_v55 = vld [vmem:[#allocation2 + $0x430] ss:$24 sps:$4 sm:$0xff]  }
 0x195   :  { %3247 = vmatpush1.bf16.msra.mxu1 %v9424_v56  ;;  %2241 = vmatprep.subr.bf16.mxu0 %v10646_v57  ;;  %v2459_v56 = vld [vmem:[#allocation7 + $0x390] sm:$0xff] }
 0x196   :  { %3248 = vmatprep.subr.bf16.mxu1 %v9441_v59  ;;  %v2467_v57 = vld [vmem:[#allocation7 + $0x3d0] sm:$0xff]  ;;  %v9458_v59 = vcombine.low %v2443_v47, %v2451_v49 }
 0x197   :  { %v9475_v61 = vcombine.high %v2459_v56, %v2467_v57 }
 0x198   :  { %2242 = vmatpush1.bf16.msra.mxu0 %v10644_v62  ;;  %v10674_v62 = vld [vmem:[#allocation2 + $0x460] ss:$24 sps:$4 sm:$0xff]  }
 0x199   :  { %3249 = vmatpush1.bf16.msra.mxu1 %v9440_v60  ;;  %2243 = vmatprep.subr.bf16.mxu0 %v10649_v63  ;;  %v2348_v60 = vld [vmem:[#allocation7 + $0x18] sm:$0xff] }
 0x19a   :  { %3250 = vmatprep.subr.bf16.mxu1 %v9457_v1  ;;  %v2356_v63 = vld [vmem:[#allocation7 + $0x58] sm:$0xff]  ;;  %v9474_v1 = vcombine.low %v2459_v56, %v2467_v57  ;;  %v2365_v57 = vld [vmem:[#allocation7 + $0xa0] sm:$0xff] }
 0x19b   :  { %v9365_v2 = vcombine.high %v2348_v60, %v2356_v63 }
 0x19c   :  { %2244 = vmatpush1.bf16.msra.mxu0 %v10647_v3  ;;  %v10677_v3 = vld [vmem:[#allocation2 + $0x490] ss:$24 sps:$4 sm:$0xff]  }
 0x19d   :  { %3251 = vmatpush1.bf16.msra.mxu1 %v9456_v4  ;;  %2245 = vmatprep.subr.bf16.mxu0 %v10652_v5  ;;  %v2364_v4 = vld [vmem:[#allocation7 + $0x98] sm:$0xff] }
 0x19e   :  { %3252 = vmatprep.subr.bf16.mxu1 %v9473_v7  ;;  %v2372_v5 = vld [vmem:[#allocation7 + $0xd8] sm:$0xff]  ;;  %v9364_v7 = vcombine.low %v2348_v60, %v2356_v63  ;;  %v2381_v63 = vld [vmem:[#allocation7 + $0x120] sm:$0xff] }
 0x1a0   :  { %2246 = vmatpush1.bf16.msra.mxu0 %v10650_v9  ;;  %v2388_v9 = vld [vmem:[#allocation7 + $0x158] sm:$0xff] }
 0x1a1   :  { %3253 = vmatpush1.bf16.msra.mxu1 %v9472_v10  ;;  %2256 = vmatprep.subr.bf16.mxu0 %v10655_v11  ;;  %v9381_v10 = vcombine.high %v2364_v4, %v2372_v5  ;;  %v10680_v11 = vld [vmem:[#allocation2 + $0x4c0] ss:$24 sps:$4 sm:$0xff]   ;;  %v9396_v21 = vcombine.low %v2380_v8, %v2388_v9 }
 0x1a2   :  { %3279 = vmatprep.subr.bf16.mxu1 %v9363_v13  ;;  %v9380_v13 = vcombine.low %v2364_v4, %v2372_v5  ;;  %v2397_v5 = vld [vmem:[#allocation7 + $0x1a0] sm:$0xff] }
 0x1a3   :  { %2248 = vmatmul.mubr.bf16.vlgmr.msra.gmra.mrb[4].mxu0 %v12288_v16  ;;  %v2411_v16 = vld [vmem:[#allocation7 + $0x210] sm:$0xff] }
 0x1a4   :  { %3271 = vmatmul.mubr.bf16.vlgmr.msra.gmra.mrb[8].mxu1 %v12317_v29  ;;  %2257 = vmatpush1.bf16.msra.mxu0 %v10653_v15  ;;  %v9427_v43 = vcombine.high %v2411_v16, %v2419_v37  ;;  %v9426_v45 = vcombine.low %v2411_v16, %v2419_v37  ;;  %v2404_v15 = vld [vmem:[#allocation7 + $0x1d8] sm:$0xff] }
 0x1a5   :  { %3280 = vmatpush1.bf16.msra.mxu1 %v9362_v17  ;;  %2258 = vmatprep.subr.bf16.mxu0 %v10658_v20  ;;  %v9397_v17 = vcombine.high %v2380_v8, %v2388_v9  ;;  %v10683_v20 = vld [vmem:[#allocation2 + $0x4f0] ss:$24 sps:$4 sm:$0xff]   ;;  %v9413_v24 = vcombine.high %v2396_v14, %v2404_v15  ;;  %v9412_v30 = vcombine.low %v2396_v14, %v2404_v15  ;;  %v10712_v8 = vld [vmem:[#allocation2 + $0x6a4] ss:$24 sps:$4 sm:$0xff]  }
 0x1a6   :  { %3281 = vmatprep.subr.bf16.mxu1 %v9379_v23  ;;  %3311 = vmatprep.mubr.bf16.mxu1 %v12099_v50  ;;  %v10688_v23 = vld [vmem:[#allocation2 + $0x524] ss:$24 sps:$4 sm:$0xff]  }
 0x1a7   :  { %2288 = vmatprep.mubr.bf16.mxu0 %v12296_v22  ;;  %v2435_v22 = vld [vmem:[#allocation7 + $0x2d0] sm:$0xff]  ;;  %v2413_v9 = vld [vmem:[#allocation7 + $0x220] sm:$0xff] }
 0x1a8   :  { %2259 = vmatpush1.bf16.msra.mxu0 %v10656_v25  ;;  %v9443_v48 = vcombine.high %v2427_v41, %v2435_v22  ;;  %v9442_v52 = vcombine.low %v2427_v41, %v2435_v22  ;;  %v2412_v25 = vld [vmem:[#allocation7 + $0x218] sm:$0xff]  ;;  %v10697_v41 = vld [vmem:[#allocation2 + $0x5b4] ss:$24 sps:$4 sm:$0xff]  }
 0x1a9   :  { %3282 = vmatpush1.bf16.msra.mxu1 %v9378_v27  ;;  %2260 = vmatprep.subr.bf16.mxu0 %v10661_v28  ;;  %v2420_v27 = vld [vmem:[#allocation7 + $0x258] sm:$0xff]  ;;  %v2429_v15 = vld [vmem:[#allocation7 + $0x2a0] sm:$0xff] }
 0x1aa   :  { %3283 = vmatprep.subr.bf16.mxu1 %v9395_v31  ;;  %v10686_v28 = vld [vmem:[#allocation2 + $0x520] ss:$24 sps:$4 sm:$0xff]   ;;  %v10691_v31 = vld [vmem:[#allocation2 + $0x554] ss:$24 sps:$4 sm:$0xff]   ;;  %v9429_v32 = vcombine.high %v2412_v25, %v2420_v27  ;;  %v9428_v16 = vcombine.low %v2412_v25, %v2420_v27 }
 0x1ab   :  { %v2460_v22 = vld [vmem:[#allocation7 + $0x398] sm:$0xff]  ;;  %v2453_v25 = vld [vmem:[#allocation7 + $0x360] sm:$0xff] }
 0x1ac   :  { %2261 = vmatpush1.bf16.msra.mxu0 %v10659_v33  ;;  %v2428_v33 = vld [vmem:[#allocation7 + $0x298] sm:$0xff] }
 0x1ad   :  { %3284 = vmatpush1.bf16.msra.mxu1 %v9394_v34  ;;  %2262 = vmatprep.subr.bf16.mxu0 %v10664_v35  ;;  %v2436_v34 = vld [vmem:[#allocation7 + $0x2d8] sm:$0xff]  ;;  %v10689_v35 = vld [vmem:[#allocation2 + $0x550] ss:$24 sps:$4 sm:$0xff]  }
 0x1ae   :  { %3285 = vmatprep.subr.bf16.mxu1 %v9411_v36  ;;  %v10694_v36 = vld [vmem:[#allocation2 + $0x584] ss:$24 sps:$4 sm:$0xff]   ;;  %v9445_v37 = vcombine.high %v2428_v33, %v2436_v34  ;;  %v10716_v27 = vld [vmem:[#allocation2 + $0x700] ss:$24 sps:$4 sm:$0xff]  }
 0x1b0   :  { %2263 = vmatpush1.bf16.msra.mxu0 %v10662_v38  ;;  %v2444_v38 = vld [vmem:[#allocation7 + $0x318] sm:$0xff] }
 0x1b1   :  { %3286 = vmatpush1.bf16.msra.mxu1 %v9410_v39  ;;  %2264 = vmatprep.subr.bf16.mxu0 %v10667_v40  ;;  %v2452_v39 = vld [vmem:[#allocation7 + $0x358] sm:$0xff] }
 0x1b2   :  { %3287 = vmatprep.subr.bf16.mxu1 %v9427_v43  ;;  %v10692_v40 = vld [vmem:[#allocation2 + $0x580] ss:$24 sps:$4 sm:$0xff]   ;;  %v9444_v43 = vcombine.low %v2428_v33, %v2436_v34  ;;  %v9460_v47 = vcombine.low %v2444_v38, %v2452_v39  ;;  %v10719_v34 = vld [vmem:[#allocation2 + $0x730] ss:$24 sps:$4 sm:$0xff]  }
 0x1b4   :  { %2265 = vmatpush1.bf16.msra.mxu0 %v10665_v44  ;;  %v2468_v44 = vld [vmem:[#allocation7 + $0x3d8] sm:$0xff] }
 0x1b5   :  { %3288 = vmatpush1.bf16.msra.mxu1 %v9426_v45  ;;  %2266 = vmatprep.subr.bf16.mxu0 %v10670_v46  ;;  %v9461_v45 = vcombine.high %v2444_v38, %v2452_v39  ;;  %v10695_v46 = vld [vmem:[#allocation2 + $0x5b0] ss:$24 sps:$4 sm:$0xff]   ;;  %v9477_v49 = vcombine.high %v2460_v22, %v2468_v44  ;;  %v10722_v39 = vld [vmem:[#allocation2 + $0x760] ss:$24 sps:$4 sm:$0xff]  }
 0x1b6   :  { %3289 = vmatprep.subr.bf16.mxu1 %v9443_v48  ;;  %v10700_v48 = vld [vmem:[#allocation2 + $0x5e4] ss:$24 sps:$4 sm:$0xff]   ;;  %v2358_v38 = vld [vmem:[#allocation7 + $0x68] sm:$0xff] }
 0x1b8   :  { %2267 = vmatpush1.bf16.msra.mxu0 %v10668_v51  ;;  %v2349_v51 = vld [vmem:[#allocation7 + $0x20] sm:$0xff] }
 0x1b9   :  { %3290 = vmatpush1.bf16.msra.mxu1 %v9442_v52  ;;  %2268 = vmatprep.subr.bf16.mxu0 %v10673_v53  ;;  %v2357_v52 = vld [vmem:[#allocation7 + $0x60] sm:$0xff]  ;;  %v10698_v53 = vld [vmem:[#allocation2 + $0x5e0] ss:$24 sps:$4 sm:$0xff]  }
 0x1ba   :  { %3291 = vmatprep.subr.bf16.mxu1 %v9459_v54  ;;  %v9476_v54 = vcombine.low %v2460_v22, %v2468_v44  ;;  %v9367_v56 = vcombine.high %v2349_v51, %v2357_v52  ;;  %v2366_v22 = vld [vmem:[#allocation7 + $0xa8] sm:$0xff] }
 0x1bb   :  { %v10725_v44 = vld [vmem:[#allocation2 + $0x790] ss:$24 sps:$4 sm:$0xff]  }
 0x1bc   :  { %2269 = vmatpush1.bf16.msra.mxu0 %v10671_v55  ;;  %v10703_v55 = vld [vmem:[#allocation2 + $0x614] ss:$24 sps:$4 sm:$0xff]  }
 0x1bd   :  { %3292 = vmatpush1.bf16.msra.mxu1 %v9458_v59  ;;  %2270 = vmatprep.subr.bf16.mxu0 %v10676_v58  ;;  %v2373_v58 = vld [vmem:[#allocation7 + $0xe0] sm:$0xff] }
 0x1be   :  { %3293 = vmatprep.subr.bf16.mxu1 %v9475_v61  ;;  %v10701_v59 = vld [vmem:[#allocation2 + $0x610] ss:$24 sps:$4 sm:$0xff]   ;;  %v9366_v61 = vcombine.low %v2349_v51, %v2357_v52  ;;  %v9383_v60 = vcombine.high %v2365_v57, %v2373_v58  ;;  %v12334_v52 = vld [vmem:[%s12604_s1] sm:$0x1]  ;;  %s12100_s1 = smov [#allocation17]  }
 0x1bf   :  { %s9057_s27 = sshll.u32 %s12100_s1, 4  ;;  %s9058_s27 = int_to_ptr.vmem [resolvable:$true] %s9057_s27 }
 0x1c0   :  { %2271 = vmatpush1.bf16.msra.mxu0 %v10674_v62  ;;  %v10706_v62 = vld [vmem:[#allocation2 + $0x644] ss:$24 sps:$4 sm:$0xff]   ;;  %s12048_s28 = scalar_lea.vmem %s9058_s27, 32  ;;  %p12053_p3 = scmp.lt.s32.totalorder %s9058_s27, %s9058_s27 }
 0x1c1   :  { %3294 = vmatpush1.bf16.msra.mxu1 %v9474_v1  ;;  %2272 = vmatprep.subr.bf16.mxu0 %v10679_v0  ;;  %v2389_v0 = vld [vmem:[#allocation7 + $0x160] sm:$0xff]  ;;  %v10704_v1 = vld [vmem:[#allocation2 + $0x640] ss:$24 sps:$4 sm:$0xff]   ;;  %p12049_p2 = scmp.ne.s32.totalorder %s9058_s27, %s12048_s28  ;;  %p12054_p4 = scmp.lt.s32.totalorder %s12048_s28, %s12048_s28 }
 0x1c2   :  { %3320 = vmatprep.subr.bf16.mxu1 %v9365_v2  ;;  %v9382_v2 = vcombine.low %v2365_v57, %v2373_v58  ;;  %v9399_v4 = vcombine.high %v2381_v63, %v2389_v0  ;;  %v2398_v57 = vld [vmem:[#allocation7 + $0x1a8] sm:$0xff] }
 0x1c3   :  { %v2406_v58 = vld [vmem:[#allocation7 + $0x1e8] sm:$0xff]  ;;  %p12055_p5 = por %p12054_p4, %p12053_p3 }
 0x1c4   :  { %3312 = vmatmul.mubr.bf16.vlgmr.msra.gmra.mrb[12].mxu1 %v12317_v29  ;;  %2273 = vmatpush1.bf16.msra.mxu0 %v10677_v3  ;;  %v10709_v3 = vld [vmem:[#allocation2 + $0x674] ss:$24 sps:$4 sm:$0xff]  }
 0x1c5   :  { %3321 = vmatpush1.bf16.msra.mxu1 %v9364_v7  ;;  %2274 = vmatprep.subr.bf16.mxu0 %v10682_v6  ;;  %v2405_v6 = vld [vmem:[#allocation7 + $0x1e0] sm:$0xff]  ;;  %p12056_p6 = pnand %p12055_p5, %p12049_p2 }
 0x1c6   :  { %3322 = vmatprep.subr.bf16.mxu1 %v9381_v10  ;;  %3352 = vmatprep.mubr.bf16.mxu1 %v12099_v50  ;;  %v10707_v7 = vld [vmem:[#allocation2 + $0x670] ss:$24 sps:$4 sm:$0xff]  }
 0x1c7   :  { %v2421_v10 = vld [vmem:[#allocation7 + $0x260] sm:$0xff] }
 0x1c8   :  { %2275 = vmatpush1.bf16.msra.mxu0 %v10680_v11  ;;  %v10710_v11 = vld [vmem:[#allocation2 + $0x6a0] ss:$24 sps:$4 sm:$0xff]   ;;  %v9431_v14 = vcombine.high %v2413_v9, %v2421_v10 }
 0x1c9   :  { %3323 = vmatpush1.bf16.msra.mxu1 %v9380_v13  ;;  %2276 = vmatprep.subr.bf16.mxu0 %v10685_v12  ;;  %v9414_v12 = vcombine.low %v2397_v5, %v2405_v6  ;;  %v10715_v13 = vld [vmem:[#allocation2 + $0x6d4] ss:$24 sps:$4 sm:$0xff]  }
 0x1ca   :  { %3324 = vmatprep.subr.bf16.mxu1 %v9397_v17  ;;  %v10713_v17 = vld [vmem:[#allocation2 + $0x6d0] ss:$24 sps:$4 sm:$0xff]  }
 0x1cc   :  { %2277 = vmatpush1.bf16.msra.mxu0 %v10683_v20  ;;  %v9430_v20 = vcombine.low %v2413_v9, %v2421_v10  ;;  %v2446_v9 = vld [vmem:[#allocation7 + $0x328] sm:$0xff] }
 0x1cd   :  { %3325 = vmatpush1.bf16.msra.mxu1 %v9396_v21  ;;  %2278 = vmatprep.subr.bf16.mxu0 %v10688_v23  ;;  %v10718_v21 = vld [vmem:[#allocation2 + $0x704] ss:$24 sps:$4 sm:$0xff]   ;;  %v2454_v10 = vld [vmem:[#allocation7 + $0x368] sm:$0xff] }
 0x1ce   :  { %3326 = vmatprep.subr.bf16.mxu1 %v9413_v24  ;;  %v2445_v24 = vld [vmem:[#allocation7 + $0x320] sm:$0xff] }
 0x1cf   :  { %v9463_v33 = vcombine.high %v2445_v24, %v2453_v25 }
 0x1d0   :  { %2279 = vmatpush1.bf16.msra.mxu0 %v10686_v28  ;;  %v10721_v28 = vld [vmem:[#allocation2 + $0x734] ss:$24 sps:$4 sm:$0xff]  }
 0x1d1   :  { %3327 = vmatpush1.bf16.msra.mxu1 %v9412_v30  ;;  %2280 = vmatprep.subr.bf16.mxu0 %v10691_v31  ;;  %v2461_v31 = vld [vmem:[#allocation7 + $0x3a0] sm:$0xff] }
 0x1d2   :  { %3328 = vmatprep.subr.bf16.mxu1 %v9429_v32  ;;  %v2469_v32 = vld [vmem:[#allocation7 + $0x3e0] sm:$0xff] }
 0x1d4   :  { %2281 = vmatpush1.bf16.msra.mxu0 %v10689_v35  ;;  %v9462_v35 = vcombine.low %v2445_v24, %v2453_v25  ;;  %v2359_v25 = vld [vmem:[#allocation7 + $0x70] sm:$0xff] }
 0x1d5   :  { %3329 = vmatpush1.bf16.msra.mxu1 %v9428_v16  ;;  %2282 = vmatprep.subr.bf16.mxu0 %v10694_v36  ;;  %v10724_v16 = vld [vmem:[#allocation2 + $0x764] ss:$24 sps:$4 sm:$0xff]   ;;  %v9479_v36 = vcombine.high %v2461_v31, %v2469_v32 }
 0x1d6   :  { %3330 = vmatprep.subr.bf16.mxu1 %v9445_v37  ;;  %v2350_v37 = vld [vmem:[#allocation7 + $0x28] sm:$0xff] }
 0x1d8   :  { %2283 = vmatpush1.bf16.msra.mxu0 %v10692_v40  ;;  %v9478_v40 = vcombine.low %v2461_v31, %v2469_v32 }
 0x1d9   :  { %3331 = vmatpush1.bf16.msra.mxu1 %v9444_v43  ;;  %2284 = vmatprep.subr.bf16.mxu0 %v10697_v41  ;;  %v10727_v41 = vld [vmem:[#allocation2 + $0x794] ss:$24 sps:$4 sm:$0xff]   ;;  %v9369_v43 = vcombine.high %v2350_v37, %v2358_v38 }
 0x1da   :  { %3332 = vmatprep.subr.bf16.mxu1 %v9461_v45  ;;  %v2374_v45 = vld [vmem:[#allocation7 + $0xe8] sm:$0xff] }
 0x1db   :  { %v9385_v51 = vcombine.high %v2366_v22, %v2374_v45 }
 0x1dc   :  { %2285 = vmatpush1.bf16.msra.mxu0 %v10695_v46  ;;  %v10730_v46 = vld [vmem:[#allocation2 + $0x7c4] ss:$24 sps:$4 sm:$0xff]  }
 0x1dd   :  { %3333 = vmatpush1.bf16.msra.mxu1 %v9460_v47  ;;  %2286 = vmatprep.subr.bf16.mxu0 %v10700_v48  ;;  %v9368_v47 = vcombine.low %v2350_v37, %v2358_v38  ;;  %v2382_v48 = vld [vmem:[#allocation7 + $0x128] sm:$0xff] }
 0x1de   :  { %3334 = vmatprep.subr.bf16.mxu1 %v9477_v49  ;;  %v2390_v49 = vld [vmem:[#allocation7 + $0x168] sm:$0xff] }
 0x1e0   :  { %2287 = vmatpush1.bf16.msra.mxu0 %v10698_v53  ;;  %v10728_v53 = vld [vmem:[#allocation2 + $0x7c0] ss:$24 sps:$4 sm:$0xff]  }
 0x1e1   :  { %3335 = vmatpush1.bf16.msra.mxu1 %v9476_v54  ;;  %2297 = vmatprep.subr.bf16.mxu0 %v10703_v55  ;;  %v9384_v54 = vcombine.low %v2366_v22, %v2374_v45  ;;  %v10733_v55 = vld [vmem:[#allocation2 + $0x7f4] ss:$24 sps:$4 sm:$0xff]   ;;  %v2384_v22 = vld [vmem:[#allocation7 + $0x138] sm:$0xff] }
 0x1e2   :  { %3361 = vmatprep.subr.bf16.mxu1 %v9367_v56  ;;  %v9401_v56 = vcombine.high %v2382_v48, %v2390_v49 }
 0x1e3   :  { %2289 = vmatmul.mubr.bf16.vlgmr.msra.gmra.mrb[4].mxu0 %v12304_v26  ;;  %v9415_v26 = vcombine.high %v2397_v5, %v2405_v6  ;;  %v2430_v5 = vld [vmem:[#allocation7 + $0x2a8] sm:$0xff] }
 0x1e4   :  { %3353 = vmatmul.mubr.bf16.vlgmr.msra.gmra.mrb[16].mxu1 %v12317_v29  ;;  %2298 = vmatpush1.bf16.msra.mxu0 %v10701_v59  ;;  %v9398_v29 = vcombine.low %v2381_v63, %v2389_v0  ;;  %v10731_v59 = vld [vmem:[#allocation2 + $0x7f0] ss:$24 sps:$4 sm:$0xff]  }
 0x1e5   :  { %3362 = vmatpush1.bf16.msra.mxu1 %v9366_v61  ;;  %2299 = vmatprep.subr.bf16.mxu0 %v10706_v62  ;;  %v9400_v61 = vcombine.low %v2382_v48, %v2390_v49  ;;  %v10736_v62 = vld [vmem:[#allocation2 + $0x824] ss:$24 sps:$4 sm:$0xff]   ;;  %v2414_v63 = vld [vmem:[#allocation7 + $0x228] sm:$0xff] }
 0x1e6   :  { %3363 = vmatprep.subr.bf16.mxu1 %v9383_v60  ;;  %3393 = vmatprep.mubr.bf16.mxu1 %v12099_v50  ;;  %v9417_v60 = vcombine.high %v2398_v57, %v2406_v58  ;;  %v2422_v0 = vld [vmem:[#allocation7 + $0x268] sm:$0xff]  ;;  %v2407_v48 = vld [vmem:[#allocation7 + $0x1f0] sm:$0xff] }
 0x1e7   :  { %2329 = vmatprep.mubr.bf16.mxu0 %v12290_v18  ;;  %v2437_v18 = vld [vmem:[#allocation7 + $0x2e0] sm:$0xff]  ;;  %v2438_v6 = vld [vmem:[#allocation7 + $0x2e8] sm:$0xff] }
 0x1e8   :  { %2300 = vmatpush1.bf16.msra.mxu0 %v10704_v1  ;;  %v9447_v23 = vcombine.high %v2429_v15, %v2437_v18  ;;  %v9446_v30 = vcombine.low %v2429_v15, %v2437_v18  ;;  %v10734_v1 = vld [vmem:[#allocation2 + $0x820] ss:$24 sps:$4 sm:$0xff]   ;;  %v2470_v15 = vld [vmem:[#allocation7 + $0x3e8] sm:$0xff]  ;;  %v9465_v18 = vcombine.high %v2446_v9, %v2454_v10 }
 0x1e9   :  { %3364 = vmatpush1.bf16.msra.mxu1 %v9382_v2  ;;  %2301 = vmatprep.subr.bf16.mxu0 %v10709_v3  ;;  %v9416_v2 = vcombine.low %v2398_v57, %v2406_v58  ;;  %v10739_v3 = vld [vmem:[#allocation2 + $0x854] ss:$24 sps:$4 sm:$0xff]  }
 0x1ea   :  { %3365 = vmatprep.subr.bf16.mxu1 %v9399_v4  ;;  %v9433_v4 = vcombine.high %v2414_v63, %v2422_v0  ;;  %v2423_v57 = vld [vmem:[#allocation7 + $0x270] sm:$0xff] }
 0x1ec   :  { %2302 = vmatpush1.bf16.msra.mxu0 %v10707_v7  ;;  %v10737_v7 = vld [vmem:[#allocation2 + $0x850] ss:$24 sps:$4 sm:$0xff]  }
 0x1ed   :  { %3366 = vmatpush1.bf16.msra.mxu1 %v9398_v29  ;;  %2303 = vmatprep.subr.bf16.mxu0 %v10712_v8  ;;  %v9432_v29 = vcombine.low %v2414_v63, %v2422_v0  ;;  %v10742_v8 = vld [vmem:[#allocation2 + $0x884] ss:$24 sps:$4 sm:$0xff]  }
 0x1ee   :  { %3367 = vmatprep.subr.bf16.mxu1 %v9415_v26  ;;  %v9449_v26 = vcombine.high %v2430_v5, %v2438_v6  ;;  %v2431_v0 = vld [vmem:[#allocation7 + $0x2b0] sm:$0xff] }
 0x1f0   :  { %2304 = vmatpush1.bf16.msra.mxu0 %v10710_v11  ;;  %v10740_v11 = vld [vmem:[#allocation2 + $0x880] ss:$24 sps:$4 sm:$0xff]  }
 0x1f1   :  { %3368 = vmatpush1.bf16.msra.mxu1 %v9414_v12  ;;  %2305 = vmatprep.subr.bf16.mxu0 %v10715_v13  ;;  %v10745_v12 = vld [vmem:[#allocation2 + $0x8b4] ss:$24 sps:$4 sm:$0xff]   ;;  %v9448_v13 = vcombine.low %v2430_v5, %v2438_v6 }
 0x1f2   :  { %3369 = vmatprep.subr.bf16.mxu1 %v9431_v14  ;;  %v2462_v14 = vld [vmem:[#allocation7 + $0x3a8] sm:$0xff] }
 0x1f3   :  { %v9481_v24 = vcombine.high %v2462_v14, %v2470_v15  ;;  %v9480_v31 = vcombine.low %v2462_v14, %v2470_v15  ;;  %v2471_v14 = vld [vmem:[#allocation7 + $0x3f0] sm:$0xff]  ;;  %v2464_v15 = vld [vmem:[#allocation7 + $0x3b8] sm:$0xff] }
 0x1f4   :  { %2306 = vmatpush1.bf16.msra.mxu0 %v10713_v17  ;;  %v10743_v17 = vld [vmem:[#allocation2 + $0x8b0] ss:$24 sps:$4 sm:$0xff]  }
 0x1f5   :  { %3370 = vmatpush1.bf16.msra.mxu1 %v9430_v20  ;;  %2307 = vmatprep.subr.bf16.mxu0 %v10718_v21  ;;  %v9464_v20 = vcombine.low %v2446_v9, %v2454_v10  ;;  %v10748_v21 = vld [vmem:[#allocation2 + $0x8e4] ss:$24 sps:$4 sm:$0xff]  }
 0x1f6   :  { %3371 = vmatprep.subr.bf16.mxu1 %v9447_v23  ;;  %v2351_v23 = vld [vmem:[#allocation7 + $0x30] sm:$0xff]  ;;  %v2448_v9 = vld [vmem:[#allocation7 + $0x338] sm:$0xff] }
 0x1f7   :  { %v9371_v32 = vcombine.high %v2351_v23, %v2359_v25  ;;  %v9370_v37 = vcombine.low %v2351_v23, %v2359_v25  ;;  %v2456_v10 = vld [vmem:[#allocation7 + $0x378] sm:$0xff] }
 0x1f8   :  { %2308 = vmatpush1.bf16.msra.mxu0 %v10716_v27  ;;  %v2352_v27 = vld [vmem:[#allocation7 + $0x38] sm:$0xff] }
 0x1f9   :  { %3372 = vmatpush1.bf16.msra.mxu1 %v9446_v30  ;;  %2309 = vmatprep.subr.bf16.mxu0 %v10721_v28  ;;  %v2360_v28 = vld [vmem:[#allocation7 + $0x78] sm:$0xff] }
 0x1fa   :  { %3373 = vmatprep.subr.bf16.mxu1 %v9463_v33  ;;  %v10746_v30 = vld [vmem:[#allocation2 + $0x8e0] ss:$24 sps:$4 sm:$0xff]   ;;  %v9373_v33 = vcombine.high %v2352_v27, %v2360_v28  ;;  %v9372_v38 = vcombine.low %v2352_v27, %v2360_v28 }
 0x1fc   :  { %2310 = vmatpush1.bf16.msra.mxu0 %v10719_v34  ;;  %v2367_v34 = vld [vmem:[#allocation7 + $0xb0] sm:$0xff] }
 0x1fd   :  { %3374 = vmatpush1.bf16.msra.mxu1 %v9462_v35  ;;  %2311 = vmatprep.subr.bf16.mxu0 %v10724_v16  ;;  %v2375_v35 = vld [vmem:[#allocation7 + $0xf0] sm:$0xff]  ;;  %v2368_v16 = vld [vmem:[#allocation7 + $0xb8] sm:$0xff] }
 0x1fe   :  { %3375 = vmatprep.subr.bf16.mxu1 %v9479_v36  ;;  %v2376_v36 = vld [vmem:[#allocation7 + $0xf8] sm:$0xff]  ;;  %v9386_v45 = vcombine.low %v2367_v34, %v2375_v35 }
 0x200   :  { %2312 = vmatpush1.bf16.msra.mxu0 %v10722_v39  ;;  %v2383_v39 = vld [vmem:[#allocation7 + $0x130] sm:$0xff] }
 0x201   :  { %3376 = vmatpush1.bf16.msra.mxu1 %v9478_v40  ;;  %2313 = vmatprep.subr.bf16.mxu0 %v10727_v41  ;;  %v2391_v40 = vld [vmem:[#allocation7 + $0x170] sm:$0xff]  ;;  %v9387_v41 = vcombine.high %v2367_v34, %v2375_v35 }
 0x202   :  { %3402 = vmatprep.subr.bf16.mxu1 %v9369_v43  ;;  %v9389_v43 = vcombine.high %v2368_v16, %v2376_v36  ;;  %v9403_v49 = vcombine.high %v2383_v39, %v2391_v40 }
 0x204   :  { %3394 = vmatmul.mubr.bf16.vlgmr.msra.gmra.mrb[20].mxu1 %v12334_v52  ;;  %2314 = vmatpush1.bf16.msra.mxu0 %v10725_v44  ;;  %v2392_v44 = vld [vmem:[#allocation7 + $0x178] sm:$0xff] }
 0x205   :  { %3403 = vmatpush1.bf16.msra.mxu1 %v9368_v47  ;;  %2315 = vmatprep.subr.bf16.mxu0 %v10730_v46  ;;  %v9388_v46 = vcombine.low %v2368_v16, %v2376_v36  ;;  %v2399_v47 = vld [vmem:[#allocation7 + $0x1b0] sm:$0xff] }
 0x206   :  { %3404 = vmatprep.subr.bf16.mxu1 %v9385_v51  ;;  %3434 = vmatprep.mubr.bf16.mxu1 %v12099_v50  ;;  %v9405_v51 = vcombine.high %v2384_v22, %v2392_v44  ;;  %v9419_v58 = vcombine.high %v2399_v47, %v2407_v48 }
 0x208   :  { %2316 = vmatpush1.bf16.msra.mxu0 %v10728_v53  ;;  %v2400_v53 = vld [vmem:[#allocation7 + $0x1b8] sm:$0xff] }
 0x209   :  { %3405 = vmatpush1.bf16.msra.mxu1 %v9384_v54  ;;  %2317 = vmatprep.subr.bf16.mxu0 %v10733_v55  ;;  %v2408_v54 = vld [vmem:[#allocation7 + $0x1f8] sm:$0xff]  ;;  %v9404_v55 = vcombine.low %v2384_v22, %v2392_v44  ;;  %v10755_v22 = vld [vmem:[#allocation11 + $0x20] ss:$16 sps:$4 sm:$0xff]  }
 0x20a   :  { %3406 = vmatprep.subr.bf16.mxu1 %v9401_v56  ;;  %v2415_v56 = vld [vmem:[#allocation7 + $0x230] sm:$0xff]  ;;  %v9420_v63 = vcombine.low %v2400_v53, %v2408_v54 }
 0x20b   :  { %v9434_v5 = vcombine.low %v2415_v56, %v2423_v57  ;;  %v10758_v44 = vld [vmem:[#allocation11 + $0x220] ss:$16 sps:$4 sm:$0xff]  }
 0x20c   :  { %2318 = vmatpush1.bf16.msra.mxu0 %v10731_v59  ;;  %v9421_v59 = vcombine.high %v2400_v53, %v2408_v54  ;;  %v10767_v53 = vld [vmem:[#allocation11 + $0x60] ss:$16 sps:$4 sm:$0xff]   ;;  %v10775_v54 = vld [vmem:[#allocation11 + $0x84] ss:$16 sps:$4 sm:$0xff]  }
 0x20d   :  { %3407 = vmatpush1.bf16.msra.mxu1 %v9400_v61  ;;  %2319 = vmatprep.subr.bf16.mxu0 %v10736_v62  ;;  %v2416_v61 = vld [vmem:[#allocation7 + $0x238] sm:$0xff] }
 0x20e   :  { %3408 = vmatprep.subr.bf16.mxu1 %v9417_v60  ;;  %v2424_v62 = vld [vmem:[#allocation7 + $0x278] sm:$0xff]  ;;  %v9418_v60 = vcombine.low %v2399_v47, %v2407_v48  ;;  %v10761_v47 = vld [vmem:[#allocation11 + $0x40] ss:$16 sps:$4 sm:$0xff]  }
 0x20f   :  { %v9436_v6 = vcombine.low %v2416_v61, %v2424_v62  ;;  %v10764_v48 = vld [vmem:[#allocation11 + $0x240] ss:$16 sps:$4 sm:$0xff]  }
 0x210   :  { %2320 = vmatpush1.bf16.msra.mxu0 %v10734_v1  ;;  %v2439_v1 = vld [vmem:[#allocation7 + $0x2f0] sm:$0xff] }
 0x211   :  { %3409 = vmatpush1.bf16.msra.mxu1 %v9416_v2  ;;  %2321 = vmatprep.subr.bf16.mxu0 %v10739_v3  ;;  %v9437_v2 = vcombine.high %v2416_v61, %v2424_v62  ;;  %v2432_v3 = vld [vmem:[#allocation7 + $0x2b8] sm:$0xff]  ;;  %v12355_v61 = vsub.s32 1, %v12278_v42  ;;  %v10779_v62 = vld [vmem:[#allocation11 + $0xa0] ss:$16 sps:$4 sm:$0xff]  }
 0x212   :  { %3410 = vmatprep.subr.bf16.mxu1 %v9433_v4  ;;  %v2440_v4 = vld [vmem:[#allocation7 + $0x2f8] sm:$0xff] }
 0x214   :  { %2322 = vmatpush1.bf16.msra.mxu0 %v10737_v7  ;;  %v2447_v7 = vld [vmem:[#allocation7 + $0x330] sm:$0xff] }
 0x215   :  { %3411 = vmatpush1.bf16.msra.mxu1 %v9432_v29  ;;  %2323 = vmatprep.subr.bf16.mxu0 %v10742_v8  ;;  %v2455_v29 = vld [vmem:[#allocation7 + $0x370] sm:$0xff]  ;;  %v9451_v8 = vcombine.high %v2431_v0, %v2439_v1 }
 0x216   :  { %3412 = vmatprep.subr.bf16.mxu1 %v9449_v26  ;;  %v9453_v26 = vcombine.high %v2432_v3, %v2440_v4 }
 0x218   :  { %2324 = vmatpush1.bf16.msra.mxu0 %v10740_v11  ;;  %v9450_v11 = vcombine.low %v2431_v0, %v2439_v1  ;;  %v10790_v1 = vld [vmem:[#allocation11 + $0x2c4] ss:$16 sps:$4 sm:$0xff]  }
 0x219   :  { %3413 = vmatpush1.bf16.msra.mxu1 %v9448_v13  ;;  %2325 = vmatprep.subr.bf16.mxu0 %v10745_v12  ;;  %v9452_v12 = vcombine.low %v2432_v3, %v2440_v4  ;;  %v2463_v13 = vld [vmem:[#allocation7 + $0x3b0] sm:$0xff] }
 0x21a   :  { %3414 = vmatprep.subr.bf16.mxu1 %v9465_v18  ;;  %v2472_v18 = vld [vmem:[#allocation7 + $0x3f8] sm:$0xff]  ;;  %v9483_v34 = vcombine.high %v2463_v13, %v2471_v14  ;;  %v9482_v16 = vcombine.low %v2463_v13, %v2471_v14  ;;  %v10785_v3 = vld [vmem:[#allocation11 + $0xc0] ss:$16 sps:$4 sm:$0xff]  }
 0x21b   :  { %v9485_v35 = vcombine.high %v2464_v15, %v2472_v18  ;;  %v9484_v36 = vcombine.low %v2464_v15, %v2472_v18  ;;  %v10797_v13 = vld [vmem:[#allocation11 + $0x100] ss:$16 sps:$4 sm:$0xff]   ;;  %v10805_v15 = vld [vmem:[#allocation11 + $0x124] ss:$16 sps:$4 sm:$0xff]  }
 0x21c   :  { %2326 = vmatpush1.bf16.msra.mxu0 %v10743_v17  ;;  %v9467_v17 = vcombine.high %v2447_v7, %v2455_v29  ;;  %v10800_v14 = vld [vmem:[#allocation11 + $0x300] ss:$16 sps:$4 sm:$0xff]   ;;  %v10808_v18 = vld [vmem:[#allocation11 + $0x324] ss:$16 sps:$4 sm:$0xff]  }
 0x21d   :  { %3415 = vmatpush1.bf16.msra.mxu1 %v9464_v20  ;;  %2327 = vmatprep.subr.bf16.mxu0 %v10748_v21  ;;  %v9469_v20 = vcombine.high %v2448_v9, %v2456_v10 }
 0x21e   :  { %3416 = vmatprep.subr.bf16.mxu1 %v9481_v24 }
 0x220   :  { %2328 = vmatpush1.bf16.msra.mxu0 %v10746_v30  ;;  %v9466_v30 = vcombine.low %v2447_v7, %v2455_v29  ;;  %v10793_v7 = vld [vmem:[#allocation11 + $0xe4] ss:$16 sps:$4 sm:$0xff]  }
 0x221   :  { %3417 = vmatpush1.bf16.msra.mxu1 %v9480_v31  ;;  %3443 = vmatprep.subr.bf16.mxu0 %v9371_v32  ;;  %v9468_v31 = vcombine.low %v2448_v9, %v2456_v10  ;;  %v10796_v9 = vld [vmem:[#allocation11 + $0x2e4] ss:$16 sps:$4 sm:$0xff]   ;;  %v10794_v10 = vld [vmem:[#allocation11 + $0x2e0] ss:$16 sps:$4 sm:$0xff]  }
 0x222   :  { %3484 = vmatprep.subr.bf16.mxu1 %v9373_v33 }
 0x223   :  { %2330 = vmatmul.mubr.bf16.vlgmr.msra.gmra.mrb[4].mxu0 %v12292_v19  ;;  %v9402_v19 = vcombine.low %v2383_v39, %v2391_v40  ;;  %v10749_v39 = vld [vmem:[#allocation11] ss:$16 sps:$4 sm:$0xff]  }
 0x224   :  { %3435 = vmatmul.mubr.bf16.vlgmr.msra.gmra.mrb[24].mxu1 %v12334_v52  ;;  %3444 = vmatpush1.bf16.msra.mxu0 %v9370_v37  ;;  %v10751_v37 = vld [vmem:[#allocation11 + $0x4] ss:$16 sps:$4 sm:$0xff]   ;;  %v10752_v40 = vld [vmem:[#allocation11 + $0x200] ss:$16 sps:$4 sm:$0xff]  }
 0x225   :  { %3485 = vmatpush1.bf16.msra.mxu1 %v9372_v38  ;;  %3445 = vmatprep.subr.bf16.mxu0 %v9387_v41  ;;  %v10754_v38 = vld [vmem:[#allocation11 + $0x204] ss:$16 sps:$4 sm:$0xff]  }
 0x226   :  { %3486 = vmatprep.subr.bf16.mxu1 %v9389_v43  ;;  %3475 = vmatprep.mubr.bf16.mxu0 %v12099_v50  ;;  %v10757_v41 = vld [vmem:[#allocation11 + $0x24] ss:$16 sps:$4 sm:$0xff]  }
 0x227   :  { %3516 = vmatprep.mubr.bf16.mxu1 %v12099_v50  ;;  %v9435_v50 = vcombine.high %v2415_v56, %v2423_v57  ;;  %v10760_v43 = vld [vmem:[#allocation11 + $0x224] ss:$16 sps:$4 sm:$0xff]   ;;  %v10776_v56 = vld [vmem:[#allocation11 + $0x280] ss:$16 sps:$4 sm:$0xff]  }
 0x228   :  { %3446 = vmatpush1.bf16.msra.mxu0 %v9386_v45  ;;  %v10763_v45 = vld [vmem:[#allocation11 + $0x44] ss:$16 sps:$4 sm:$0xff]  }
 0x229   :  { %3487 = vmatpush1.bf16.msra.mxu1 %v9388_v46  ;;  %3447 = vmatprep.subr.bf16.mxu0 %v9403_v49  ;;  %v10766_v46 = vld [vmem:[#allocation11 + $0x244] ss:$16 sps:$4 sm:$0xff]  }
 0x22a   :  { %3488 = vmatprep.subr.bf16.mxu1 %v9405_v51  ;;  %v10769_v49 = vld [vmem:[#allocation11 + $0x64] ss:$16 sps:$4 sm:$0xff]  }
 0x22b   :  { %v10772_v51 = vld [vmem:[#allocation11 + $0x264] ss:$16 sps:$4 sm:$0xff]  }
 0x22c   :  { %3448 = vmatpush1.bf16.msra.mxu0 %v9402_v19  ;;  %v10778_v19 = vld [vmem:[#allocation11 + $0x284] ss:$16 sps:$4 sm:$0xff]  }
 0x22d   :  { %3489 = vmatpush1.bf16.msra.mxu1 %v9404_v55  ;;  %3449 = vmatprep.subr.bf16.mxu0 %v9419_v58  ;;  %v10773_v55 = vld [vmem:[#allocation11 + $0x80] ss:$16 sps:$4 sm:$0xff]   ;;  %v10781_v58 = vld [vmem:[#allocation11 + $0xa4] ss:$16 sps:$4 sm:$0xff]  }
 0x22e   :  { %3490 = vmatprep.subr.bf16.mxu1 %v9421_v59  ;;  %v12352_v57 = vld [vmem:[#allocation8] sm:$0xff] }
 0x22f   :  { %v10784_v59 = vld [vmem:[#allocation11 + $0x2a4] ss:$16 sps:$4 sm:$0xff]   ;;  %v2484_v0 = vrot.slane %v12352_v57, %v12355_v61 }
 0x230   :  { %3450 = vmatpush1.bf16.msra.mxu0 %v9418_v60  ;;  %v10782_v60 = vld [vmem:[#allocation11 + $0x2a0] ss:$16 sps:$4 sm:$0xff]  }
 0x231   :  { %3491 = vmatpush1.bf16.msra.mxu1 %v9420_v63  ;;  %3451 = vmatprep.subr.bf16.mxu0 %v9435_v50  ;;  %v10787_v63 = vld [vmem:[#allocation11 + $0xc4] ss:$16 sps:$4 sm:$0xff]  }
 0x232   :  { %3492 = vmatprep.subr.bf16.mxu1 %v9437_v2 }
 0x234   :  { %3452 = vmatpush1.bf16.msra.mxu0 %v9434_v5 }
 0x235   :  { %3493 = vmatpush1.bf16.msra.mxu1 %v9436_v6  ;;  %3453 = vmatprep.subr.bf16.mxu0 %v9451_v8  ;;  %v10788_v6 = vld [vmem:[#allocation11 + $0x2c0] ss:$16 sps:$4 sm:$0xff]  }
 0x236   :  { %3494 = vmatprep.subr.bf16.mxu1 %v9453_v26  ;;  %v12342_v21 = vpop.f32.mrb[0].mxu0  ;;  %v10791_v26 = vld [vmem:[#allocation11 + $0xe0] ss:$16 sps:$4 sm:$0xff]  }
 0x237   :  { %v12344_v23 = vpop.f32.mrb[0].mxu1  ;;  %v12346_v24 = vpop.f32.mrb[1].mxu0 }
 0x238   :  { %v12348_v25 = vpop.f32.mrb[1].mxu1  ;;  %v2089_v27 = vpop.f32.mrb[2].mxu0  ;;  %3454 = vmatpush1.bf16.msra.mxu0 %v9450_v11  ;;  %v10799_v11 = vld [vmem:[#allocation11 + $0x104] ss:$16 sps:$4 sm:$0xff]  }
 0x239   :  { %v2212_v28 = vpop.f32.mrb[2].mxu1  ;;  %3495 = vmatpush1.bf16.msra.mxu1 %v9452_v12  ;;  %v2090_v32 = vpop.f32.mrb[3].mxu0  ;;  %3455 = vmatprep.subr.bf16.mxu0 %v9467_v17  ;;  %v10802_v12 = vld [vmem:[#allocation11 + $0x304] ss:$16 sps:$4 sm:$0xff]   ;;  %v10803_v17 = vld [vmem:[#allocation11 + $0x120] ss:$16 sps:$4 sm:$0xff]  }
 0x23a   :  { %v2213_v33 = vpop.f32.mrb[3].mxu1  ;;  %3496 = vmatprep.subr.bf16.mxu1 %v9469_v20  ;;  %v10806_v20 = vld [vmem:[#allocation11 + $0x320] ss:$16 sps:$4 sm:$0xff]   ;;  %v10811_v27 = vld [vmem:[#allocation11 + $0x144] ss:$16 sps:$4 sm:$0xff]  }
 0x23b   :  { %v10814_v28 = vld [vmem:[#allocation11 + $0x344] ss:$16 sps:$4 sm:$0xff]  }
 0x23c   :  { %3456 = vmatpush1.bf16.msra.mxu0 %v9466_v30  ;;  %v10809_v30 = vld [vmem:[#allocation11 + $0x140] ss:$16 sps:$4 sm:$0xff]   ;;  %v10817_v32 = vld [vmem:[#allocation11 + $0x164] ss:$16 sps:$4 sm:$0xff]  }
 0x23d   :  { %3497 = vmatpush1.bf16.msra.mxu1 %v9468_v31  ;;  %3457 = vmatprep.subr.bf16.mxu0 %v9483_v34  ;;  %v10812_v31 = vld [vmem:[#allocation11 + $0x340] ss:$16 sps:$4 sm:$0xff]   ;;  %v10820_v33 = vld [vmem:[#allocation11 + $0x364] ss:$16 sps:$4 sm:$0xff]  }
 0x23e   :  { %3498 = vmatprep.subr.bf16.mxu1 %v9485_v35  ;;  %v10815_v34 = vld [vmem:[#allocation11 + $0x160] ss:$16 sps:$4 sm:$0xff]  }
 0x23f   :  { %v10818_v35 = vld [vmem:[#allocation11 + $0x360] ss:$16 sps:$4 sm:$0xff]  }
 0x240   :  { %3458 = vmatpush1.bf16.msra.mxu0 %v9482_v16  ;;  %v10823_v16 = vld [vmem:[#allocation11 + $0x184] ss:$16 sps:$4 sm:$0xff]  }
 0x241   :  { %3499 = vmatpush1.bf16.msra.mxu1 %v9484_v36  ;;  %6811 = vmatprep.subr.bf16.mxu0 %v10751_v37  ;;  %v10826_v36 = vld [vmem:[#allocation11 + $0x384] ss:$16 sps:$4 sm:$0xff]   ;;  %v10821_v37 = vld [vmem:[#allocation11 + $0x180] ss:$16 sps:$4 sm:$0xff]  }
 0x242   :  { %6852 = vmatprep.subr.bf16.mxu1 %v10754_v38  ;;  %v10824_v38 = vld [vmem:[#allocation11 + $0x380] ss:$16 sps:$4 sm:$0xff]  }
 0x243   :  { %3476 = vmatmul.mubr.bf16.vlgmr.msra.gmra.mrb[8].mxu0 %v12334_v52 }
 0x244   :  { %3517 = vmatmul.mubr.bf16.vlgmr.msra.gmra.mrb[28].mxu1 %v12334_v52  ;;  %6812 = vmatpush1.bf16.msra.mxu0 %v10749_v39  ;;  %v10770_v52 = vld [vmem:[#allocation11 + $0x260] ss:$16 sps:$4 sm:$0xff]   ;;  %v10829_v39 = vld [vmem:[#allocation11 + $0x1a4] ss:$16 sps:$4 sm:$0xff]  }
 0x245   :  { %6853 = vmatpush1.bf16.msra.mxu1 %v10752_v40  ;;  %6813 = vmatprep.subr.bf16.mxu0 %v10757_v41  ;;  %v10832_v40 = vld [vmem:[#allocation11 + $0x3a4] ss:$16 sps:$4 sm:$0xff]   ;;  %v12365_v41 = vsub.s32 3, %v12278_v42 }
 0x246   :  { %6854 = vmatprep.subr.bf16.mxu1 %v10760_v43  ;;  %v10827_v43 = vld [vmem:[#allocation11 + $0x1a0] ss:$16 sps:$4 sm:$0xff]  }
 0x248   :  { %6814 = vmatpush1.bf16.msra.mxu0 %v10755_v22  ;;  %v10830_v22 = vld [vmem:[#allocation11 + $0x3a0] ss:$16 sps:$4 sm:$0xff]  }
 0x249   :  { %6855 = vmatpush1.bf16.msra.mxu1 %v10758_v44  ;;  %6815 = vmatprep.subr.bf16.mxu0 %v10763_v45  ;;  %v10835_v44 = vld [vmem:[#allocation11 + $0x1c4] ss:$16 sps:$4 sm:$0xff]  }
 0x24a   :  { %6856 = vmatprep.subr.bf16.mxu1 %v10766_v46  ;;  %v10838_v45 = vld [vmem:[#allocation11 + $0x3c4] ss:$16 sps:$4 sm:$0xff]   ;;  %v2492_v46 = vrot.slane %v12352_v57, %v12365_v41 }
 0x24c   :  { %6816 = vmatpush1.bf16.msra.mxu0 %v10761_v47  ;;  %v12370_v47 = vsub.s32 0, %v12278_v42 }
 0x24d   :  { %6857 = vmatpush1.bf16.msra.mxu1 %v10764_v48  ;;  %6817 = vmatprep.subr.bf16.mxu0 %v10769_v49  ;;  %v12373_v48 = vsub.s32 2, %v12278_v42 }
 0x24e   :  { %6858 = vmatprep.subr.bf16.mxu1 %v10772_v51 }
 0x250   :  { %6818 = vmatpush1.bf16.msra.mxu0 %v10767_v53  ;;  %v10833_v53 = vld [vmem:[#allocation11 + $0x1c0] ss:$16 sps:$4 sm:$0xff]  }
 0x251   :  { %6859 = vmatpush1.bf16.msra.mxu1 %v10770_v52  ;;  %6819 = vmatprep.subr.bf16.mxu0 %v10775_v54  ;;  %v10836_v52 = vld [vmem:[#allocation11 + $0x3c0] ss:$16 sps:$4 sm:$0xff]  }
 0x252   :  { %6860 = vmatprep.subr.bf16.mxu1 %v10778_v19 }
 0x254   :  { %6820 = vmatpush1.bf16.msra.mxu0 %v10773_v55  ;;  %v10841_v55 = vld [vmem:[#allocation11 + $0x1e4] ss:$16 sps:$4 sm:$0xff]  }
 0x255   :  { %6861 = vmatpush1.bf16.msra.mxu1 %v10776_v56  ;;  %6821 = vmatprep.subr.bf16.mxu0 %v10781_v58  ;;  %v10844_v56 = vld [vmem:[#allocation11 + $0x3e4] ss:$16 sps:$4 sm:$0xff]   ;;  %v2480_v58 = vrot.slane %v12352_v57, %v12370_v47 }
 0x256   :  { %6862 = vmatprep.subr.bf16.mxu1 %v10784_v59  ;;  %v2488_v59 = vrot.slane %v12352_v57, %v12373_v48 }
 0x257   :  { %v12359_v50 = vpop.f32.mrb[4].mxu1 }
 0x258   :  { %v3233_v2 = vpop.f32.mrb[5].mxu1  ;;  %6822 = vmatpush1.bf16.msra.mxu0 %v10779_v62 }
 0x259   :  { %v3234_v4 = vadd.f32 %v3233_v2, %v2484_v0  ;;  %v3235_v5 = vpop.f32.mrb[6].mxu1  ;;  %6863 = vmatpush1.bf16.msra.mxu1 %v10782_v60  ;;  %6823 = vmatprep.subr.bf16.mxu0 %v10787_v63  ;;  %v10839_v63 = vld [vmem:[#allocation11 + $0x1e0] ss:$16 sps:$4 sm:$0xff]   ;;  %v10850_v2 = vld [vmem:[#allocation11 + $0x604] ss:$16 sps:$4 sm:$0xff]  }
 0x25a   :  { %v3236_v29 = vpop.f32.mrb[7].mxu1  ;;  %6864 = vmatprep.subr.bf16.mxu1 %v10790_v1  ;;  %v10842_v0 = vld [vmem:[#allocation11 + $0x3e0] ss:$16 sps:$4 sm:$0xff]   ;;  %v10847_v1 = vld [vmem:[#allocation11 + $0x404] ss:$16 sps:$4 sm:$0xff]  }
 0x25b   :  { %v12361_v8 = vpack.c.bf16 %v3234_v4, %v3234_v4  ;;  %v10845_v5 = vld [vmem:[#allocation11 + $0x400] ss:$16 sps:$4 sm:$0xff]   ;;  %v10856_v29 = vld [vmem:[#allocation11 + $0x624] ss:$16 sps:$4 sm:$0xff]  }
 0x25c   :  { %6824 = vmatpush1.bf16.msra.mxu0 %v10785_v3  ;;  %v3232_v3 = vadd.f32 %v12359_v50, %v2480_v58  ;;  %v10851_v50 = vld [vmem:[#allocation11 + $0x420] ss:$16 sps:$4 sm:$0xff]  }
 0x25d   :  { %6865 = vmatpush1.bf16.msra.mxu1 %v10788_v6  ;;  %6843 = vmatprep.mubr.bf16.mxu0 %v12361_v8  ;;  %v10848_v6 = vld [vmem:[#allocation11 + $0x600] ss:$16 sps:$4 sm:$0xff]  }
 0x25e   :  { %6825 = vmatprep.subr.bf16.mxu0 %v10793_v7  ;;  %6866 = vmatprep.subr.bf16.mxu1 %v10796_v9  ;;  %v10853_v7 = vld [vmem:[#allocation11 + $0x424] ss:$16 sps:$4 sm:$0xff]   ;;  %v10896_v58 = vld [vmem:[#allocation11 + $0x700] ss:$16 sps:$4 sm:$0xff]  }
 0x260   :  { %6826 = vmatpush1.bf16.msra.mxu0 %v10791_v26  ;;  %v12383_v26 = vpack.c.bf16 %v3232_v3, %v3232_v3  ;;  %v10905_v3 = vld [vmem:[#allocation11 + $0x540] ss:$16 sps:$4 sm:$0xff]  }
 0x261   :  { %6867 = vmatpush1.bf16.msra.mxu1 %v10794_v10  ;;  %6827 = vmatprep.subr.bf16.mxu0 %v10799_v11  ;;  %v10854_v10 = vld [vmem:[#allocation11 + $0x620] ss:$16 sps:$4 sm:$0xff]   ;;  %v10859_v11 = vld [vmem:[#allocation11 + $0x444] ss:$16 sps:$4 sm:$0xff]  }
 0x262   :  { %6868 = vmatprep.subr.bf16.mxu1 %v10802_v12  ;;  %v10862_v12 = vld [vmem:[#allocation11 + $0x644] ss:$16 sps:$4 sm:$0xff]  }
 0x264   :  { %6828 = vmatpush1.bf16.msra.mxu0 %v10797_v13  ;;  %v10857_v13 = vld [vmem:[#allocation11 + $0x440] ss:$16 sps:$4 sm:$0xff]  }
 0x265   :  { %6869 = vmatpush1.bf16.msra.mxu1 %v10800_v14  ;;  %6829 = vmatprep.subr.bf16.mxu0 %v10805_v15  ;;  %v10860_v14 = vld [vmem:[#allocation11 + $0x640] ss:$16 sps:$4 sm:$0xff]   ;;  %v10865_v15 = vld [vmem:[#allocation11 + $0x464] ss:$16 sps:$4 sm:$0xff]  }
 0x266   :  { %6870 = vmatprep.subr.bf16.mxu1 %v10808_v18  ;;  %v10868_v18 = vld [vmem:[#allocation11 + $0x664] ss:$16 sps:$4 sm:$0xff]  }
 0x268   :  { %6830 = vmatpush1.bf16.msra.mxu0 %v10803_v17  ;;  %v10863_v17 = vld [vmem:[#allocation11 + $0x460] ss:$16 sps:$4 sm:$0xff]  }
 0x269   :  { %6871 = vmatpush1.bf16.msra.mxu1 %v10806_v20  ;;  %6831 = vmatprep.subr.bf16.mxu0 %v10811_v27  ;;  %v10866_v20 = vld [vmem:[#allocation11 + $0x660] ss:$16 sps:$4 sm:$0xff]   ;;  %v10871_v27 = vld [vmem:[#allocation11 + $0x484] ss:$16 sps:$4 sm:$0xff]  }
 0x26a   :  { %6872 = vmatprep.subr.bf16.mxu1 %v10814_v28  ;;  %v10874_v28 = vld [vmem:[#allocation11 + $0x684] ss:$16 sps:$4 sm:$0xff]  }
 0x26c   :  { %6832 = vmatpush1.bf16.msra.mxu0 %v10809_v30  ;;  %v10869_v30 = vld [vmem:[#allocation11 + $0x480] ss:$16 sps:$4 sm:$0xff]  }
 0x26d   :  { %6873 = vmatpush1.bf16.msra.mxu1 %v10812_v31  ;;  %6833 = vmatprep.subr.bf16.mxu0 %v10817_v32  ;;  %v10872_v31 = vld [vmem:[#allocation11 + $0x680] ss:$16 sps:$4 sm:$0xff]   ;;  %v12390_v32 = vsub.s32 5, %v12278_v42 }
 0x26e   :  { %6874 = vmatprep.subr.bf16.mxu1 %v10820_v33  ;;  %v10877_v33 = vld [vmem:[#allocation11 + $0x4a4] ss:$16 sps:$4 sm:$0xff]  }
 0x270   :  { %6834 = vmatpush1.bf16.msra.mxu0 %v10815_v34  ;;  %v10880_v34 = vld [vmem:[#allocation11 + $0x6a4] ss:$16 sps:$4 sm:$0xff]  }
 0x271   :  { %6875 = vmatpush1.bf16.msra.mxu1 %v10818_v35  ;;  %6835 = vmatprep.subr.bf16.mxu0 %v10823_v16  ;;  %v10875_v35 = vld [vmem:[#allocation11 + $0x4a0] ss:$16 sps:$4 sm:$0xff]  }
 0x272   :  { %6876 = vmatprep.subr.bf16.mxu1 %v10826_v36  ;;  %v10878_v16 = vld [vmem:[#allocation11 + $0x6a0] ss:$16 sps:$4 sm:$0xff]   ;;  %v10883_v36 = vld [vmem:[#allocation11 + $0x4c4] ss:$16 sps:$4 sm:$0xff]  }
 0x274   :  { %6836 = vmatpush1.bf16.msra.mxu0 %v10821_v37  ;;  %v10886_v37 = vld [vmem:[#allocation11 + $0x6c4] ss:$16 sps:$4 sm:$0xff]  }
 0x275   :  { %6877 = vmatpush1.bf16.msra.mxu1 %v10824_v38  ;;  %6837 = vmatprep.subr.bf16.mxu0 %v10829_v39  ;;  %v2500_v38 = vrot.slane %v12352_v57, %v12390_v32 }
 0x276   :  { %6878 = vmatprep.subr.bf16.mxu1 %v10832_v40 }
 0x277   :  { %v3272_v49 = vpop.f32.mrb[8].mxu1 }
 0x278   :  { %v3274_v51 = vpop.f32.mrb[9].mxu1  ;;  %6838 = vmatpush1.bf16.msra.mxu0 %v10827_v43  ;;  %v3273_v4 = vadd.f32 %v3272_v49, %v2488_v59  ;;  %v10881_v43 = vld [vmem:[#allocation11 + $0x4c0] ss:$16 sps:$4 sm:$0xff]   ;;  %v10901_v59 = vld [vmem:[#allocation11 + $0x524] ss:$16 sps:$4 sm:$0xff]  }
 0x279   :  { %v3275_v54 = vadd.f32 %v3274_v51, %v2492_v46  ;;  %v3276_v19 = vpop.f32.mrb[10].mxu1  ;;  %6879 = vmatpush1.bf16.msra.mxu1 %v10830_v22  ;;  %6839 = vmatprep.subr.bf16.mxu0 %v10835_v44  ;;  %v10889_v46 = vld [vmem:[#allocation11 + $0x4e4] ss:$16 sps:$4 sm:$0xff]  }
 0x27a   :  { %v3277_v62 = vpop.f32.mrb[11].mxu1  ;;  %6880 = vmatprep.subr.bf16.mxu1 %v10838_v45  ;;  %v12385_v9 = vpack.c.bf16 %v3273_v4, %v3273_v4  ;;  %v10884_v45 = vld [vmem:[#allocation11 + $0x6c0] ss:$16 sps:$4 sm:$0xff]   ;;  %v10895_v19 = vld [vmem:[#allocation11 + $0x504] ss:$16 sps:$4 sm:$0xff]  }
 0x27b   :  { %v12379_v60 = vpack.c.bf16 %v3275_v54, %v3275_v54  ;;  %v10890_v54 = vld [vmem:[#allocation11 + $0x6e0] ss:$16 sps:$4 sm:$0xff]   ;;  %v10904_v62 = vld [vmem:[#allocation11 + $0x724] ss:$16 sps:$4 sm:$0xff]  }
 0x27c   :  { %6840 = vmatpush1.bf16.msra.mxu0 %v10833_v53  ;;  %v10887_v53 = vld [vmem:[#allocation11 + $0x4e0] ss:$16 sps:$4 sm:$0xff]  }
 0x27d   :  { %6881 = vmatpush1.bf16.msra.mxu1 %v10836_v52  ;;  %6884 = vmatprep.mubr.bf16.mxu1 %v12379_v60  ;;  %v10892_v52 = vld [vmem:[#allocation11 + $0x6e4] ss:$16 sps:$4 sm:$0xff]   ;;  %v10908_v4 = vld [vmem:[#allocation11 + $0x740] ss:$16 sps:$4 sm:$0xff]  }
 0x27e   :  { %6841 = vmatprep.subr.bf16.mxu0 %v10841_v55  ;;  %6882 = vmatprep.subr.bf16.mxu1 %v10844_v56  ;;  %v10898_v55 = vld [vmem:[#allocation11 + $0x704] ss:$16 sps:$4 sm:$0xff]   ;;  %v10893_v56 = vld [vmem:[#allocation11 + $0x500] ss:$16 sps:$4 sm:$0xff]  }
 0x280   :  { %6842 = vmatpush1.bf16.msra.mxu0 %v10839_v63  ;;  %v10899_v63 = vld [vmem:[#allocation11 + $0x520] ss:$16 sps:$4 sm:$0xff]  }
 0x281   :  { %6883 = vmatpush1.bf16.msra.mxu1 %v10842_v0  ;;  %6893 = vmatprep.subr.bf16.mxu0 %v10847_v1  ;;  %v10902_v0 = vld [vmem:[#allocation11 + $0x720] ss:$16 sps:$4 sm:$0xff]   ;;  %v10907_v1 = vld [vmem:[#allocation11 + $0x544] ss:$16 sps:$4 sm:$0xff]  }
 0x282   :  { %6934 = vmatprep.subr.bf16.mxu1 %v10850_v2  ;;  %v10910_v2 = vld [vmem:[#allocation11 + $0x744] ss:$16 sps:$4 sm:$0xff]  }
 0x283   :  { %6844 = vmatmul.mubr.bf16.vlgmr.msra.gmra.mrb[12].mxu0 %v12383_v26 }
 0x284   :  { %6885 = vmatmul.mubr.bf16.vlgmr.msra.gmra.mrb[32].mxu1 %v12385_v9  ;;  %6894 = vmatpush1.bf16.msra.mxu0 %v10845_v5  ;;  %v10913_v5 = vld [vmem:[#allocation11 + $0x564] ss:$16 sps:$4 sm:$0xff]  }
 0x285   :  { %6935 = vmatpush1.bf16.msra.mxu1 %v10848_v6  ;;  %6895 = vmatprep.subr.bf16.mxu0 %v10853_v7  ;;  %v10916_v6 = vld [vmem:[#allocation11 + $0x764] ss:$16 sps:$4 sm:$0xff]   ;;  %v10911_v7 = vld [vmem:[#allocation11 + $0x560] ss:$16 sps:$4 sm:$0xff]  }
 0x286   :  { %6936 = vmatprep.subr.bf16.mxu1 %v10856_v29  ;;  %v10914_v29 = vld [vmem:[#allocation11 + $0x760] ss:$16 sps:$4 sm:$0xff]  }
 0x288   :  { %6896 = vmatpush1.bf16.msra.mxu0 %v10851_v50  ;;  %v10919_v50 = vld [vmem:[#allocation11 + $0x584] ss:$16 sps:$4 sm:$0xff]  }
 0x289   :  { %6937 = vmatpush1.bf16.msra.mxu1 %v10854_v10  ;;  %6897 = vmatprep.subr.bf16.mxu0 %v10859_v11  ;;  %v10922_v10 = vld [vmem:[#allocation11 + $0x784] ss:$16 sps:$4 sm:$0xff]   ;;  %v10917_v11 = vld [vmem:[#allocation11 + $0x580] ss:$16 sps:$4 sm:$0xff]  }
 0x28a   :  { %6938 = vmatprep.subr.bf16.mxu1 %v10862_v12  ;;  %v10920_v12 = vld [vmem:[#allocation11 + $0x780] ss:$16 sps:$4 sm:$0xff]  }
 0x28c   :  { %6898 = vmatpush1.bf16.msra.mxu0 %v10857_v13  ;;  %v2507_v13 = vsub.s32 7, %v12278_v42 }
 0x28d   :  { %6939 = vmatpush1.bf16.msra.mxu1 %v10860_v14  ;;  %6899 = vmatprep.subr.bf16.mxu0 %v10865_v15  ;;  %v10925_v14 = vld [vmem:[#allocation11 + $0x5a4] ss:$16 sps:$4 sm:$0xff]  }
 0x28e   :  { %6940 = vmatprep.subr.bf16.mxu1 %v10868_v18  ;;  %v10928_v15 = vld [vmem:[#allocation11 + $0x7a4] ss:$16 sps:$4 sm:$0xff]   ;;  %v10923_v18 = vld [vmem:[#allocation11 + $0x5a0] ss:$16 sps:$4 sm:$0xff]  }
 0x290   :  { %6900 = vmatpush1.bf16.msra.mxu0 %v10863_v17  ;;  %v10926_v17 = vld [vmem:[#allocation11 + $0x7a0] ss:$16 sps:$4 sm:$0xff]  }
 0x291   :  { %6941 = vmatpush1.bf16.msra.mxu1 %v10866_v20  ;;  %6901 = vmatprep.subr.bf16.mxu0 %v10871_v27  ;;  %v2508_v20 = vrot.slane %v12352_v57, %v2507_v13  ;;  %v12404_v27 = vsub.s32 4, %v12278_v42 }
 0x292   :  { %6942 = vmatprep.subr.bf16.mxu1 %v10874_v28  ;;  %v2503_v28 = vsub.s32 6, %v12278_v42  ;;  %v11136_v42 = vld [vmem:[#allocation11 + $0x208] ss:$16 sps:$4 sm:$0xff]  }
 0x294   :  { %6902 = vmatpush1.bf16.msra.mxu0 %v10869_v30  ;;  %v10931_v30 = vld [vmem:[#allocation11 + $0x5c4] ss:$16 sps:$4 sm:$0xff]  }
 0x295   :  { %6943 = vmatpush1.bf16.msra.mxu1 %v10872_v31  ;;  %6903 = vmatprep.subr.bf16.mxu0 %v10877_v33  ;;  %v10934_v31 = vld [vmem:[#allocation11 + $0x7c4] ss:$16 sps:$4 sm:$0xff]  }
 0x296   :  { %6944 = vmatprep.subr.bf16.mxu1 %v10880_v34  ;;  %v10929_v34 = vld [vmem:[#allocation11 + $0x5c0] ss:$16 sps:$4 sm:$0xff]  }
 0x297   :  { %v12394_v39 = vpop.f32.mrb[12].mxu1 }
 0x298   :  { %v3315_v40 = vpop.f32.mrb[13].mxu1  ;;  %6904 = vmatpush1.bf16.msra.mxu0 %v10875_v35  ;;  %v10932_v35 = vld [vmem:[#allocation11 + $0x7c0] ss:$16 sps:$4 sm:$0xff]  }
 0x299   :  { %v3316_v22 = vadd.f32 %v3315_v40, %v2500_v38  ;;  %v3317_v44 = vpop.f32.mrb[14].mxu1  ;;  %6945 = vmatpush1.bf16.msra.mxu1 %v10878_v16  ;;  %6905 = vmatprep.subr.bf16.mxu0 %v10883_v36  ;;  %v2496_v38 = vrot.slane %v12352_v57, %v12404_v27  ;;  %v2504_v40 = vrot.slane %v12352_v57, %v2503_v28  ;;  %v10941_v57 = vld [vmem:[#allocation11 + $0x800] ss:$16 sps:$4 sm:$0xff]  }
 0x29a   :  { %v3318_v49 = vpop.f32.mrb[15].mxu1  ;;  %6946 = vmatprep.subr.bf16.mxu1 %v10886_v37 }
 0x29b   :  { %v12396_v51 = vpack.c.bf16 %v3316_v22, %v3316_v22  ;;  %v10937_v22 = vld [vmem:[#allocation11 + $0x5e4] ss:$16 sps:$4 sm:$0xff]  }
 0x29c   :  { %6906 = vmatpush1.bf16.msra.mxu0 %v10881_v43  ;;  %v10940_v49 = vld [vmem:[#allocation11 + $0x7e4] ss:$16 sps:$4 sm:$0xff]  }
 0x29d   :  { %6947 = vmatpush1.bf16.msra.mxu1 %v10884_v45  ;;  %6925 = vmatprep.mubr.bf16.mxu0 %v12396_v51  ;;  %v10935_v45 = vld [vmem:[#allocation11 + $0x5e0] ss:$16 sps:$4 sm:$0xff]  }
 0x29e   :  { %6907 = vmatprep.subr.bf16.mxu0 %v10889_v46  ;;  %6948 = vmatprep.subr.bf16.mxu1 %v10892_v52  ;;  %v10938_v46 = vld [vmem:[#allocation11 + $0x7e0] ss:$16 sps:$4 sm:$0xff]  }
 0x2a0   :  { %6908 = vmatpush1.bf16.msra.mxu0 %v10887_v53  ;;  %v3314_v53 = vadd.f32 %v12394_v39, %v2496_v38  ;;  %v10947_v39 = vld [vmem:[#allocation11 + $0x820] ss:$16 sps:$4 sm:$0xff]  }
 0x2a1   :  { %6949 = vmatpush1.bf16.msra.mxu1 %v10890_v54  ;;  %6909 = vmatprep.subr.bf16.mxu0 %v10895_v19  ;;  %v10943_v54 = vld [vmem:[#allocation11 + $0x804] ss:$16 sps:$4 sm:$0xff]  }
 0x2a2   :  { %6950 = vmatprep.subr.bf16.mxu1 %v10898_v55  ;;  %v10946_v19 = vld [vmem:[#allocation11 + $0xa04] ss:$16 sps:$4 sm:$0xff]   ;;  %v10944_v55 = vld [vmem:[#allocation11 + $0xa00] ss:$16 sps:$4 sm:$0xff]  }
 0x2a4   :  { %6910 = vmatpush1.bf16.msra.mxu0 %v10893_v56  ;;  %v10949_v56 = vld [vmem:[#allocation11 + $0x824] ss:$16 sps:$4 sm:$0xff]  }
 0x2a5   :  { %6951 = vmatpush1.bf16.msra.mxu1 %v10896_v58  ;;  %6911 = vmatprep.subr.bf16.mxu0 %v10901_v59  ;;  %v10952_v58 = vld [vmem:[#allocation11 + $0xa24] ss:$16 sps:$4 sm:$0xff]   ;;  %v12416_v59 = vpack.c.bf16 %v3314_v53, %v3314_v53 }
 0x2a6   :  { %6952 = vmatprep.subr.bf16.mxu1 %v10904_v62  ;;  %v10994_v53 = vld [vmem:[#allocation11 + $0xb04] ss:$16 sps:$4 sm:$0xff]  }
 0x2a8   :  { %6912 = vmatpush1.bf16.msra.mxu0 %v10899_v63  ;;  %v10950_v63 = vld [vmem:[#allocation11 + $0xa20] ss:$16 sps:$4 sm:$0xff]  }
 0x2a9   :  { %6953 = vmatpush1.bf16.msra.mxu1 %v10902_v0  ;;  %6913 = vmatprep.subr.bf16.mxu0 %v10907_v1  ;;  %v10955_v0 = vld [vmem:[#allocation11 + $0x844] ss:$16 sps:$4 sm:$0xff]  }
 0x2aa   :  { %6954 = vmatprep.subr.bf16.mxu1 %v10910_v2  ;;  %v10958_v1 = vld [vmem:[#allocation11 + $0xa44] ss:$16 sps:$4 sm:$0xff]   ;;  %v10953_v2 = vld [vmem:[#allocation11 + $0x840] ss:$16 sps:$4 sm:$0xff]  }
 0x2ac   :  { %6914 = vmatpush1.bf16.msra.mxu0 %v10905_v3  ;;  %v10956_v3 = vld [vmem:[#allocation11 + $0xa40] ss:$16 sps:$4 sm:$0xff]  }
 0x2ad   :  { %6955 = vmatpush1.bf16.msra.mxu1 %v10908_v4  ;;  %6915 = vmatprep.subr.bf16.mxu0 %v10913_v5  ;;  %v10961_v4 = vld [vmem:[#allocation11 + $0x864] ss:$16 sps:$4 sm:$0xff]  }
 0x2ae   :  { %6956 = vmatprep.subr.bf16.mxu1 %v10916_v6  ;;  %v10964_v5 = vld [vmem:[#allocation11 + $0xa64] ss:$16 sps:$4 sm:$0xff]   ;;  %v10959_v6 = vld [vmem:[#allocation11 + $0x860] ss:$16 sps:$4 sm:$0xff]  }
 0x2b0   :  { %6916 = vmatpush1.bf16.msra.mxu0 %v10911_v7  ;;  %v10962_v7 = vld [vmem:[#allocation11 + $0xa60] ss:$16 sps:$4 sm:$0xff]  }
 0x2b1   :  { %6957 = vmatpush1.bf16.msra.mxu1 %v10914_v29  ;;  %6917 = vmatprep.subr.bf16.mxu0 %v10919_v50  ;;  %v10967_v29 = vld [vmem:[#allocation11 + $0x884] ss:$16 sps:$4 sm:$0xff]  }
 0x2b2   :  { %6958 = vmatprep.subr.bf16.mxu1 %v10922_v10  ;;  %v10970_v50 = vld [vmem:[#allocation11 + $0xa84] ss:$16 sps:$4 sm:$0xff]   ;;  %v10965_v10 = vld [vmem:[#allocation11 + $0x880] ss:$16 sps:$4 sm:$0xff]  }
 0x2b4   :  { %6918 = vmatpush1.bf16.msra.mxu0 %v10917_v11  ;;  %v10968_v11 = vld [vmem:[#allocation11 + $0xa80] ss:$16 sps:$4 sm:$0xff]  }
 0x2b5   :  { %6959 = vmatpush1.bf16.msra.mxu1 %v10920_v12  ;;  %6919 = vmatprep.subr.bf16.mxu0 %v10925_v14  ;;  %v12422_v12 = vld [vmem:[#allocation8 + $0x8] sm:$0xff]  ;;  %v10973_v14 = vld [vmem:[#allocation11 + $0x8a4] ss:$16 sps:$4 sm:$0xff]  }
 0x2b6   :  { %6960 = vmatprep.subr.bf16.mxu1 %v10928_v15  ;;  %v10976_v15 = vld [vmem:[#allocation11 + $0xaa4] ss:$16 sps:$4 sm:$0xff]  }
 0x2b7   :  { %v3354_v33 = vpop.f32.mrb[16].mxu1 }
 0x2b8   :  { %v3356_v16 = vpop.f32.mrb[17].mxu1  ;;  %6920 = vmatpush1.bf16.msra.mxu0 %v10923_v18  ;;  %v3355_v52 = vadd.f32 %v3354_v33, %v2504_v40  ;;  %v10971_v18 = vld [vmem:[#allocation11 + $0x8a0] ss:$16 sps:$4 sm:$0xff]   ;;  %v10985_v40 = vld [vmem:[#allocation11 + $0x8e4] ss:$16 sps:$4 sm:$0xff]  }
 0x2b9   :  { %v3357_v36 = vadd.f32 %v3356_v16, %v2508_v20  ;;  %v3358_v37 = vpop.f32.mrb[18].mxu1  ;;  %6961 = vmatpush1.bf16.msra.mxu1 %v10926_v17  ;;  %6921 = vmatprep.subr.bf16.mxu0 %v10931_v30  ;;  %v10974_v17 = vld [vmem:[#allocation11 + $0xaa0] ss:$16 sps:$4 sm:$0xff]   ;;  %v10979_v20 = vld [vmem:[#allocation11 + $0x8c4] ss:$16 sps:$4 sm:$0xff]  }
 0x2ba   :  { %v3359_v43 = vpop.f32.mrb[19].mxu1  ;;  %6962 = vmatprep.subr.bf16.mxu1 %v10934_v31  ;;  %v12418_v62 = vpack.c.bf16 %v3355_v52, %v3355_v52  ;;  %v10982_v30 = vld [vmem:[#allocation11 + $0xac4] ss:$16 sps:$4 sm:$0xff]   ;;  %v2516_v31 = vrot.slane %v12422_v12, %v12355_v61  ;;  %v10980_v37 = vld [vmem:[#allocation11 + $0xac0] ss:$16 sps:$4 sm:$0xff]  }
 0x2bb   :  { %v12412_v44 = vpack.c.bf16 %v3357_v36, %v3357_v36  ;;  %v10977_v36 = vld [vmem:[#allocation11 + $0x8c0] ss:$16 sps:$4 sm:$0xff]  }
 0x2bc   :  { %6922 = vmatpush1.bf16.msra.mxu0 %v10929_v34  ;;  %v10989_v52 = vld [vmem:[#allocation11 + $0x900] ss:$16 sps:$4 sm:$0xff]  }
 0x2bd   :  { %6963 = vmatpush1.bf16.msra.mxu1 %v10932_v35  ;;  %6966 = vmatprep.mubr.bf16.mxu1 %v12412_v44 }
 0x2be   :  { %6923 = vmatprep.subr.bf16.mxu0 %v10937_v22  ;;  %6964 = vmatprep.subr.bf16.mxu1 %v10940_v49  ;;  %v10983_v22 = vld [vmem:[#allocation11 + $0x8e0] ss:$16 sps:$4 sm:$0xff]   ;;  %v10991_v49 = vld [vmem:[#allocation11 + $0x904] ss:$16 sps:$4 sm:$0xff]  }
 0x2c0   :  { %6924 = vmatpush1.bf16.msra.mxu0 %v10935_v45  ;;  %v10986_v45 = vld [vmem:[#allocation11 + $0xae0] ss:$16 sps:$4 sm:$0xff]  }
 0x2c1   :  { %6965 = vmatpush1.bf16.msra.mxu1 %v10938_v46  ;;  %6975 = vmatprep.subr.bf16.mxu0 %v10943_v54  ;;  %v10988_v46 = vld [vmem:[#allocation11 + $0xae4] ss:$16 sps:$4 sm:$0xff]   ;;  %v10992_v54 = vld [vmem:[#allocation11 + $0xb00] ss:$16 sps:$4 sm:$0xff]  }
 0x2c2   :  { %7016 = vmatprep.subr.bf16.mxu1 %v10946_v19  ;;  %v10997_v19 = vld [vmem:[#allocation11 + $0x924] ss:$16 sps:$4 sm:$0xff]  }
 0x2c3   :  { %6926 = vmatmul.mubr.bf16.vlgmr.msra.gmra.mrb[16].mxu0 %v12416_v59 }
 0x2c4   :  { %6967 = vmatmul.mubr.bf16.vlgmr.msra.gmra.mrb[36].mxu1 %v12418_v62  ;;  %6976 = vmatpush1.bf16.msra.mxu0 %v10941_v57  ;;  %v11000_v57 = vld [vmem:[#allocation11 + $0xb24] ss:$16 sps:$4 sm:$0xff]  }
 0x2c5   :  { %7017 = vmatpush1.bf16.msra.mxu1 %v10944_v55  ;;  %6977 = vmatprep.subr.bf16.mxu0 %v10949_v56  ;;  %v10995_v55 = vld [vmem:[#allocation11 + $0x920] ss:$16 sps:$4 sm:$0xff]  }
 0x2c6   :  { %7018 = vmatprep.subr.bf16.mxu1 %v10952_v58  ;;  %v10998_v56 = vld [vmem:[#allocation11 + $0xb20] ss:$16 sps:$4 sm:$0xff]   ;;  %v11003_v58 = vld [vmem:[#allocation11 + $0x944] ss:$16 sps:$4 sm:$0xff]  }
 0x2c8   :  { %6978 = vmatpush1.bf16.msra.mxu0 %v10947_v39  ;;  %v11006_v39 = vld [vmem:[#allocation11 + $0xb44] ss:$16 sps:$4 sm:$0xff]  }
 0x2c9   :  { %7019 = vmatpush1.bf16.msra.mxu1 %v10950_v63  ;;  %6979 = vmatprep.subr.bf16.mxu0 %v10955_v0  ;;  %v11001_v63 = vld [vmem:[#allocation11 + $0x940] ss:$16 sps:$4 sm:$0xff]  }
 0x2ca   :  { %7020 = vmatprep.subr.bf16.mxu1 %v10958_v1  ;;  %v11004_v0 = vld [vmem:[#allocation11 + $0xb40] ss:$16 sps:$4 sm:$0xff]   ;;  %v11009_v1 = vld [vmem:[#allocation11 + $0x964] ss:$16 sps:$4 sm:$0xff]  }
 0x2cc   :  { %6980 = vmatpush1.bf16.msra.mxu0 %v10953_v2  ;;  %v11012_v2 = vld [vmem:[#allocation11 + $0xb64] ss:$16 sps:$4 sm:$0xff]  }
 0x2cd   :  { %7021 = vmatpush1.bf16.msra.mxu1 %v10956_v3  ;;  %6981 = vmatprep.subr.bf16.mxu0 %v10961_v4  ;;  %v11007_v3 = vld [vmem:[#allocation11 + $0x960] ss:$16 sps:$4 sm:$0xff]  }
 0x2ce   :  { %7022 = vmatprep.subr.bf16.mxu1 %v10964_v5  ;;  %v11010_v4 = vld [vmem:[#allocation11 + $0xb60] ss:$16 sps:$4 sm:$0xff]   ;;  %v11015_v5 = vld [vmem:[#allocation11 + $0x984] ss:$16 sps:$4 sm:$0xff]  }
 0x2d0   :  { %6982 = vmatpush1.bf16.msra.mxu0 %v10959_v6  ;;  %v11018_v6 = vld [vmem:[#allocation11 + $0xb84] ss:$16 sps:$4 sm:$0xff]  }
 0x2d1   :  { %7023 = vmatpush1.bf16.msra.mxu1 %v10962_v7  ;;  %6983 = vmatprep.subr.bf16.mxu0 %v10967_v29  ;;  %v11013_v7 = vld [vmem:[#allocation11 + $0x980] ss:$16 sps:$4 sm:$0xff]  }
 0x2d2   :  { %7024 = vmatprep.subr.bf16.mxu1 %v10970_v50  ;;  %v11016_v29 = vld [vmem:[#allocation11 + $0xb80] ss:$16 sps:$4 sm:$0xff]   ;;  %v11021_v50 = vld [vmem:[#allocation11 + $0x9a4] ss:$16 sps:$4 sm:$0xff]  }
 0x2d4   :  { %6984 = vmatpush1.bf16.msra.mxu0 %v10965_v10  ;;  %v11024_v10 = vld [vmem:[#allocation11 + $0xba4] ss:$16 sps:$4 sm:$0xff]  }
 0x2d5   :  { %7025 = vmatpush1.bf16.msra.mxu1 %v10968_v11  ;;  %6985 = vmatprep.subr.bf16.mxu0 %v10973_v14  ;;  %v11019_v11 = vld [vmem:[#allocation11 + $0x9a0] ss:$16 sps:$4 sm:$0xff]  }
 0x2d6   :  { %7026 = vmatprep.subr.bf16.mxu1 %v10976_v15  ;;  %v11022_v14 = vld [vmem:[#allocation11 + $0xba0] ss:$16 sps:$4 sm:$0xff]   ;;  %v2524_v15 = vrot.slane %v12422_v12, %v12365_v41 }
 0x2d7   :  { %v12426_v33 = vpop.f32.mrb[20].mxu1 }
 0x2d8   :  { %v3397_v34 = vpop.f32.mrb[21].mxu1  ;;  %6986 = vmatpush1.bf16.msra.mxu0 %v10971_v18  ;;  %v11027_v18 = vld [vmem:[#allocation11 + $0x9c4] ss:$16 sps:$4 sm:$0xff]  }
 0x2d9   :  { %v3398_v35 = vadd.f32 %v3397_v34, %v2516_v31  ;;  %v3399_v16 = vpop.f32.mrb[22].mxu1  ;;  %7027 = vmatpush1.bf16.msra.mxu1 %v10974_v17  ;;  %6987 = vmatprep.subr.bf16.mxu0 %v10979_v20  ;;  %v11030_v17 = vld [vmem:[#allocation11 + $0xbc4] ss:$16 sps:$4 sm:$0xff]  }
 0x2da   :  { %v3400_v38 = vpop.f32.mrb[23].mxu1  ;;  %7028 = vmatprep.subr.bf16.mxu1 %v10982_v30 }
 0x2db   :  { %v12428_v43 = vpack.c.bf16 %v3398_v35, %v3398_v35  ;;  %v11028_v38 = vld [vmem:[#allocation11 + $0xbc0] ss:$16 sps:$4 sm:$0xff]  }
 0x2dc   :  { %6988 = vmatpush1.bf16.msra.mxu0 %v10977_v36 }
 0x2dd   :  { %7029 = vmatpush1.bf16.msra.mxu1 %v10980_v37  ;;  %7007 = vmatprep.mubr.bf16.mxu0 %v12428_v43  ;;  %v11025_v37 = vld [vmem:[#allocation11 + $0x9c0] ss:$16 sps:$4 sm:$0xff]  }
 0x2de   :  { %6989 = vmatprep.subr.bf16.mxu0 %v10985_v40  ;;  %7030 = vmatprep.subr.bf16.mxu1 %v10988_v46  ;;  %v2512_v40 = vrot.slane %v12422_v12, %v12370_v47 }
 0x2e0   :  { %6990 = vmatpush1.bf16.msra.mxu0 %v10983_v22  ;;  %v2520_v22 = vrot.slane %v12422_v12, %v12373_v48 }
 0x2e1   :  { %7031 = vmatpush1.bf16.msra.mxu1 %v10986_v45  ;;  %6991 = vmatprep.subr.bf16.mxu0 %v10991_v49  ;;  %v11033_v49 = vld [vmem:[#allocation11 + $0x9e4] ss:$16 sps:$4 sm:$0xff]  }
 0x2e2   :  { %7032 = vmatprep.subr.bf16.mxu1 %v10994_v53 }
 0x2e4   :  { %6992 = vmatpush1.bf16.msra.mxu0 %v10989_v52  ;;  %v11036_v52 = vld [vmem:[#allocation11 + $0xbe4] ss:$16 sps:$4 sm:$0xff]  }
 0x2e5   :  { %7033 = vmatpush1.bf16.msra.mxu1 %v10992_v54  ;;  %6993 = vmatprep.subr.bf16.mxu0 %v10997_v19  ;;  %v11031_v54 = vld [vmem:[#allocation11 + $0x9e0] ss:$16 sps:$4 sm:$0xff]  }
 0x2e6   :  { %7034 = vmatprep.subr.bf16.mxu1 %v11000_v57  ;;  %v11034_v19 = vld [vmem:[#allocation11 + $0xbe0] ss:$16 sps:$4 sm:$0xff]   ;;  %v3396_v57 = vadd.f32 %v12426_v33, %v2512_v40  ;;  %v11075_v40 = vld [vmem:[#allocation11 + $0xcc4] ss:$16 sps:$4 sm:$0xff]  }
 0x2e7   :  { %v11043_v33 = vld [vmem:[#allocation11 + $0xc20] ss:$16 sps:$4 sm:$0xff]  }
 0x2e8   :  { %6994 = vmatpush1.bf16.msra.mxu0 %v10995_v55 }
 0x2e9   :  { %7035 = vmatpush1.bf16.msra.mxu1 %v10998_v56  ;;  %6995 = vmatprep.subr.bf16.mxu0 %v11003_v58  ;;  %v11039_v56 = vld [vmem:[#allocation11 + $0xc04] ss:$16 sps:$4 sm:$0xff]  }
 0x2ea   :  { %7036 = vmatprep.subr.bf16.mxu1 %v11006_v39  ;;  %v11042_v58 = vld [vmem:[#allocation11 + $0xe04] ss:$16 sps:$4 sm:$0xff]   ;;  %v11037_v39 = vld [vmem:[#allocation11 + $0xc00] ss:$16 sps:$4 sm:$0xff]  }
 0x2ec   :  { %6996 = vmatpush1.bf16.msra.mxu0 %v11001_v63  ;;  %v11040_v63 = vld [vmem:[#allocation11 + $0xe00] ss:$16 sps:$4 sm:$0xff]  }
 0x2ed   :  { %7037 = vmatpush1.bf16.msra.mxu1 %v11004_v0  ;;  %6997 = vmatprep.subr.bf16.mxu0 %v11009_v1  ;;  %v12445_v0 = vpack.c.bf16 %v3396_v57, %v3396_v57 }
 0x2ee   :  { %7038 = vmatprep.subr.bf16.mxu1 %v11012_v2  ;;  %v11045_v2 = vld [vmem:[#allocation11 + $0xc24] ss:$16 sps:$4 sm:$0xff]  }
 0x2f0   :  { %6998 = vmatpush1.bf16.msra.mxu0 %v11007_v3  ;;  %v11048_v3 = vld [vmem:[#allocation11 + $0xe24] ss:$16 sps:$4 sm:$0xff]  }
 0x2f1   :  { %7039 = vmatpush1.bf16.msra.mxu1 %v11010_v4  ;;  %6999 = vmatprep.subr.bf16.mxu0 %v11015_v5  ;;  %v11046_v4 = vld [vmem:[#allocation11 + $0xe20] ss:$16 sps:$4 sm:$0xff]   ;;  %v11051_v5 = vld [vmem:[#allocation11 + $0xc44] ss:$16 sps:$4 sm:$0xff]  }
 0x2f2   :  { %7040 = vmatprep.subr.bf16.mxu1 %v11018_v6  ;;  %v11054_v6 = vld [vmem:[#allocation11 + $0xe44] ss:$16 sps:$4 sm:$0xff]  }
 0x2f4   :  { %7000 = vmatpush1.bf16.msra.mxu0 %v11013_v7  ;;  %v11049_v7 = vld [vmem:[#allocation11 + $0xc40] ss:$16 sps:$4 sm:$0xff]  }
 0x2f5   :  { %7041 = vmatpush1.bf16.msra.mxu1 %v11016_v29  ;;  %7001 = vmatprep.subr.bf16.mxu0 %v11021_v50  ;;  %v11052_v29 = vld [vmem:[#allocation11 + $0xe40] ss:$16 sps:$4 sm:$0xff]   ;;  %v11057_v50 = vld [vmem:[#allocation11 + $0xc64] ss:$16 sps:$4 sm:$0xff]  }
 0x2f6   :  { %7042 = vmatprep.subr.bf16.mxu1 %v11024_v10  ;;  %v12433_v20 = vpop.f32.mrb[4].mxu0  ;;  %v11060_v10 = vld [vmem:[#allocation11 + $0xe64] ss:$16 sps:$4 sm:$0xff]  }
 0x2f7   :  { %v3436_v30 = vpop.f32.mrb[24].mxu1  ;;  %v12435_v31 = vpop.f32.mrb[5].mxu0 }
 0x2f8   :  { %v3438_v34 = vpop.f32.mrb[25].mxu1  ;;  %v2335_v16 = vpop.f32.mrb[6].mxu0  ;;  %7002 = vmatpush1.bf16.msra.mxu0 %v11019_v11  ;;  %v3437_v55 = vadd.f32 %v3436_v30, %v2520_v22  ;;  %v11055_v11 = vld [vmem:[#allocation11 + $0xc60] ss:$16 sps:$4 sm:$0xff]   ;;  %v11078_v22 = vld [vmem:[#allocation11 + $0xec4] ss:$16 sps:$4 sm:$0xff]  }
 0x2f9   :  { %v3439_v35 = vadd.f32 %v3438_v34, %v2524_v15  ;;  %v3440_v36 = vpop.f32.mrb[26].mxu1  ;;  %7043 = vmatpush1.bf16.msra.mxu1 %v11022_v14  ;;  %v2336_v45 = vpop.f32.mrb[7].mxu0  ;;  %7003 = vmatprep.subr.bf16.mxu0 %v11027_v18  ;;  %v11058_v14 = vld [vmem:[#allocation11 + $0xe60] ss:$16 sps:$4 sm:$0xff]   ;;  %v11063_v15 = vld [vmem:[#allocation11 + $0xc84] ss:$16 sps:$4 sm:$0xff]   ;;  %v2532_v16 = vrot.slane %v12422_v12, %v12390_v32 }
 0x2fa   :  { %v3441_v46 = vpop.f32.mrb[27].mxu1  ;;  %7044 = vmatprep.subr.bf16.mxu1 %v11030_v17  ;;  %v12447_v1 = vpack.c.bf16 %v3437_v55, %v3437_v55  ;;  %v11066_v18 = vld [vmem:[#allocation11 + $0xe84] ss:$16 sps:$4 sm:$0xff]   ;;  %v11061_v17 = vld [vmem:[#allocation11 + $0xc80] ss:$16 sps:$4 sm:$0xff]   ;;  %v2540_v36 = vrot.slane %v12422_v12, %v2507_v13 }
 0x2fb   :  { %v12441_v53 = vpack.c.bf16 %v3439_v35, %v3439_v35  ;;  %v11064_v30 = vld [vmem:[#allocation11 + $0xe80] ss:$16 sps:$4 sm:$0xff]   ;;  %v11069_v34 = vld [vmem:[#allocation11 + $0xca4] ss:$16 sps:$4 sm:$0xff]  }
 0x2fc   :  { %7004 = vmatpush1.bf16.msra.mxu0 %v11025_v37  ;;  %v11072_v35 = vld [vmem:[#allocation11 + $0xea4] ss:$16 sps:$4 sm:$0xff]   ;;  %v11067_v37 = vld [vmem:[#allocation11 + $0xca0] ss:$16 sps:$4 sm:$0xff]  }
 0x2fd   :  { %7045 = vmatpush1.bf16.msra.mxu1 %v11028_v38  ;;  %7048 = vmatprep.mubr.bf16.mxu1 %v12441_v53  ;;  %v11070_v38 = vld [vmem:[#allocation11 + $0xea0] ss:$16 sps:$4 sm:$0xff]  }
 0x2fe   :  { %7005 = vmatprep.subr.bf16.mxu0 %v11033_v49  ;;  %7046 = vmatprep.subr.bf16.mxu1 %v11036_v52 }
 0x300   :  { %7006 = vmatpush1.bf16.msra.mxu0 %v11031_v54 }
 0x301   :  { %7047 = vmatpush1.bf16.msra.mxu1 %v11034_v19  ;;  %7057 = vmatprep.subr.bf16.mxu0 %v11039_v56  ;;  %v11073_v56 = vld [vmem:[#allocation11 + $0xcc0] ss:$16 sps:$4 sm:$0xff]  }
 0x302   :  { %7098 = vmatprep.subr.bf16.mxu1 %v11042_v58 }
 0x303   :  { %7008 = vmatmul.mubr.bf16.vlgmr.msra.gmra.mrb[20].mxu0 %v12445_v0 }
 0x304   :  { %7049 = vmatmul.mubr.bf16.vlgmr.msra.gmra.mrb[40].mxu1 %v12447_v1  ;;  %7058 = vmatpush1.bf16.msra.mxu0 %v11037_v39  ;;  %v11076_v39 = vld [vmem:[#allocation11 + $0xec0] ss:$16 sps:$4 sm:$0xff]  }
 0x305   :  { %7099 = vmatpush1.bf16.msra.mxu1 %v11040_v63  ;;  %7059 = vmatprep.subr.bf16.mxu0 %v11045_v2 }
 0x306   :  { %7100 = vmatprep.subr.bf16.mxu1 %v11048_v3  ;;  %v11081_v3 = vld [vmem:[#allocation11 + $0xce4] ss:$16 sps:$4 sm:$0xff]  }
 0x308   :  { %7060 = vmatpush1.bf16.msra.mxu0 %v11043_v33  ;;  %v11084_v33 = vld [vmem:[#allocation11 + $0xee4] ss:$16 sps:$4 sm:$0xff]  }
 0x309   :  { %7101 = vmatpush1.bf16.msra.mxu1 %v11046_v4  ;;  %7061 = vmatprep.subr.bf16.mxu0 %v11051_v5  ;;  %v11079_v4 = vld [vmem:[#allocation11 + $0xce0] ss:$16 sps:$4 sm:$0xff]  }
 0x30a   :  { %7102 = vmatprep.subr.bf16.mxu1 %v11054_v6  ;;  %v11082_v5 = vld [vmem:[#allocation11 + $0xee0] ss:$16 sps:$4 sm:$0xff]   ;;  %v11087_v6 = vld [vmem:[#allocation11 + $0xd04] ss:$16 sps:$4 sm:$0xff]  }
 0x30c   :  { %7062 = vmatpush1.bf16.msra.mxu0 %v11049_v7  ;;  %v11090_v7 = vld [vmem:[#allocation11 + $0xf04] ss:$16 sps:$4 sm:$0xff]  }
 0x30d   :  { %7103 = vmatpush1.bf16.msra.mxu1 %v11052_v29  ;;  %7063 = vmatprep.subr.bf16.mxu0 %v11057_v50  ;;  %v11085_v29 = vld [vmem:[#allocation11 + $0xd00] ss:$16 sps:$4 sm:$0xff]  }
 0x30e   :  { %7104 = vmatprep.subr.bf16.mxu1 %v11060_v10  ;;  %v11088_v50 = vld [vmem:[#allocation11 + $0xf00] ss:$16 sps:$4 sm:$0xff]   ;;  %v11093_v10 = vld [vmem:[#allocation11 + $0xd24] ss:$16 sps:$4 sm:$0xff]  }
 0x310   :  { %7064 = vmatpush1.bf16.msra.mxu0 %v11055_v11  ;;  %v11096_v11 = vld [vmem:[#allocation11 + $0xf24] ss:$16 sps:$4 sm:$0xff]  }
 0x311   :  { %7105 = vmatpush1.bf16.msra.mxu1 %v11058_v14  ;;  %7065 = vmatprep.subr.bf16.mxu0 %v11063_v15  ;;  %v11091_v14 = vld [vmem:[#allocation11 + $0xd20] ss:$16 sps:$4 sm:$0xff]  }
 0x312   :  { %7106 = vmatprep.subr.bf16.mxu1 %v11066_v18  ;;  %v11094_v15 = vld [vmem:[#allocation11 + $0xf20] ss:$16 sps:$4 sm:$0xff]   ;;  %v11099_v18 = vld [vmem:[#allocation11 + $0xd44] ss:$16 sps:$4 sm:$0xff]  }
 0x314   :  { %7066 = vmatpush1.bf16.msra.mxu0 %v11061_v17  ;;  %v11102_v17 = vld [vmem:[#allocation11 + $0xf44] ss:$16 sps:$4 sm:$0xff]  }
 0x315   :  { %7107 = vmatpush1.bf16.msra.mxu1 %v11064_v30  ;;  %7067 = vmatprep.subr.bf16.mxu0 %v11069_v34  ;;  %v11097_v30 = vld [vmem:[#allocation11 + $0xd40] ss:$16 sps:$4 sm:$0xff]  }
 0x316   :  { %7108 = vmatprep.subr.bf16.mxu1 %v11072_v35  ;;  %v12456_v45 = vpop.f32.mrb[8].mxu0  ;;  %v11100_v34 = vld [vmem:[#allocation11 + $0xf40] ss:$16 sps:$4 sm:$0xff]   ;;  %v11105_v35 = vld [vmem:[#allocation11 + $0xd64] ss:$16 sps:$4 sm:$0xff]  }
 0x317   :  { %v12458_v46 = vpop.f32.mrb[28].mxu1  ;;  %v3479_v49 = vpop.f32.mrb[9].mxu0 }
 0x318   :  { %v3520_v52 = vpop.f32.mrb[29].mxu1  ;;  %v3480_v54 = vadd.f32 %v3479_v49, %v2532_v16  ;;  %v3481_v57 = vpop.f32.mrb[10].mxu0  ;;  %7068 = vmatpush1.bf16.msra.mxu0 %v11067_v37  ;;  %v11108_v16 = vld [vmem:[#allocation11 + $0xf64] ss:$16 sps:$4 sm:$0xff]   ;;  %v11106_v37 = vld [vmem:[#allocation11 + $0xf60] ss:$16 sps:$4 sm:$0xff]  }
 0x319   :  { %v3521_v19 = vadd.f32 %v3520_v52, %v2540_v36  ;;  %v3522_v55 = vpop.f32.mrb[30].mxu1  ;;  %7109 = vmatpush1.bf16.msra.mxu1 %v11070_v38  ;;  %v3482_v13 = vpop.f32.mrb[11].mxu0  ;;  %7069 = vmatprep.subr.bf16.mxu0 %v11075_v40  ;;  %v11103_v36 = vld [vmem:[#allocation11 + $0xd60] ss:$16 sps:$4 sm:$0xff]   ;;  %v11111_v38 = vld [vmem:[#allocation11 + $0xd84] ss:$16 sps:$4 sm:$0xff]  }
 0x31a   :  { %v3523_v58 = vpop.f32.mrb[31].mxu1  ;;  %7110 = vmatprep.subr.bf16.mxu1 %v11078_v22  ;;  %v12460_v63 = vpack.c.bf16 %v3480_v54, %v3480_v54  ;;  %v11114_v40 = vld [vmem:[#allocation11 + $0xf84] ss:$16 sps:$4 sm:$0xff]   ;;  %v11109_v22 = vld [vmem:[#allocation11 + $0xd80] ss:$16 sps:$4 sm:$0xff]  }
 0x31b   :  { %v12462_v2 = vpack.c.bf16 %v3521_v19, %v3521_v19  ;;  %v11112_v49 = vld [vmem:[#allocation11 + $0xf80] ss:$16 sps:$4 sm:$0xff]   ;;  %v11117_v52 = vld [vmem:[#allocation11 + $0xda4] ss:$16 sps:$4 sm:$0xff]   ;;  %v2528_v58 = vrot.slane %v12422_v12, %v12404_v27 }
 0x31c   :  { %7070 = vmatpush1.bf16.msra.mxu0 %v11073_v56  ;;  %7089 = vmatprep.mubr.bf16.mxu0 %v12460_v63  ;;  %v11120_v54 = vld [vmem:[#allocation11 + $0xfa4] ss:$16 sps:$4 sm:$0xff]   ;;  %v11115_v19 = vld [vmem:[#allocation11 + $0xda0] ss:$16 sps:$4 sm:$0xff]  }
 0x31d   :  { %7111 = vmatpush1.bf16.msra.mxu1 %v11076_v39  ;;  %7130 = vmatprep.mubr.bf16.mxu1 %v12462_v2  ;;  %v11118_v57 = vld [vmem:[#allocation11 + $0xfa0] ss:$16 sps:$4 sm:$0xff]   ;;  %v11123_v55 = vld [vmem:[#allocation11 + $0xdc4] ss:$16 sps:$4 sm:$0xff]  }
 0x31e   :  { %7071 = vmatprep.subr.bf16.mxu0 %v11081_v3  ;;  %7112 = vmatprep.subr.bf16.mxu1 %v11084_v33  ;;  %v11126_v56 = vld [vmem:[#allocation11 + $0xfc4] ss:$16 sps:$4 sm:$0xff]   ;;  %v11121_v13 = vld [vmem:[#allocation11 + $0xdc0] ss:$16 sps:$4 sm:$0xff]   ;;  %v2536_v33 = vrot.slane %v12422_v12, %v2503_v28  ;;  %v11141_v12 = vld [vmem:[#allocation11 + $0x2c] ss:$16 sps:$4 sm:$0xff]  }
 0x31f   :  { %v11124_v39 = vld [vmem:[#allocation11 + $0xfc0] ss:$16 sps:$4 sm:$0xff]   ;;  %v11129_v3 = vld [vmem:[#allocation11 + $0xde4] ss:$16 sps:$4 sm:$0xff]  }
 0x320   :  { %7072 = vmatpush1.bf16.msra.mxu0 %v11079_v4  ;;  %v11132_v4 = vld [vmem:[#allocation11 + $0xfe4] ss:$16 sps:$4 sm:$0xff]  }
 0x321   :  { %7113 = vmatpush1.bf16.msra.mxu1 %v11082_v5  ;;  %7073 = vmatprep.subr.bf16.mxu0 %v11087_v6  ;;  %v11127_v5 = vld [vmem:[#allocation11 + $0xde0] ss:$16 sps:$4 sm:$0xff]   ;;  %v3478_v6 = vadd.f32 %v12456_v45, %v2528_v58  ;;  %v11144_v45 = vld [vmem:[#allocation11 + $0x22c] ss:$16 sps:$4 sm:$0xff]  }
 0x322   :  { %7114 = vmatprep.subr.bf16.mxu1 %v11090_v7  ;;  %v11130_v7 = vld [vmem:[#allocation11 + $0xfe0] ss:$16 sps:$4 sm:$0xff]  }
 0x324   :  { %7074 = vmatpush1.bf16.msra.mxu0 %v11085_v29  ;;  %v11135_v29 = vld [vmem:[#allocation11 + $0xc] ss:$16 sps:$4 sm:$0xff]  }
 0x325   :  { %7115 = vmatpush1.bf16.msra.mxu1 %v11088_v50  ;;  %7075 = vmatprep.subr.bf16.mxu0 %v11093_v10  ;;  %v3519_v50 = vadd.f32 %v12458_v46, %v2536_v33  ;;  %v11138_v10 = vld [vmem:[#allocation11 + $0x20c] ss:$16 sps:$4 sm:$0xff]   ;;  %v11139_v46 = vld [vmem:[#allocation11 + $0x28] ss:$16 sps:$4 sm:$0xff]  }
 0x326   :  { %7116 = vmatprep.subr.bf16.mxu1 %v11096_v11  ;;  %v11133_v11 = vld [vmem:[#allocation11 + $0x8] ss:$16 sps:$4 sm:$0xff]  }
 0x327   :  { %v12475_v28 = vpack.c.bf16 %v3519_v50, %v3519_v50  ;;  %v11177_v50 = vld [vmem:[#allocation11 + $0xec] ss:$16 sps:$4 sm:$0xff]  }
 0x328   :  { %7076 = vmatpush1.bf16.msra.mxu0 %v11091_v14  ;;  %v12473_v14 = vpack.c.bf16 %v3478_v6, %v3478_v6 }
 0x329   :  { %7117 = vmatpush1.bf16.msra.mxu1 %v11094_v15  ;;  %7077 = vmatprep.subr.bf16.mxu0 %v11099_v18  ;;  %v11142_v15 = vld [vmem:[#allocation11 + $0x228] ss:$16 sps:$4 sm:$0xff]   ;;  %v11147_v18 = vld [vmem:[#allocation11 + $0x4c] ss:$16 sps:$4 sm:$0xff]  }
 0x32a   :  { %7118 = vmatprep.subr.bf16.mxu1 %v11102_v17  ;;  %v11150_v17 = vld [vmem:[#allocation11 + $0x24c] ss:$16 sps:$4 sm:$0xff]  }
 0x32c   :  { %7078 = vmatpush1.bf16.msra.mxu0 %v11097_v30  ;;  %v11145_v30 = vld [vmem:[#allocation11 + $0x48] ss:$16 sps:$4 sm:$0xff]  }
 0x32d   :  { %7119 = vmatpush1.bf16.msra.mxu1 %v11100_v34  ;;  %7079 = vmatprep.subr.bf16.mxu0 %v11105_v35  ;;  %v11148_v34 = vld [vmem:[#allocation11 + $0x248] ss:$16 sps:$4 sm:$0xff]   ;;  %v11153_v35 = vld [vmem:[#allocation11 + $0x6c] ss:$16 sps:$4 sm:$0xff]  }
 0x32e   :  { %7120 = vmatprep.subr.bf16.mxu1 %v11108_v16  ;;  %v11156_v16 = vld [vmem:[#allocation11 + $0x26c] ss:$16 sps:$4 sm:$0xff]  }
 0x330   :  { %7080 = vmatpush1.bf16.msra.mxu0 %v11103_v36  ;;  %v11151_v36 = vld [vmem:[#allocation11 + $0x68] ss:$16 sps:$4 sm:$0xff]  }
 0x331   :  { %7121 = vmatpush1.bf16.msra.mxu1 %v11106_v37  ;;  %7081 = vmatprep.subr.bf16.mxu0 %v11111_v38  ;;  %v11159_v37 = vld [vmem:[#allocation11 + $0x8c] ss:$16 sps:$4 sm:$0xff]  }
 0x332   :  { %7122 = vmatprep.subr.bf16.mxu1 %v11114_v40  ;;  %v11162_v38 = vld [vmem:[#allocation11 + $0x28c] ss:$16 sps:$4 sm:$0xff]   ;;  %v11160_v40 = vld [vmem:[#allocation11 + $0x288] ss:$16 sps:$4 sm:$0xff]  }
 0x334   :  { %7082 = vmatpush1.bf16.msra.mxu0 %v11109_v22  ;;  %v11165_v22 = vld [vmem:[#allocation11 + $0xac] ss:$16 sps:$4 sm:$0xff]  }
 0x335   :  { %7123 = vmatpush1.bf16.msra.mxu1 %v11112_v49  ;;  %7083 = vmatprep.subr.bf16.mxu0 %v11117_v52  ;;  %v11168_v49 = vld [vmem:[#allocation11 + $0x2ac] ss:$16 sps:$4 sm:$0xff]   ;;  %v11163_v52 = vld [vmem:[#allocation11 + $0xa8] ss:$16 sps:$4 sm:$0xff]  }
 0x336   :  { %7124 = vmatprep.subr.bf16.mxu1 %v11120_v54  ;;  %v11166_v54 = vld [vmem:[#allocation11 + $0x2a8] ss:$16 sps:$4 sm:$0xff]  }
 0x338   :  { %7084 = vmatpush1.bf16.msra.mxu0 %v11115_v19  ;;  %v11171_v19 = vld [vmem:[#allocation11 + $0xcc] ss:$16 sps:$4 sm:$0xff]  }
 0x339   :  { %7125 = vmatpush1.bf16.msra.mxu1 %v11118_v57  ;;  %7085 = vmatprep.subr.bf16.mxu0 %v11123_v55 }
 0x33a   :  { %7126 = vmatprep.subr.bf16.mxu1 %v11126_v56  ;;  %v11174_v56 = vld [vmem:[#allocation11 + $0x2cc] ss:$16 sps:$4 sm:$0xff]  }
 0x33c   :  { %7086 = vmatpush1.bf16.msra.mxu0 %v11121_v13 }
 0x33d   :  { %7127 = vmatpush1.bf16.msra.mxu1 %v11124_v39  ;;  %7087 = vmatprep.subr.bf16.mxu0 %v11129_v3 }
 0x33e   :  { %7128 = vmatprep.subr.bf16.mxu1 %v11132_v4 }
 0x340   :  { %7088 = vmatpush1.bf16.msra.mxu0 %v11127_v5  ;;  %v11169_v5 = vld [vmem:[#allocation11 + $0xc8] ss:$16 sps:$4 sm:$0xff]  }
 0x341   :  { %7129 = vmatpush1.bf16.msra.mxu1 %v11130_v7  ;;  %7139 = vmatprep.subr.bf16.mxu0 %v11135_v29  ;;  %v11172_v29 = vld [vmem:[#allocation11 + $0x2c8] ss:$16 sps:$4 sm:$0xff]  }
 0x342   :  { %7180 = vmatprep.subr.bf16.mxu1 %v11138_v10  ;;  %v11180_v10 = vld [vmem:[#allocation11 + $0x2ec] ss:$16 sps:$4 sm:$0xff]  }
 0x343   :  { %7090 = vmatmul.mubr.bf16.vlgmr.msra.gmra.mrb[24].mxu0 %v12473_v14 }
 0x344   :  { %7131 = vmatmul.mubr.bf16.vlgmr.msra.gmra.mrb[44].mxu1 %v12475_v28  ;;  %7140 = vmatpush1.bf16.msra.mxu0 %v11133_v11  ;;  %v11175_v11 = vld [vmem:[#allocation11 + $0xe8] ss:$16 sps:$4 sm:$0xff]  }
 0x345   :  { %7171 = vmatprep.mubr.bf16.mxu0 %v12361_v8  ;;  %7181 = vmatpush1.bf16.msra.mxu1 %v11136_v42  ;;  %v11154_v8 = vld [vmem:[#allocation11 + $0x268] ss:$16 sps:$4 sm:$0xff]  }
 0x346   :  { %7212 = vmatprep.mubr.bf16.mxu1 %v12379_v60  ;;  %7141 = vmatprep.subr.bf16.mxu0 %v11141_v12  ;;  %v11157_v60 = vld [vmem:[#allocation11 + $0x88] ss:$16 sps:$4 sm:$0xff]   ;;  %v11183_v12 = vld [vmem:[#allocation11 + $0x10c] ss:$16 sps:$4 sm:$0xff]  }
 0x347   :  { %7182 = vmatprep.subr.bf16.mxu1 %v11144_v45  ;;  %v11178_v42 = vld [vmem:[#allocation11 + $0x2e8] ss:$16 sps:$4 sm:$0xff]   ;;  %v11186_v45 = vld [vmem:[#allocation11 + $0x30c] ss:$16 sps:$4 sm:$0xff]  }
 0x348   :  { %7142 = vmatpush1.bf16.msra.mxu0 %v11139_v46  ;;  %v11181_v46 = vld [vmem:[#allocation11 + $0x108] ss:$16 sps:$4 sm:$0xff]  }
 0x349   :  { %7183 = vmatpush1.bf16.msra.mxu1 %v11142_v15  ;;  %7143 = vmatprep.subr.bf16.mxu0 %v11147_v18  ;;  %v11184_v15 = vld [vmem:[#allocation11 + $0x308] ss:$16 sps:$4 sm:$0xff]   ;;  %v11189_v18 = vld [vmem:[#allocation11 + $0x12c] ss:$16 sps:$4 sm:$0xff]  }
 0x34a   :  { %7184 = vmatprep.subr.bf16.mxu1 %v11150_v17  ;;  %v11192_v17 = vld [vmem:[#allocation11 + $0x32c] ss:$16 sps:$4 sm:$0xff]  }
 0x34c   :  { %7144 = vmatpush1.bf16.msra.mxu0 %v11145_v30  ;;  %v11187_v30 = vld [vmem:[#allocation11 + $0x128] ss:$16 sps:$4 sm:$0xff]  }
 0x34d   :  { %7185 = vmatpush1.bf16.msra.mxu1 %v11148_v34  ;;  %7145 = vmatprep.subr.bf16.mxu0 %v11153_v35  ;;  %v11190_v34 = vld [vmem:[#allocation11 + $0x328] ss:$16 sps:$4 sm:$0xff]   ;;  %v11195_v35 = vld [vmem:[#allocation11 + $0x14c] ss:$16 sps:$4 sm:$0xff]  }
 0x34e   :  { %7186 = vmatprep.subr.bf16.mxu1 %v11156_v16  ;;  %v11198_v16 = vld [vmem:[#allocation11 + $0x34c] ss:$16 sps:$4 sm:$0xff]  }
 0x350   :  { %7146 = vmatpush1.bf16.msra.mxu0 %v11151_v36  ;;  %v11193_v36 = vld [vmem:[#allocation11 + $0x148] ss:$16 sps:$4 sm:$0xff]  }
 0x351   :  { %7187 = vmatpush1.bf16.msra.mxu1 %v11154_v8  ;;  %7147 = vmatprep.subr.bf16.mxu0 %v11159_v37  ;;  %v11196_v8 = vld [vmem:[#allocation11 + $0x348] ss:$16 sps:$4 sm:$0xff]   ;;  %v11201_v37 = vld [vmem:[#allocation11 + $0x16c] ss:$16 sps:$4 sm:$0xff]  }
 0x352   :  { %7188 = vmatprep.subr.bf16.mxu1 %v11162_v38  ;;  %v11204_v38 = vld [vmem:[#allocation11 + $0x36c] ss:$16 sps:$4 sm:$0xff]  }
 0x354   :  { %7148 = vmatpush1.bf16.msra.mxu0 %v11157_v60  ;;  %v11199_v60 = vld [vmem:[#allocation11 + $0x168] ss:$16 sps:$4 sm:$0xff]  }
 0x355   :  { %7189 = vmatpush1.bf16.msra.mxu1 %v11160_v40  ;;  %7149 = vmatprep.subr.bf16.mxu0 %v11165_v22  ;;  %v11202_v40 = vld [vmem:[#allocation11 + $0x368] ss:$16 sps:$4 sm:$0xff]   ;;  %v11207_v22 = vld [vmem:[#allocation11 + $0x18c] ss:$16 sps:$4 sm:$0xff]  }
 0x356   :  { %v6845_v57 = vpop.f32.mrb[12].mxu0  ;;  %7190 = vmatprep.subr.bf16.mxu1 %v11168_v49  ;;  %v11210_v49 = vld [vmem:[#allocation11 + $0x38c] ss:$16 sps:$4 sm:$0xff]  }
 0x357   :  { %v6886_v55 = vpop.f32.mrb[32].mxu1  ;;  %v6847_v58 = vpop.f32.mrb[13].mxu0 }
 0x358   :  { %v12481_v13 = vadd.f32 %v6886_v55, %v6845_v57  ;;  %v6888_v39 = vpop.f32.mrb[33].mxu1  ;;  %v6849_v33 = vpop.f32.mrb[14].mxu0  ;;  %7150 = vmatpush1.bf16.msra.mxu0 %v11163_v52  ;;  %v11205_v52 = vld [vmem:[#allocation11 + $0x188] ss:$16 sps:$4 sm:$0xff]   ;;  %v11216_v57 = vld [vmem:[#allocation11 + $0x3ac] ss:$16 sps:$4 sm:$0xff]  }
 0x359   :  { %v12483_v3 = vadd.f32 %v6888_v39, %v6847_v58  ;;  %v6890_v4 = vpop.f32.mrb[34].mxu1  ;;  %7191 = vmatpush1.bf16.msra.mxu1 %v11166_v54  ;;  %v6850_v6 = vpop.f32.mrb[15].mxu0  ;;  %7151 = vmatprep.subr.bf16.mxu0 %v11171_v19  ;;  %v11208_v54 = vld [vmem:[#allocation11 + $0x388] ss:$16 sps:$4 sm:$0xff]   ;;  %v11213_v19 = vld [vmem:[#allocation11 + $0x1ac] ss:$16 sps:$4 sm:$0xff]  }
 0x35a   :  { %v6891_v7 = vpop.f32.mrb[35].mxu1  ;;  %7192 = vmatprep.subr.bf16.mxu1 %v11174_v56  ;;  %v11211_v55 = vld [vmem:[#allocation11 + $0x1a8] ss:$16 sps:$4 sm:$0xff]   ;;  %v11219_v58 = vld [vmem:[#allocation11 + $0x1cc] ss:$16 sps:$4 sm:$0xff]  }
 0x35b   :  { %v11214_v56 = vld [vmem:[#allocation11 + $0x3a8] ss:$16 sps:$4 sm:$0xff]   ;;  %v11222_v39 = vld [vmem:[#allocation11 + $0x3cc] ss:$16 sps:$4 sm:$0xff]  }
 0x35c   :  { %7152 = vmatpush1.bf16.msra.mxu0 %v11169_v5  ;;  %v11217_v33 = vld [vmem:[#allocation11 + $0x1c8] ss:$16 sps:$4 sm:$0xff]   ;;  %v11225_v5 = vld [vmem:[#allocation11 + $0x1ec] ss:$16 sps:$4 sm:$0xff]  }
 0x35d   :  { %7193 = vmatpush1.bf16.msra.mxu1 %v11172_v29  ;;  %7153 = vmatprep.subr.bf16.mxu0 %v11177_v50  ;;  %v11220_v4 = vld [vmem:[#allocation11 + $0x3c8] ss:$16 sps:$4 sm:$0xff]   ;;  %v11228_v6 = vld [vmem:[#allocation11 + $0x3ec] ss:$16 sps:$4 sm:$0xff]  }
 0x35e   :  { %7194 = vmatprep.subr.bf16.mxu1 %v11180_v10  ;;  %v11223_v7 = vld [vmem:[#allocation11 + $0x1e8] ss:$16 sps:$4 sm:$0xff]   ;;  %v11231_v50 = vld [vmem:[#allocation11 + $0x40c] ss:$16 sps:$4 sm:$0xff]  }
 0x35f   :  { %v11226_v29 = vld [vmem:[#allocation11 + $0x3e8] ss:$16 sps:$4 sm:$0xff]   ;;  %v11234_v10 = vld [vmem:[#allocation11 + $0x60c] ss:$16 sps:$4 sm:$0xff]  }
 0x360   :  { %7154 = vmatpush1.bf16.msra.mxu0 %v11175_v11  ;;  %v11229_v11 = vld [vmem:[#allocation11 + $0x408] ss:$16 sps:$4 sm:$0xff]  }
 0x361   :  { %7195 = vmatpush1.bf16.msra.mxu1 %v11178_v42  ;;  %7155 = vmatprep.subr.bf16.mxu0 %v11183_v12  ;;  %v11232_v42 = vld [vmem:[#allocation11 + $0x608] ss:$16 sps:$4 sm:$0xff]   ;;  %v11237_v12 = vld [vmem:[#allocation11 + $0x42c] ss:$16 sps:$4 sm:$0xff]  }
 0x362   :  { %7196 = vmatprep.subr.bf16.mxu1 %v11186_v45  ;;  %v11240_v45 = vld [vmem:[#allocation11 + $0x62c] ss:$16 sps:$4 sm:$0xff]  }
 0x364   :  { %7156 = vmatpush1.bf16.msra.mxu0 %v11181_v46  ;;  %v11235_v46 = vld [vmem:[#allocation11 + $0x428] ss:$16 sps:$4 sm:$0xff]  }
 0x365   :  { %7197 = vmatpush1.bf16.msra.mxu1 %v11184_v15  ;;  %7157 = vmatprep.subr.bf16.mxu0 %v11189_v18  ;;  %v11238_v15 = vld [vmem:[#allocation11 + $0x628] ss:$16 sps:$4 sm:$0xff]   ;;  %v11243_v18 = vld [vmem:[#allocation11 + $0x44c] ss:$16 sps:$4 sm:$0xff]  }
 0x366   :  { %7198 = vmatprep.subr.bf16.mxu1 %v11192_v17  ;;  %v11246_v17 = vld [vmem:[#allocation11 + $0x64c] ss:$16 sps:$4 sm:$0xff]  }
 0x368   :  { %7158 = vmatpush1.bf16.msra.mxu0 %v11187_v30  ;;  %v11241_v30 = vld [vmem:[#allocation11 + $0x448] ss:$16 sps:$4 sm:$0xff]  }
 0x369   :  { %7199 = vmatpush1.bf16.msra.mxu1 %v11190_v34  ;;  %7159 = vmatprep.subr.bf16.mxu0 %v11195_v35  ;;  %v11249_v34 = vld [vmem:[#allocation11 + $0x46c] ss:$16 sps:$4 sm:$0xff]   ;;  %v11247_v35 = vld [vmem:[#allocation11 + $0x468] ss:$16 sps:$4 sm:$0xff]  }
 0x36a   :  { %7200 = vmatprep.subr.bf16.mxu1 %v11198_v16  ;;  %v11255_v16 = vld [vmem:[#allocation11 + $0x48c] ss:$16 sps:$4 sm:$0xff]  }
 0x36c   :  { %7160 = vmatpush1.bf16.msra.mxu0 %v11193_v36  ;;  %v11258_v36 = vld [vmem:[#allocation11 + $0x68c] ss:$16 sps:$4 sm:$0xff]  }
 0x36d   :  { %7201 = vmatpush1.bf16.msra.mxu1 %v11196_v8  ;;  %7161 = vmatprep.subr.bf16.mxu0 %v11201_v37  ;;  %v11256_v8 = vld [vmem:[#allocation11 + $0x688] ss:$16 sps:$4 sm:$0xff]   ;;  %v11261_v37 = vld [vmem:[#allocation11 + $0x4ac] ss:$16 sps:$4 sm:$0xff]  }
 0x36e   :  { %7202 = vmatprep.subr.bf16.mxu1 %v11204_v38  ;;  %v11264_v38 = vld [vmem:[#allocation11 + $0x6ac] ss:$16 sps:$4 sm:$0xff]  }
 0x370   :  { %7162 = vmatpush1.bf16.msra.mxu0 %v11199_v60  ;;  %v11259_v60 = vld [vmem:[#allocation11 + $0x4a8] ss:$16 sps:$4 sm:$0xff]  }
 0x371   :  { %7203 = vmatpush1.bf16.msra.mxu1 %v11202_v40  ;;  %7163 = vmatprep.subr.bf16.mxu0 %v11207_v22  ;;  %v11262_v40 = vld [vmem:[#allocation11 + $0x6a8] ss:$16 sps:$4 sm:$0xff]   ;;  %v11267_v22 = vld [vmem:[#allocation11 + $0x4cc] ss:$16 sps:$4 sm:$0xff]  }
 0x372   :  { %7204 = vmatprep.subr.bf16.mxu1 %v11210_v49 }
 0x374   :  { %7164 = vmatpush1.bf16.msra.mxu0 %v11205_v52 }
 0x375   :  { %7205 = vmatpush1.bf16.msra.mxu1 %v11208_v54  ;;  %7165 = vmatprep.subr.bf16.mxu0 %v11213_v19  ;;  %v11270_v54 = vld [vmem:[#allocation11 + $0x6cc] ss:$16 sps:$4 sm:$0xff]  }
 0x376   :  { %7206 = vmatprep.subr.bf16.mxu1 %v11216_v57 }
 0x378   :  { %7166 = vmatpush1.bf16.msra.mxu0 %v11211_v55 }
 0x379   :  { %7207 = vmatpush1.bf16.msra.mxu1 %v11214_v56  ;;  %7167 = vmatprep.subr.bf16.mxu0 %v11219_v58 }
 0x37a   :  { %7208 = vmatprep.subr.bf16.mxu1 %v11222_v39 }
 0x37c   :  { %7168 = vmatpush1.bf16.msra.mxu0 %v11217_v33  ;;  %v11265_v33 = vld [vmem:[#allocation11 + $0x4c8] ss:$16 sps:$4 sm:$0xff]  }
 0x37d   :  { %7209 = vmatpush1.bf16.msra.mxu1 %v11220_v4  ;;  %7169 = vmatprep.subr.bf16.mxu0 %v11225_v5 }
 0x37e   :  { %7210 = vmatprep.subr.bf16.mxu1 %v11228_v6 }
 0x380   :  { %7170 = vmatpush1.bf16.msra.mxu0 %v11223_v7  ;;  %v11268_v7 = vld [vmem:[#allocation11 + $0x6c8] ss:$16 sps:$4 sm:$0xff]  }
 0x381   :  { %7211 = vmatpush1.bf16.msra.mxu1 %v11226_v29  ;;  %7221 = vmatprep.subr.bf16.mxu0 %v11231_v50  ;;  %v11273_v29 = vld [vmem:[#allocation11 + $0x4ec] ss:$16 sps:$4 sm:$0xff]  }
 0x382   :  { %7262 = vmatprep.subr.bf16.mxu1 %v11234_v10  ;;  %v11271_v10 = vld [vmem:[#allocation11 + $0x4e8] ss:$16 sps:$4 sm:$0xff]  }
 0x383   :  { %7172 = vmatmul.mubr.bf16.vlgmr.msra.gmra.mrb[28].mxu0 %v12383_v26  ;;  %v11244_v26 = vld [vmem:[#allocation11 + $0x648] ss:$16 sps:$4 sm:$0xff]  }
 0x384   :  { %7213 = vmatmul.mubr.bf16.vlgmr.msra.gmra.mrb[48].mxu1 %v12385_v9  ;;  %7222 = vmatpush1.bf16.msra.mxu0 %v11229_v11  ;;  %v11252_v9 = vld [vmem:[#allocation11 + $0x66c] ss:$16 sps:$4 sm:$0xff]  }
 0x385   :  { %7253 = vmatprep.mubr.bf16.mxu0 %v12396_v51  ;;  %7263 = vmatpush1.bf16.msra.mxu1 %v11232_v42  ;;  %v11250_v51 = vld [vmem:[#allocation11 + $0x668] ss:$16 sps:$4 sm:$0xff]   ;;  %v11279_v11 = vld [vmem:[#allocation11 + $0x50c] ss:$16 sps:$4 sm:$0xff]  }
 0x386   :  { %7294 = vmatprep.mubr.bf16.mxu1 %v12412_v44  ;;  %7223 = vmatprep.subr.bf16.mxu0 %v11237_v12  ;;  %v11253_v44 = vld [vmem:[#allocation11 + $0x488] ss:$16 sps:$4 sm:$0xff]   ;;  %v11282_v42 = vld [vmem:[#allocation11 + $0x70c] ss:$16 sps:$4 sm:$0xff]  }
 0x387   :  { %7264 = vmatprep.subr.bf16.mxu1 %v11240_v45  ;;  %v11277_v12 = vld [vmem:[#allocation11 + $0x508] ss:$16 sps:$4 sm:$0xff]  }
 0x388   :  { %7224 = vmatpush1.bf16.msra.mxu0 %v11235_v46  ;;  %v11280_v45 = vld [vmem:[#allocation11 + $0x708] ss:$16 sps:$4 sm:$0xff]   ;;  %v11285_v46 = vld [vmem:[#allocation11 + $0x52c] ss:$16 sps:$4 sm:$0xff]  }
 0x389   :  { %7265 = vmatpush1.bf16.msra.mxu1 %v11238_v15  ;;  %7225 = vmatprep.subr.bf16.mxu0 %v11243_v18  ;;  %v11288_v15 = vld [vmem:[#allocation11 + $0x72c] ss:$16 sps:$4 sm:$0xff]   ;;  %v11283_v18 = vld [vmem:[#allocation11 + $0x528] ss:$16 sps:$4 sm:$0xff]  }
 0x38a   :  { %7266 = vmatprep.subr.bf16.mxu1 %v11246_v17  ;;  %v11286_v17 = vld [vmem:[#allocation11 + $0x728] ss:$16 sps:$4 sm:$0xff]  }
 0x38c   :  { %7226 = vmatpush1.bf16.msra.mxu0 %v11241_v30  ;;  %v11291_v30 = vld [vmem:[#allocation11 + $0x54c] ss:$16 sps:$4 sm:$0xff]  }
 0x38d   :  { %7267 = vmatpush1.bf16.msra.mxu1 %v11244_v26  ;;  %7227 = vmatprep.subr.bf16.mxu0 %v11249_v34  ;;  %v11294_v26 = vld [vmem:[#allocation11 + $0x74c] ss:$16 sps:$4 sm:$0xff]   ;;  %v11289_v34 = vld [vmem:[#allocation11 + $0x548] ss:$16 sps:$4 sm:$0xff]  }
 0x38e   :  { %7268 = vmatprep.subr.bf16.mxu1 %v11252_v9  ;;  %v11292_v9 = vld [vmem:[#allocation11 + $0x748] ss:$16 sps:$4 sm:$0xff]  }
 0x390   :  { %7228 = vmatpush1.bf16.msra.mxu0 %v11247_v35  ;;  %v11297_v35 = vld [vmem:[#allocation11 + $0x56c] ss:$16 sps:$4 sm:$0xff]  }
 0x391   :  { %7269 = vmatpush1.bf16.msra.mxu1 %v11250_v51  ;;  %7229 = vmatprep.subr.bf16.mxu0 %v11255_v16  ;;  %v11300_v51 = vld [vmem:[#allocation11 + $0x76c] ss:$16 sps:$4 sm:$0xff]   ;;  %v11295_v16 = vld [vmem:[#allocation11 + $0x568] ss:$16 sps:$4 sm:$0xff]  }
 0x392   :  { %7270 = vmatprep.subr.bf16.mxu1 %v11258_v36  ;;  %v11298_v36 = vld [vmem:[#allocation11 + $0x768] ss:$16 sps:$4 sm:$0xff]  }
 0x394   :  { %7230 = vmatpush1.bf16.msra.mxu0 %v11253_v44  ;;  %v11303_v44 = vld [vmem:[#allocation11 + $0x58c] ss:$16 sps:$4 sm:$0xff]  }
 0x395   :  { %7271 = vmatpush1.bf16.msra.mxu1 %v11256_v8  ;;  %7231 = vmatprep.subr.bf16.mxu0 %v11261_v37  ;;  %v11306_v8 = vld [vmem:[#allocation11 + $0x78c] ss:$16 sps:$4 sm:$0xff]   ;;  %v11301_v37 = vld [vmem:[#allocation11 + $0x588] ss:$16 sps:$4 sm:$0xff]  }
 0x396   :  { %v6927_v49 = vpop.f32.mrb[16].mxu0  ;;  %7272 = vmatprep.subr.bf16.mxu1 %v11264_v38  ;;  %v11304_v38 = vld [vmem:[#allocation11 + $0x788] ss:$16 sps:$4 sm:$0xff]  }
 0x397   :  { %v6968_v52 = vpop.f32.mrb[36].mxu1  ;;  %v6928_v19 = vadd.f32 %v6927_v49, %v12481_v13  ;;  %v6929_v57 = vpop.f32.mrb[17].mxu0  ;;  %v11276_v13 = vld [vmem:[#allocation11 + $0x6ec] ss:$16 sps:$4 sm:$0xff]   ;;  %v11310_v49 = vld [vmem:[#allocation11 + $0x7a8] ss:$16 sps:$4 sm:$0xff]  }
 0x398   :  { %v6970_v55 = vpop.f32.mrb[37].mxu1  ;;  %v6930_v56 = vadd.f32 %v6929_v57, %v12483_v3  ;;  %v6931_v58 = vpop.f32.mrb[18].mxu0  ;;  %7232 = vmatpush1.bf16.msra.mxu0 %v11259_v60  ;;  %v11274_v3 = vld [vmem:[#allocation11 + $0x6e8] ss:$16 sps:$4 sm:$0xff]   ;;  %v11309_v60 = vld [vmem:[#allocation11 + $0x5ac] ss:$16 sps:$4 sm:$0xff]  }
 0x399   :  { %v6972_v39 = vpop.f32.mrb[38].mxu1  ;;  %v12491_v4 = vadd.f32 %v6968_v52, %v6928_v19  ;;  %7273 = vmatpush1.bf16.msra.mxu1 %v11262_v40  ;;  %v6932_v5 = vpop.f32.mrb[19].mxu0  ;;  %7233 = vmatprep.subr.bf16.mxu0 %v11267_v22  ;;  %v11312_v40 = vld [vmem:[#allocation11 + $0x7ac] ss:$16 sps:$4 sm:$0xff]   ;;  %v11307_v22 = vld [vmem:[#allocation11 + $0x5a8] ss:$16 sps:$4 sm:$0xff]  }
 0x39a   :  { %v6973_v6 = vpop.f32.mrb[39].mxu1  ;;  %v12493_v50 = vadd.f32 %v6970_v55, %v6930_v56  ;;  %7274 = vmatprep.subr.bf16.mxu1 %v11270_v54  ;;  %v11315_v52 = vld [vmem:[#allocation11 + $0x5cc] ss:$16 sps:$4 sm:$0xff]   ;;  %v11313_v19 = vld [vmem:[#allocation11 + $0x5c8] ss:$16 sps:$4 sm:$0xff]  }
 0x39b   :  { %v11318_v54 = vld [vmem:[#allocation11 + $0x7cc] ss:$16 sps:$4 sm:$0xff]   ;;  %v11316_v57 = vld [vmem:[#allocation11 + $0x7c8] ss:$16 sps:$4 sm:$0xff]  }
 0x39c   :  { %7234 = vmatpush1.bf16.msra.mxu0 %v11265_v33  ;;  %v11321_v55 = vld [vmem:[#allocation11 + $0x5ec] ss:$16 sps:$4 sm:$0xff]   ;;  %v11319_v58 = vld [vmem:[#allocation11 + $0x5e8] ss:$16 sps:$4 sm:$0xff]  }
 0x39d   :  { %7275 = vmatpush1.bf16.msra.mxu1 %v11268_v7  ;;  %7235 = vmatprep.subr.bf16.mxu0 %v11273_v29  ;;  %v11324_v56 = vld [vmem:[#allocation11 + $0x7ec] ss:$16 sps:$4 sm:$0xff]   ;;  %v11322_v39 = vld [vmem:[#allocation11 + $0x7e8] ss:$16 sps:$4 sm:$0xff]  }
 0x39e   :  { %7276 = vmatprep.subr.bf16.mxu1 %v11276_v13  ;;  %v11327_v33 = vld [vmem:[#allocation11 + $0x80c] ss:$16 sps:$4 sm:$0xff]   ;;  %v11325_v6 = vld [vmem:[#allocation11 + $0x808] ss:$16 sps:$4 sm:$0xff]  }
 0x39f   :  { %v11330_v5 = vld [vmem:[#allocation11 + $0xa0c] ss:$16 sps:$4 sm:$0xff]   ;;  %v11328_v7 = vld [vmem:[#allocation11 + $0xa08] ss:$16 sps:$4 sm:$0xff]  }
 0x3a0   :  { %7236 = vmatpush1.bf16.msra.mxu0 %v11271_v10  ;;  %v11333_v29 = vld [vmem:[#allocation11 + $0x82c] ss:$16 sps:$4 sm:$0xff]   ;;  %v11331_v10 = vld [vmem:[#allocation11 + $0x828] ss:$16 sps:$4 sm:$0xff]  }
 0x3a1   :  { %7277 = vmatpush1.bf16.msra.mxu1 %v11274_v3  ;;  %7237 = vmatprep.subr.bf16.mxu0 %v11279_v11  ;;  %v11336_v13 = vld [vmem:[#allocation11 + $0xa2c] ss:$16 sps:$4 sm:$0xff]   ;;  %v11334_v3 = vld [vmem:[#allocation11 + $0xa28] ss:$16 sps:$4 sm:$0xff]  }
 0x3a2   :  { %7278 = vmatprep.subr.bf16.mxu1 %v11282_v42  ;;  %v11339_v11 = vld [vmem:[#allocation11 + $0x84c] ss:$16 sps:$4 sm:$0xff]  }
 0x3a3   :  { %v11342_v42 = vld [vmem:[#allocation11 + $0xa4c] ss:$16 sps:$4 sm:$0xff]  }
 0x3a4   :  { %7238 = vmatpush1.bf16.msra.mxu0 %v11277_v12  ;;  %v11337_v12 = vld [vmem:[#allocation11 + $0x848] ss:$16 sps:$4 sm:$0xff]  }
 0x3a5   :  { %7279 = vmatpush1.bf16.msra.mxu1 %v11280_v45  ;;  %7239 = vmatprep.subr.bf16.mxu0 %v11285_v46  ;;  %v11345_v45 = vld [vmem:[#allocation11 + $0x86c] ss:$16 sps:$4 sm:$0xff]   ;;  %v11343_v46 = vld [vmem:[#allocation11 + $0x868] ss:$16 sps:$4 sm:$0xff]  }
 0x3a6   :  { %7280 = vmatprep.subr.bf16.mxu1 %v11288_v15  ;;  %v11351_v15 = vld [vmem:[#allocation11 + $0x88c] ss:$16 sps:$4 sm:$0xff]  }
 0x3a8   :  { %7240 = vmatpush1.bf16.msra.mxu0 %v11283_v18  ;;  %v11354_v18 = vld [vmem:[#allocation11 + $0xa8c] ss:$16 sps:$4 sm:$0xff]  }
 0x3a9   :  { %7281 = vmatpush1.bf16.msra.mxu1 %v11286_v17  ;;  %7241 = vmatprep.subr.bf16.mxu0 %v11291_v30  ;;  %v11352_v17 = vld [vmem:[#allocation11 + $0xa88] ss:$16 sps:$4 sm:$0xff]   ;;  %v11357_v30 = vld [vmem:[#allocation11 + $0x8ac] ss:$16 sps:$4 sm:$0xff]  }
 0x3aa   :  { %7282 = vmatprep.subr.bf16.mxu1 %v11294_v26  ;;  %v11360_v26 = vld [vmem:[#allocation11 + $0xaac] ss:$16 sps:$4 sm:$0xff]  }
 0x3ac   :  { %7242 = vmatpush1.bf16.msra.mxu0 %v11289_v34  ;;  %v11355_v34 = vld [vmem:[#allocation11 + $0x8a8] ss:$16 sps:$4 sm:$0xff]  }
 0x3ad   :  { %7283 = vmatpush1.bf16.msra.mxu1 %v11292_v9  ;;  %7243 = vmatprep.subr.bf16.mxu0 %v11297_v35  ;;  %v11358_v9 = vld [vmem:[#allocation11 + $0xaa8] ss:$16 sps:$4 sm:$0xff]   ;;  %v11363_v35 = vld [vmem:[#allocation11 + $0x8cc] ss:$16 sps:$4 sm:$0xff]  }
 0x3ae   :  { %7284 = vmatprep.subr.bf16.mxu1 %v11300_v51 }
 0x3b0   :  { %7244 = vmatpush1.bf16.msra.mxu0 %v11295_v16 }
 0x3b1   :  { %7285 = vmatpush1.bf16.msra.mxu1 %v11298_v36  ;;  %7245 = vmatprep.subr.bf16.mxu0 %v11303_v44  ;;  %v11366_v36 = vld [vmem:[#allocation11 + $0xacc] ss:$16 sps:$4 sm:$0xff]  }
 0x3b2   :  { %7286 = vmatprep.subr.bf16.mxu1 %v11306_v8 }
 0x3b4   :  { %7246 = vmatpush1.bf16.msra.mxu0 %v11301_v37 }
 0x3b5   :  { %7287 = vmatpush1.bf16.msra.mxu1 %v11304_v38  ;;  %7247 = vmatprep.subr.bf16.mxu0 %v11309_v60 }
 0x3b6   :  { %7288 = vmatprep.subr.bf16.mxu1 %v11312_v40 }
 0x3b8   :  { %7248 = vmatpush1.bf16.msra.mxu0 %v11307_v22  ;;  %v11361_v22 = vld [vmem:[#allocation11 + $0x8c8] ss:$16 sps:$4 sm:$0xff]  }
 0x3b9   :  { %7289 = vmatpush1.bf16.msra.mxu1 %v11310_v49  ;;  %7249 = vmatprep.subr.bf16.mxu0 %v11315_v52 }
 0x3ba   :  { %7290 = vmatprep.subr.bf16.mxu1 %v11318_v54 }
 0x3bc   :  { %7250 = vmatpush1.bf16.msra.mxu0 %v11313_v19  ;;  %v11364_v19 = vld [vmem:[#allocation11 + $0xac8] ss:$16 sps:$4 sm:$0xff]  }
 0x3bd   :  { %7291 = vmatpush1.bf16.msra.mxu1 %v11316_v57  ;;  %7251 = vmatprep.subr.bf16.mxu0 %v11321_v55  ;;  %v11369_v57 = vld [vmem:[#allocation11 + $0x8ec] ss:$16 sps:$4 sm:$0xff]  }
 0x3be   :  { %7292 = vmatprep.subr.bf16.mxu1 %v11324_v56  ;;  %v11367_v56 = vld [vmem:[#allocation11 + $0x8e8] ss:$16 sps:$4 sm:$0xff]  }
 0x3c0   :  { %7252 = vmatpush1.bf16.msra.mxu0 %v11319_v58  ;;  %v11375_v58 = vld [vmem:[#allocation11 + $0x90c] ss:$16 sps:$4 sm:$0xff]  }
 0x3c1   :  { %7293 = vmatpush1.bf16.msra.mxu1 %v11322_v39  ;;  %7303 = vmatprep.subr.bf16.mxu0 %v11327_v33  ;;  %v11378_v39 = vld [vmem:[#allocation11 + $0xb0c] ss:$16 sps:$4 sm:$0xff]   ;;  %v11373_v33 = vld [vmem:[#allocation11 + $0x908] ss:$16 sps:$4 sm:$0xff]  }
 0x3c2   :  { %7344 = vmatprep.subr.bf16.mxu1 %v11330_v5  ;;  %v11376_v5 = vld [vmem:[#allocation11 + $0xb08] ss:$16 sps:$4 sm:$0xff]  }
 0x3c3   :  { %7254 = vmatmul.mubr.bf16.vlgmr.msra.gmra.mrb[32].mxu0 %v12416_v59  ;;  %v11340_v59 = vld [vmem:[#allocation11 + $0xa48] ss:$16 sps:$4 sm:$0xff]  }
 0x3c4   :  { %7295 = vmatmul.mubr.bf16.vlgmr.msra.gmra.mrb[52].mxu1 %v12418_v62  ;;  %7304 = vmatpush1.bf16.msra.mxu0 %v11325_v6  ;;  %v11348_v62 = vld [vmem:[#allocation11 + $0xa6c] ss:$16 sps:$4 sm:$0xff]  }
 0x3c5   :  { %7335 = vmatprep.mubr.bf16.mxu0 %v12428_v43  ;;  %7345 = vmatpush1.bf16.msra.mxu1 %v11328_v7  ;;  %v11346_v43 = vld [vmem:[#allocation11 + $0xa68] ss:$16 sps:$4 sm:$0xff]   ;;  %v11381_v6 = vld [vmem:[#allocation11 + $0x92c] ss:$16 sps:$4 sm:$0xff]  }
 0x3c6   :  { %7376 = vmatprep.mubr.bf16.mxu1 %v12441_v53  ;;  %7305 = vmatprep.subr.bf16.mxu0 %v11333_v29  ;;  %v11349_v53 = vld [vmem:[#allocation11 + $0x888] ss:$16 sps:$4 sm:$0xff]   ;;  %v11384_v7 = vld [vmem:[#allocation11 + $0xb2c] ss:$16 sps:$4 sm:$0xff]  }
 0x3c7   :  { %7346 = vmatprep.subr.bf16.mxu1 %v11336_v13  ;;  %v11379_v29 = vld [vmem:[#allocation11 + $0x928] ss:$16 sps:$4 sm:$0xff]  }
 0x3c8   :  { %7306 = vmatpush1.bf16.msra.mxu0 %v11331_v10  ;;  %v11382_v13 = vld [vmem:[#allocation11 + $0xb28] ss:$16 sps:$4 sm:$0xff]   ;;  %v11387_v10 = vld [vmem:[#allocation11 + $0x94c] ss:$16 sps:$4 sm:$0xff]  }
 0x3c9   :  { %7347 = vmatpush1.bf16.msra.mxu1 %v11334_v3  ;;  %7307 = vmatprep.subr.bf16.mxu0 %v11339_v11  ;;  %v11390_v3 = vld [vmem:[#allocation11 + $0xb4c] ss:$16 sps:$4 sm:$0xff]   ;;  %v11385_v11 = vld [vmem:[#allocation11 + $0x948] ss:$16 sps:$4 sm:$0xff]  }
 0x3ca   :  { %7348 = vmatprep.subr.bf16.mxu1 %v11342_v42  ;;  %v11388_v42 = vld [vmem:[#allocation11 + $0xb48] ss:$16 sps:$4 sm:$0xff]  }
 0x3cc   :  { %7308 = vmatpush1.bf16.msra.mxu0 %v11337_v12  ;;  %v11393_v12 = vld [vmem:[#allocation11 + $0x96c] ss:$16 sps:$4 sm:$0xff]  }
 0x3cd   :  { %7349 = vmatpush1.bf16.msra.mxu1 %v11340_v59  ;;  %7309 = vmatprep.subr.bf16.mxu0 %v11345_v45  ;;  %v11396_v59 = vld [vmem:[#allocation11 + $0xb6c] ss:$16 sps:$4 sm:$0xff]   ;;  %v11391_v45 = vld [vmem:[#allocation11 + $0x968] ss:$16 sps:$4 sm:$0xff]  }
 0x3ce   :  { %7350 = vmatprep.subr.bf16.mxu1 %v11348_v62  ;;  %v11394_v62 = vld [vmem:[#allocation11 + $0xb68] ss:$16 sps:$4 sm:$0xff]  }
 0x3d0   :  { %7310 = vmatpush1.bf16.msra.mxu0 %v11343_v46  ;;  %v11399_v46 = vld [vmem:[#allocation11 + $0x98c] ss:$16 sps:$4 sm:$0xff]  }
 0x3d1   :  { %7351 = vmatpush1.bf16.msra.mxu1 %v11346_v43  ;;  %7311 = vmatprep.subr.bf16.mxu0 %v11351_v15  ;;  %v11402_v43 = vld [vmem:[#allocation11 + $0xb8c] ss:$16 sps:$4 sm:$0xff]   ;;  %v11397_v15 = vld [vmem:[#allocation11 + $0x988] ss:$16 sps:$4 sm:$0xff]  }
 0x3d2   :  { %7352 = vmatprep.subr.bf16.mxu1 %v11354_v18  ;;  %v11400_v18 = vld [vmem:[#allocation11 + $0xb88] ss:$16 sps:$4 sm:$0xff]  }
 0x3d4   :  { %7312 = vmatpush1.bf16.msra.mxu0 %v11349_v53  ;;  %v11405_v53 = vld [vmem:[#allocation11 + $0x9ac] ss:$16 sps:$4 sm:$0xff]  }
 0x3d5   :  { %7353 = vmatpush1.bf16.msra.mxu1 %v11352_v17  ;;  %7313 = vmatprep.subr.bf16.mxu0 %v11357_v30  ;;  %v11408_v17 = vld [vmem:[#allocation11 + $0xbac] ss:$16 sps:$4 sm:$0xff]   ;;  %v11403_v30 = vld [vmem:[#allocation11 + $0x9a8] ss:$16 sps:$4 sm:$0xff]  }
 0x3d6   :  { %v7009_v51 = vpop.f32.mrb[20].mxu0  ;;  %7354 = vmatprep.subr.bf16.mxu1 %v11360_v26  ;;  %v11406_v26 = vld [vmem:[#allocation11 + $0xba8] ss:$16 sps:$4 sm:$0xff]  }
 0x3d7   :  { %v7050_v16 = vpop.f32.mrb[40].mxu1  ;;  %v7010_v44 = vadd.f32 %v7009_v51, %v12491_v4  ;;  %v7011_v8 = vpop.f32.mrb[21].mxu0  ;;  %v11372_v4 = vld [vmem:[#allocation11 + $0xaec] ss:$16 sps:$4 sm:$0xff]   ;;  %v11412_v51 = vld [vmem:[#allocation11 + $0xbc8] ss:$16 sps:$4 sm:$0xff]  }
 0x3d8   :  { %v7052_v37 = vpop.f32.mrb[41].mxu1  ;;  %v7012_v38 = vadd.f32 %v7011_v8, %v12493_v50  ;;  %v7013_v60 = vpop.f32.mrb[22].mxu0  ;;  %7314 = vmatpush1.bf16.msra.mxu0 %v11355_v34  ;;  %v11370_v50 = vld [vmem:[#allocation11 + $0xae8] ss:$16 sps:$4 sm:$0xff]   ;;  %v11411_v34 = vld [vmem:[#allocation11 + $0x9cc] ss:$16 sps:$4 sm:$0xff]  }
 0x3d9   :  { %v7054_v40 = vpop.f32.mrb[42].mxu1  ;;  %v12501_v49 = vadd.f32 %v7050_v16, %v7010_v44  ;;  %7355 = vmatpush1.bf16.msra.mxu1 %v11358_v9  ;;  %v7014_v52 = vpop.f32.mrb[23].mxu0  ;;  %7315 = vmatprep.subr.bf16.mxu0 %v11363_v35  ;;  %v11414_v9 = vld [vmem:[#allocation11 + $0xbcc] ss:$16 sps:$4 sm:$0xff]   ;;  %v11409_v35 = vld [vmem:[#allocation11 + $0x9c8] ss:$16 sps:$4 sm:$0xff]  }
 0x3da   :  { %v7055_v54 = vpop.f32.mrb[43].mxu1  ;;  %v12503_v55 = vadd.f32 %v7052_v37, %v7012_v38  ;;  %7356 = vmatprep.subr.bf16.mxu1 %v11366_v36  ;;  %v11417_v16 = vld [vmem:[#allocation11 + $0x9ec] ss:$16 sps:$4 sm:$0xff]   ;;  %v11415_v44 = vld [vmem:[#allocation11 + $0x9e8] ss:$16 sps:$4 sm:$0xff]  }
 0x3db   :  { %v11420_v36 = vld [vmem:[#allocation11 + $0xbec] ss:$16 sps:$4 sm:$0xff]   ;;  %v11418_v8 = vld [vmem:[#allocation11 + $0xbe8] ss:$16 sps:$4 sm:$0xff]  }
 0x3dc   :  { %7316 = vmatpush1.bf16.msra.mxu0 %v11361_v22  ;;  %v11423_v37 = vld [vmem:[#allocation11 + $0xc0c] ss:$16 sps:$4 sm:$0xff]   ;;  %v11421_v60 = vld [vmem:[#allocation11 + $0xc08] ss:$16 sps:$4 sm:$0xff]  }
 0x3dd   :  { %7357 = vmatpush1.bf16.msra.mxu1 %v11364_v19  ;;  %7317 = vmatprep.subr.bf16.mxu0 %v11369_v57  ;;  %v11426_v38 = vld [vmem:[#allocation11 + $0xe0c] ss:$16 sps:$4 sm:$0xff]   ;;  %v11424_v40 = vld [vmem:[#allocation11 + $0xe08] ss:$16 sps:$4 sm:$0xff]  }
 0x3de   :  { %7358 = vmatprep.subr.bf16.mxu1 %v11372_v4  ;;  %v11429_v22 = vld [vmem:[#allocation11 + $0xc2c] ss:$16 sps:$4 sm:$0xff]   ;;  %v11427_v54 = vld [vmem:[#allocation11 + $0xc28] ss:$16 sps:$4 sm:$0xff]  }
 0x3df   :  { %v11432_v52 = vld [vmem:[#allocation11 + $0xe2c] ss:$16 sps:$4 sm:$0xff]   ;;  %v11430_v19 = vld [vmem:[#allocation11 + $0xe28] ss:$16 sps:$4 sm:$0xff]  }
 0x3e0   :  { %7318 = vmatpush1.bf16.msra.mxu0 %v11367_v56  ;;  %v11435_v57 = vld [vmem:[#allocation11 + $0xc4c] ss:$16 sps:$4 sm:$0xff]   ;;  %v11433_v56 = vld [vmem:[#allocation11 + $0xc48] ss:$16 sps:$4 sm:$0xff]  }
 0x3e1   :  { %7359 = vmatpush1.bf16.msra.mxu1 %v11370_v50  ;;  %7319 = vmatprep.subr.bf16.mxu0 %v11375_v58  ;;  %v11438_v4 = vld [vmem:[#allocation11 + $0xe4c] ss:$16 sps:$4 sm:$0xff]   ;;  %v11439_v58 = vld [vmem:[#allocation11 + $0xc68] ss:$16 sps:$4 sm:$0xff]  }
 0x3e2   :  { %7360 = vmatprep.subr.bf16.mxu1 %v11378_v39  ;;  %v11441_v50 = vld [vmem:[#allocation11 + $0xc6c] ss:$16 sps:$4 sm:$0xff]  }
 0x3e3   :  { %v11447_v39 = vld [vmem:[#allocation11 + $0xc8c] ss:$16 sps:$4 sm:$0xff]  }
 0x3e4   :  { %7320 = vmatpush1.bf16.msra.mxu0 %v11373_v33  ;;  %v11450_v33 = vld [vmem:[#allocation11 + $0xe8c] ss:$16 sps:$4 sm:$0xff]  }
 0x3e5   :  { %7361 = vmatpush1.bf16.msra.mxu1 %v11376_v5  ;;  %7321 = vmatprep.subr.bf16.mxu0 %v11381_v6  ;;  %v11448_v5 = vld [vmem:[#allocation11 + $0xe88] ss:$16 sps:$4 sm:$0xff]   ;;  %v11453_v6 = vld [vmem:[#allocation11 + $0xcac] ss:$16 sps:$4 sm:$0xff]  }
 0x3e6   :  { %7362 = vmatprep.subr.bf16.mxu1 %v11384_v7  ;;  %v11456_v7 = vld [vmem:[#allocation11 + $0xeac] ss:$16 sps:$4 sm:$0xff]  }
 0x3e8   :  { %7322 = vmatpush1.bf16.msra.mxu0 %v11379_v29  ;;  %v11451_v29 = vld [vmem:[#allocation11 + $0xca8] ss:$16 sps:$4 sm:$0xff]  }
 0x3e9   :  { %7363 = vmatpush1.bf16.msra.mxu1 %v11382_v13  ;;  %7323 = vmatprep.subr.bf16.mxu0 %v11387_v10  ;;  %v11454_v13 = vld [vmem:[#allocation11 + $0xea8] ss:$16 sps:$4 sm:$0xff]   ;;  %v11459_v10 = vld [vmem:[#allocation11 + $0xccc] ss:$16 sps:$4 sm:$0xff]  }
 0x3ea   :  { %7364 = vmatprep.subr.bf16.mxu1 %v11390_v3 }
 0x3ec   :  { %7324 = vmatpush1.bf16.msra.mxu0 %v11385_v11  ;;  %v11462_v11 = vld [vmem:[#allocation11 + $0xecc] ss:$16 sps:$4 sm:$0xff]  }
 0x3ed   :  { %7365 = vmatpush1.bf16.msra.mxu1 %v11388_v42  ;;  %7325 = vmatprep.subr.bf16.mxu0 %v11393_v12 }
 0x3ee   :  { %7366 = vmatprep.subr.bf16.mxu1 %v11396_v59 }
 0x3f0   :  { %7326 = vmatpush1.bf16.msra.mxu0 %v11391_v45 }
 0x3f1   :  { %7367 = vmatpush1.bf16.msra.mxu1 %v11394_v62  ;;  %7327 = vmatprep.subr.bf16.mxu0 %v11399_v46 }
 0x3f2   :  { %7368 = vmatprep.subr.bf16.mxu1 %v11402_v43  ;;  %v11457_v43 = vld [vmem:[#allocation11 + $0xcc8] ss:$16 sps:$4 sm:$0xff]  }
 0x3f4   :  { %7328 = vmatpush1.bf16.msra.mxu0 %v11397_v15 }
 0x3f5   :  { %7369 = vmatpush1.bf16.msra.mxu1 %v11400_v18  ;;  %7329 = vmatprep.subr.bf16.mxu0 %v11405_v53 }
 0x3f6   :  { %7370 = vmatprep.subr.bf16.mxu1 %v11408_v17  ;;  %v11460_v17 = vld [vmem:[#allocation11 + $0xec8] ss:$16 sps:$4 sm:$0xff]  }
 0x3f8   :  { %7330 = vmatpush1.bf16.msra.mxu0 %v11403_v30  ;;  %v11465_v30 = vld [vmem:[#allocation11 + $0xcec] ss:$16 sps:$4 sm:$0xff]  }
 0x3f9   :  { %7371 = vmatpush1.bf16.msra.mxu1 %v11406_v26  ;;  %7331 = vmatprep.subr.bf16.mxu0 %v11411_v34 }
 0x3fa   :  { %7372 = vmatprep.subr.bf16.mxu1 %v11414_v9  ;;  %v11463_v9 = vld [vmem:[#allocation11 + $0xce8] ss:$16 sps:$4 sm:$0xff]  }
 0x3fc   :  { %7332 = vmatpush1.bf16.msra.mxu0 %v11409_v35  ;;  %v11471_v35 = vld [vmem:[#allocation11 + $0xd0c] ss:$16 sps:$4 sm:$0xff]  }
 0x3fd   :  { %7373 = vmatpush1.bf16.msra.mxu1 %v11412_v51  ;;  %7333 = vmatprep.subr.bf16.mxu0 %v11417_v16  ;;  %v11474_v51 = vld [vmem:[#allocation11 + $0xf0c] ss:$16 sps:$4 sm:$0xff]   ;;  %v11469_v16 = vld [vmem:[#allocation11 + $0xd08] ss:$16 sps:$4 sm:$0xff]  }
 0x3fe   :  { %7374 = vmatprep.subr.bf16.mxu1 %v11420_v36  ;;  %v11472_v36 = vld [vmem:[#allocation11 + $0xf08] ss:$16 sps:$4 sm:$0xff]  }
 0x400   :  { %7334 = vmatpush1.bf16.msra.mxu0 %v11415_v44  ;;  %v11477_v44 = vld [vmem:[#allocation11 + $0xd2c] ss:$16 sps:$4 sm:$0xff]  }
 0x401   :  { %7375 = vmatpush1.bf16.msra.mxu1 %v11418_v8  ;;  %7385 = vmatprep.subr.bf16.mxu0 %v11423_v37  ;;  %v11480_v8 = vld [vmem:[#allocation11 + $0xf2c] ss:$16 sps:$4 sm:$0xff]   ;;  %v11475_v37 = vld [vmem:[#allocation11 + $0xd28] ss:$16 sps:$4 sm:$0xff]  }
 0x402   :  { %7426 = vmatprep.subr.bf16.mxu1 %v11426_v38  ;;  %v11478_v38 = vld [vmem:[#allocation11 + $0xf28] ss:$16 sps:$4 sm:$0xff]  }
 0x403   :  { %7336 = vmatmul.mubr.bf16.vlgmr.msra.gmra.mrb[36].mxu0 %v12445_v0  ;;  %v11436_v0 = vld [vmem:[#allocation11 + $0xe48] ss:$16 sps:$4 sm:$0xff]  }
 0x404   :  { %7377 = vmatmul.mubr.bf16.vlgmr.msra.gmra.mrb[56].mxu1 %v12447_v1  ;;  %7386 = vmatpush1.bf16.msra.mxu0 %v11421_v60  ;;  %v11444_v1 = vld [vmem:[#allocation11 + $0xe6c] ss:$16 sps:$4 sm:$0xff]  }
 0x405   :  { %7417 = vmatprep.mubr.bf16.mxu0 %v12460_v63  ;;  %7427 = vmatpush1.bf16.msra.mxu1 %v11424_v40  ;;  %v11442_v63 = vld [vmem:[#allocation11 + $0xe68] ss:$16 sps:$4 sm:$0xff]   ;;  %v11483_v60 = vld [vmem:[#allocation11 + $0xd4c] ss:$16 sps:$4 sm:$0xff]  }
 0x406   :  { %7458 = vmatprep.mubr.bf16.mxu1 %v12462_v2  ;;  %7387 = vmatprep.subr.bf16.mxu0 %v11429_v22  ;;  %v11445_v2 = vld [vmem:[#allocation11 + $0xc88] ss:$16 sps:$4 sm:$0xff]   ;;  %v11486_v40 = vld [vmem:[#allocation11 + $0xf4c] ss:$16 sps:$4 sm:$0xff]  }
 0x407   :  { %7428 = vmatprep.subr.bf16.mxu1 %v11432_v52  ;;  %v11481_v22 = vld [vmem:[#allocation11 + $0xd48] ss:$16 sps:$4 sm:$0xff]  }
 0x408   :  { %7388 = vmatpush1.bf16.msra.mxu0 %v11427_v54  ;;  %v11484_v52 = vld [vmem:[#allocation11 + $0xf48] ss:$16 sps:$4 sm:$0xff]   ;;  %v11489_v54 = vld [vmem:[#allocation11 + $0xd6c] ss:$16 sps:$4 sm:$0xff]  }
 0x409   :  { %7429 = vmatpush1.bf16.msra.mxu1 %v11430_v19  ;;  %7389 = vmatprep.subr.bf16.mxu0 %v11435_v57  ;;  %v11492_v19 = vld [vmem:[#allocation11 + $0xf6c] ss:$16 sps:$4 sm:$0xff]  }
 0x40a   :  { %7430 = vmatprep.subr.bf16.mxu1 %v11438_v4  ;;  %v12515_v57 = vld [vmem:[#allocation5] sm:$0x3f] }
 0x40b   :  { %v11487_v4 = vld [vmem:[#allocation11 + $0xd68] ss:$16 sps:$4 sm:$0xff]  }
 0x40c   :  { %7390 = vmatpush1.bf16.msra.mxu0 %v11433_v56  ;;  %v11490_v56 = vld [vmem:[#allocation11 + $0xf68] ss:$16 sps:$4 sm:$0xff]  }
 0x40d   :  { %7431 = vmatpush1.bf16.msra.mxu1 %v11436_v0  ;;  %7391 = vmatprep.subr.bf16.mxu0 %v11441_v50  ;;  %v11495_v0 = vld [vmem:[#allocation11 + $0xd8c] ss:$16 sps:$4 sm:$0xff]   ;;  %v452_v50 = vrot.slane %v12515_v57, %v12355_v61 }
 0x40e   :  { %7432 = vmatprep.subr.bf16.mxu1 %v11444_v1  ;;  %v11498_v1 = vld [vmem:[#allocation11 + $0xf8c] ss:$16 sps:$4 sm:$0xff]  }
 0x410   :  { %7392 = vmatpush1.bf16.msra.mxu0 %v11439_v58  ;;  %v460_v58 = vrot.slane %v12515_v57, %v12365_v41 }
 0x411   :  { %7433 = vmatpush1.bf16.msra.mxu1 %v11442_v63  ;;  %7393 = vmatprep.subr.bf16.mxu0 %v11447_v39  ;;  %v11493_v63 = vld [vmem:[#allocation11 + $0xd88] ss:$16 sps:$4 sm:$0xff]  }
 0x412   :  { %7434 = vmatprep.subr.bf16.mxu1 %v11450_v33  ;;  %v11496_v39 = vld [vmem:[#allocation11 + $0xf88] ss:$16 sps:$4 sm:$0xff]   ;;  %v11501_v33 = vld [vmem:[#allocation11 + $0xdac] ss:$16 sps:$4 sm:$0xff]  }
 0x414   :  { %7394 = vmatpush1.bf16.msra.mxu0 %v11445_v2  ;;  %v10268_v2 = vadd.f32 %v12346_v24, %v452_v50  ;;  %v11513_v24 = vld [vmem:[#allocation11 + $0xdec] ss:$16 sps:$4 sm:$0xff]  }
 0x415   :  { %7435 = vmatpush1.bf16.msra.mxu1 %v11448_v5  ;;  %7395 = vmatprep.subr.bf16.mxu0 %v11453_v6  ;;  %v11504_v5 = vld [vmem:[#allocation11 + $0xfac] ss:$16 sps:$4 sm:$0xff]   ;;  %v10270_v6 = vadd.f32 %v12348_v25, %v460_v58  ;;  %v11511_v25 = vld [vmem:[#allocation11 + $0xde8] ss:$16 sps:$4 sm:$0xff]  }
 0x416   :  { %v7091_v3 = vpop.f32.mrb[24].mxu0  ;;  %7436 = vmatprep.subr.bf16.mxu1 %v11456_v7  ;;  %v11499_v7 = vld [vmem:[#allocation11 + $0xda8] ss:$16 sps:$4 sm:$0xff]   ;;  %11837 = vtanh.f32 %v10268_v2 }
 0x417   :  { %v7092_v42 = vadd.f32 %v7091_v3, %v12501_v49  ;;  %v7132_v12 = vpop.f32.mrb[44].mxu1  ;;  %v7093_v59 = vpop.f32.mrb[25].mxu0  ;;  %v11468_v49 = vld [vmem:[#allocation11 + $0xeec] ss:$16 sps:$4 sm:$0xff]   ;;  %11839 = vtanh.f32 %v10270_v6  ;;  %v11505_v3 = vld [vmem:[#allocation11 + $0xdc8] ss:$16 sps:$4 sm:$0xff]  }
 0x418   :  { %v7094_v45 = vadd.f32 %v7093_v59, %v12503_v55  ;;  %v7134_v62 = vpop.f32.mrb[45].mxu1  ;;  %v7095_v46 = vpop.f32.mrb[26].mxu0  ;;  %7396 = vmatpush1.bf16.msra.mxu0 %v11451_v29  ;;  %v11466_v55 = vld [vmem:[#allocation11 + $0xee8] ss:$16 sps:$4 sm:$0xff]   ;;  %v11519_v59 = vld [vmem:[#allocation10 + $0x4] ss:$16 sps:$4 sm:$0xff]  }
 0x419   :  { %v12511_v15 = vadd.f32 %v7132_v12, %v7092_v42  ;;  %v7136_v18 = vpop.f32.mrb[46].mxu1  ;;  %7437 = vmatpush1.bf16.msra.mxu1 %v11454_v13  ;;  %v7096_v53 = vpop.f32.mrb[27].mxu0  ;;  %7397 = vmatprep.subr.bf16.mxu0 %v11459_v10  ;;  %v11502_v29 = vld [vmem:[#allocation11 + $0xfa8] ss:$16 sps:$4 sm:$0xff]   ;;  %v11507_v13 = vld [vmem:[#allocation11 + $0xdcc] ss:$16 sps:$4 sm:$0xff]  }
 0x41a   :  { %v12513_v26 = vadd.f32 %v7134_v62, %v7094_v45  ;;  %v7137_v34 = vpop.f32.mrb[47].mxu1  ;;  %7438 = vmatprep.subr.bf16.mxu1 %v11462_v11  ;;  %v11510_v10 = vld [vmem:[#allocation11 + $0xfcc] ss:$16 sps:$4 sm:$0xff]   ;;  %v11508_v11 = vld [vmem:[#allocation11 + $0xfc8] ss:$16 sps:$4 sm:$0xff]  }
 0x41b   :  { %v11516_v42 = vld [vmem:[#allocation11 + $0xfec] ss:$16 sps:$4 sm:$0xff]   ;;  %v11514_v12 = vld [vmem:[#allocation11 + $0xfe8] ss:$16 sps:$4 sm:$0xff]   ;;  %v11522_v45 = vld [vmem:[#allocation10 + $0x204] ss:$16 sps:$4 sm:$0xff]  }
 0x41c   :  { %7398 = vmatpush1.bf16.msra.mxu0 %v11457_v43  ;;  %v11517_v46 = vld [vmem:[#allocation10] ss:$16 sps:$4 sm:$0xff]   ;;  %v11525_v53 = vld [vmem:[#allocation10 + $0x24] ss:$16 sps:$4 sm:$0xff]  }
 0x41d   :  { %7439 = vmatpush1.bf16.msra.mxu1 %v11460_v17  ;;  %7399 = vmatprep.subr.bf16.mxu0 %v11465_v30  ;;  %v11520_v18 = vld [vmem:[#allocation10 + $0x200] ss:$16 sps:$4 sm:$0xff]   ;;  %v11528_v30 = vld [vmem:[#allocation10 + $0x224] ss:$16 sps:$4 sm:$0xff]  }
 0x41e   :  { %7440 = vmatprep.subr.bf16.mxu1 %v11468_v49  ;;  %v11523_v49 = vld [vmem:[#allocation10 + $0x20] ss:$16 sps:$4 sm:$0xff]  }
 0x41f   :  { %v11556_v6 = vld [vmem:[#allocation10 + $0x2c0] ss:$16 sps:$4 sm:$0xff]  }
 0x420   :  { %7400 = vmatpush1.bf16.msra.mxu0 %v11463_v9  ;;  %v11838_v62 = vpop.eup %11837  ;;  %v11526_v9 = vld [vmem:[#allocation10 + $0x220] ss:$16 sps:$4 sm:$0xff]  }
 0x421   :  { %7441 = vmatpush1.bf16.msra.mxu1 %v11466_v55  ;;  %7401 = vmatprep.subr.bf16.mxu0 %v11471_v35  ;;  %v11840_v43 = vpop.eup %11839  ;;  %v12523_v17 = vpack.c.bf16 %v11838_v62, %v11838_v62  ;;  %v11531_v55 = vld [vmem:[#allocation10 + $0x44] ss:$16 sps:$4 sm:$0xff]   ;;  %v11574_v62 = vld [vmem:[#allocation10 + $0x320] ss:$16 sps:$4 sm:$0xff]  }
 0x422   :  { %7442 = vmatprep.subr.bf16.mxu1 %v11474_v51  ;;  %v12526_v34 = vpack.c.bf16 %v11840_v43, %v11840_v43  ;;  %v11534_v35 = vld [vmem:[#allocation10 + $0x244] ss:$16 sps:$4 sm:$0xff]   ;;  %v11529_v51 = vld [vmem:[#allocation10 + $0x40] ss:$16 sps:$4 sm:$0xff]  }
 0x423   :  { %v11582_v43 = vld [vmem:[#allocation10 + $0x344] ss:$16 sps:$4 sm:$0xff]  }
 0x424   :  { %7402 = vmatpush1.bf16.msra.mxu0 %v11469_v16  ;;  %v11537_v16 = vld [vmem:[#allocation10 + $0x64] ss:$16 sps:$4 sm:$0xff]  }
 0x425   :  { %7443 = vmatpush1.bf16.msra.mxu1 %v11472_v36  ;;  %7403 = vmatprep.subr.bf16.mxu0 %v11477_v44  ;;  %v11535_v36 = vld [vmem:[#allocation10 + $0x60] ss:$16 sps:$4 sm:$0xff]  }
 0x426   :  { %7444 = vmatprep.subr.bf16.mxu1 %v11480_v8  ;;  %v11538_v44 = vld [vmem:[#allocation10 + $0x260] ss:$16 sps:$4 sm:$0xff]   ;;  %v11543_v8 = vld [vmem:[#allocation10 + $0x84] ss:$16 sps:$4 sm:$0xff]  }
 0x428   :  { %7404 = vmatpush1.bf16.msra.mxu0 %v11475_v37  ;;  %v11546_v37 = vld [vmem:[#allocation10 + $0x284] ss:$16 sps:$4 sm:$0xff]  }
 0x429   :  { %7445 = vmatpush1.bf16.msra.mxu1 %v11478_v38  ;;  %7405 = vmatprep.subr.bf16.mxu0 %v11483_v60  ;;  %v11541_v38 = vld [vmem:[#allocation10 + $0x80] ss:$16 sps:$4 sm:$0xff]  }
 0x42a   :  { %7446 = vmatprep.subr.bf16.mxu1 %v11486_v40  ;;  %v11544_v60 = vld [vmem:[#allocation10 + $0x280] ss:$16 sps:$4 sm:$0xff]   ;;  %v11549_v40 = vld [vmem:[#allocation10 + $0xa4] ss:$16 sps:$4 sm:$0xff]  }
 0x42c   :  { %7406 = vmatpush1.bf16.msra.mxu0 %v11481_v22  ;;  %v11552_v22 = vld [vmem:[#allocation10 + $0x2a4] ss:$16 sps:$4 sm:$0xff]  }
 0x42d   :  { %7447 = vmatpush1.bf16.msra.mxu1 %v11484_v52  ;;  %7407 = vmatprep.subr.bf16.mxu0 %v11489_v54  ;;  %v11547_v52 = vld [vmem:[#allocation10 + $0xa0] ss:$16 sps:$4 sm:$0xff]  }
 0x42e   :  { %7448 = vmatprep.subr.bf16.mxu1 %v11492_v19  ;;  %v11550_v54 = vld [vmem:[#allocation10 + $0x2a0] ss:$16 sps:$4 sm:$0xff]   ;;  %v11555_v19 = vld [vmem:[#allocation10 + $0xc4] ss:$16 sps:$4 sm:$0xff]  }
 0x430   :  { %7408 = vmatpush1.bf16.msra.mxu0 %v11487_v4 }
 0x431   :  { %7449 = vmatpush1.bf16.msra.mxu1 %v11490_v56  ;;  %7409 = vmatprep.subr.bf16.mxu0 %v11495_v0  ;;  %v11558_v56 = vld [vmem:[#allocation10 + $0x2c4] ss:$16 sps:$4 sm:$0xff]  }
 0x432   :  { %7450 = vmatprep.subr.bf16.mxu1 %v11498_v1 }
 0x434   :  { %7410 = vmatpush1.bf16.msra.mxu0 %v11493_v63 }
 0x435   :  { %7451 = vmatpush1.bf16.msra.mxu1 %v11496_v39  ;;  %7411 = vmatprep.subr.bf16.mxu0 %v11501_v33  ;;  %v11553_v39 = vld [vmem:[#allocation10 + $0xc0] ss:$16 sps:$4 sm:$0xff]  }
 0x436   :  { %7452 = vmatprep.subr.bf16.mxu1 %v11504_v5 }
 0x438   :  { %7412 = vmatpush1.bf16.msra.mxu0 %v11499_v7  ;;  %v11561_v7 = vld [vmem:[#allocation10 + $0xe4] ss:$16 sps:$4 sm:$0xff]  }
 0x439   :  { %7453 = vmatpush1.bf16.msra.mxu1 %v11502_v29  ;;  %7413 = vmatprep.subr.bf16.mxu0 %v11507_v13  ;;  %v11564_v13 = vld [vmem:[#allocation10 + $0x2e4] ss:$16 sps:$4 sm:$0xff]  }
 0x43a   :  { %7454 = vmatprep.subr.bf16.mxu1 %v11510_v10  ;;  %v11559_v10 = vld [vmem:[#allocation10 + $0xe0] ss:$16 sps:$4 sm:$0xff]  }
 0x43c   :  { %7414 = vmatpush1.bf16.msra.mxu0 %v11505_v3  ;;  %v11562_v3 = vld [vmem:[#allocation10 + $0x2e0] ss:$16 sps:$4 sm:$0xff]  }
 0x43d   :  { %7455 = vmatpush1.bf16.msra.mxu1 %v11508_v11  ;;  %7415 = vmatprep.subr.bf16.mxu0 %v11513_v24  ;;  %v11567_v11 = vld [vmem:[#allocation10 + $0x104] ss:$16 sps:$4 sm:$0xff]  }
 0x43e   :  { %7456 = vmatprep.subr.bf16.mxu1 %v11516_v42  ;;  %v11570_v24 = vld [vmem:[#allocation10 + $0x304] ss:$16 sps:$4 sm:$0xff]   ;;  %v11565_v42 = vld [vmem:[#allocation10 + $0x100] ss:$16 sps:$4 sm:$0xff]  }
 0x440   :  { %7416 = vmatpush1.bf16.msra.mxu0 %v11511_v25  ;;  %v11568_v25 = vld [vmem:[#allocation10 + $0x300] ss:$16 sps:$4 sm:$0xff]  }
 0x441   :  { %7457 = vmatpush1.bf16.msra.mxu1 %v11514_v12  ;;  %8427 = vmatprep.subr.bf16.mxu0 %v11519_v59  ;;  %v11573_v12 = vld [vmem:[#allocation10 + $0x124] ss:$16 sps:$4 sm:$0xff]  }
 0x442   :  { %8468 = vmatprep.subr.bf16.mxu1 %v11522_v45  ;;  %v11576_v59 = vld [vmem:[#allocation10 + $0x324] ss:$16 sps:$4 sm:$0xff]   ;;  %v11571_v45 = vld [vmem:[#allocation10 + $0x120] ss:$16 sps:$4 sm:$0xff]  }
 0x443   :  { %7418 = vmatmul.mubr.bf16.vlgmr.msra.gmra.mrb[40].mxu0 %v12473_v14  ;;  %v11532_v14 = vld [vmem:[#allocation10 + $0x240] ss:$16 sps:$4 sm:$0xff]  }
 0x444   :  { %7459 = vmatmul.mubr.bf16.vlgmr.msra.gmra.mrb[60].mxu1 %v12475_v28  ;;  %8428 = vmatpush1.bf16.msra.mxu0 %v11517_v46  ;;  %v11540_v28 = vld [vmem:[#allocation10 + $0x264] ss:$16 sps:$4 sm:$0xff]  }
 0x445   :  { %8459 = vmatprep.mubr.bf16.mxu0 %v12523_v17  ;;  %8469 = vmatpush1.bf16.msra.mxu1 %v11520_v18  ;;  %v11579_v46 = vld [vmem:[#allocation10 + $0x144] ss:$16 sps:$4 sm:$0xff]   ;;  %v11577_v18 = vld [vmem:[#allocation10 + $0x140] ss:$16 sps:$4 sm:$0xff]  }
 0x446   :  { %8500 = vmatprep.mubr.bf16.mxu1 %v12526_v34  ;;  %8429 = vmatprep.subr.bf16.mxu0 %v11525_v53  ;;  %v11580_v53 = vld [vmem:[#allocation10 + $0x340] ss:$16 sps:$4 sm:$0xff]  }
 0x447   :  { %8470 = vmatprep.subr.bf16.mxu1 %v11528_v30  ;;  %v11585_v30 = vld [vmem:[#allocation10 + $0x164] ss:$16 sps:$4 sm:$0xff]  }
 0x448   :  { %8430 = vmatpush1.bf16.msra.mxu0 %v11523_v49  ;;  %v11588_v49 = vld [vmem:[#allocation10 + $0x364] ss:$16 sps:$4 sm:$0xff]  }
 0x449   :  { %8471 = vmatpush1.bf16.msra.mxu1 %v11526_v9  ;;  %8431 = vmatprep.subr.bf16.mxu0 %v11531_v55  ;;  %v448_v9 = vrot.slane %v12515_v57, %v12370_v47  ;;  %v11583_v55 = vld [vmem:[#allocation10 + $0x160] ss:$16 sps:$4 sm:$0xff]  }
 0x44a   :  { %8472 = vmatprep.subr.bf16.mxu1 %v11534_v35  ;;  %v456_v35 = vrot.slane %v12515_v57, %v12373_v48 }
 0x44c   :  { %8432 = vmatpush1.bf16.msra.mxu0 %v11529_v51  ;;  %v11586_v51 = vld [vmem:[#allocation10 + $0x360] ss:$16 sps:$4 sm:$0xff]  }
 0x44d   :  { %8473 = vmatpush1.bf16.msra.mxu1 %v11532_v14  ;;  %8433 = vmatprep.subr.bf16.mxu0 %v11537_v16  ;;  %v11591_v14 = vld [vmem:[#allocation10 + $0x184] ss:$16 sps:$4 sm:$0xff]   ;;  %v468_v16 = vrot.slane %v12515_v57, %v12390_v32  ;;  %v11598_v32 = vld [vmem:[#allocation10 + $0x3a0] ss:$16 sps:$4 sm:$0xff]  }
 0x44e   :  { %8474 = vmatprep.subr.bf16.mxu1 %v11540_v28  ;;  %v11594_v28 = vld [vmem:[#allocation10 + $0x384] ss:$16 sps:$4 sm:$0xff]  }
 0x450   :  { %8434 = vmatpush1.bf16.msra.mxu0 %v11535_v36  ;;  %v10267_v36 = vadd.f32 %v12342_v21, %v448_v9  ;;  %v11603_v21 = vld [vmem:[#allocation10 + $0x1c4] ss:$16 sps:$4 sm:$0xff]   ;;  %v11643_v9 = vld [vmem:[#allocation10 + $0x4a0] ss:$16 sps:$4 sm:$0xff]  }
 0x451   :  { %8475 = vmatpush1.bf16.msra.mxu1 %v11538_v44  ;;  %8435 = vmatprep.subr.bf16.mxu0 %v11543_v8  ;;  %v11589_v44 = vld [vmem:[#allocation10 + $0x180] ss:$16 sps:$4 sm:$0xff]   ;;  %v10269_v8 = vadd.f32 %v12344_v23, %v456_v35  ;;  %v11651_v35 = vld [vmem:[#allocation10 + $0x4c4] ss:$16 sps:$4 sm:$0xff]  }
 0x452   :  { %8476 = vmatprep.subr.bf16.mxu1 %v11546_v37  ;;  %v11592_v37 = vld [vmem:[#allocation10 + $0x380] ss:$16 sps:$4 sm:$0xff]   ;;  %11841 = vtanh.f32 %v10267_v36 }
 0x453   :  { %11843 = vtanh.f32 %v10269_v8  ;;  %v11601_v23 = vld [vmem:[#allocation10 + $0x1c0] ss:$16 sps:$4 sm:$0xff]  }
 0x454   :  { %8436 = vmatpush1.bf16.msra.mxu0 %v11541_v38  ;;  %v11597_v38 = vld [vmem:[#allocation10 + $0x1a4] ss:$16 sps:$4 sm:$0xff]  }
 0x455   :  { %8477 = vmatpush1.bf16.msra.mxu1 %v11544_v60  ;;  %8437 = vmatprep.subr.bf16.mxu0 %v11549_v40  ;;  %v10272_v60 = vadd.f32 %v12435_v31, %v468_v16  ;;  %v11600_v40 = vld [vmem:[#allocation10 + $0x3a4] ss:$16 sps:$4 sm:$0xff]  }
 0x456   :  { %v7173_v4 = vpop.f32.mrb[28].mxu0  ;;  %8478 = vmatprep.subr.bf16.mxu1 %v11552_v22  ;;  %v11595_v22 = vld [vmem:[#allocation10 + $0x1a0] ss:$16 sps:$4 sm:$0xff]   ;;  %v11612_v31 = vld [vmem:[#allocation10 + $0x3e4] ss:$16 sps:$4 sm:$0xff]  }
 0x457   :  { %v7214_v0 = vpop.f32.mrb[48].mxu1  ;;  %v7175_v50 = vpop.f32.mrb[29].mxu0  ;;  %11845 = vtanh.f32 %v10272_v60 }
 0x458   :  { %v12531_v1 = vadd.f32 %v7214_v0, %v7173_v4  ;;  %v7216_v58 = vpop.f32.mrb[49].mxu1  ;;  %v7177_v63 = vpop.f32.mrb[30].mxu0  ;;  %8438 = vmatpush1.bf16.msra.mxu0 %v11547_v52  ;;  %v11606_v52 = vld [vmem:[#allocation10 + $0x3c4] ss:$16 sps:$4 sm:$0xff]   ;;  %v11607_v4 = vld [vmem:[#allocation10 + $0x1e0] ss:$16 sps:$4 sm:$0xff]  }
 0x459   :  { %v12533_v33 = vadd.f32 %v7216_v58, %v7175_v50  ;;  %v7218_v2 = vpop.f32.mrb[50].mxu1  ;;  %8479 = vmatpush1.bf16.msra.mxu1 %v11550_v54  ;;  %v7178_v5 = vpop.f32.mrb[31].mxu0  ;;  %8439 = vmatprep.subr.bf16.mxu0 %v11555_v19  ;;  %v11604_v54 = vld [vmem:[#allocation10 + $0x3c0] ss:$16 sps:$4 sm:$0xff]   ;;  %v11609_v19 = vld [vmem:[#allocation10 + $0x1e4] ss:$16 sps:$4 sm:$0xff]  }
 0x45a   :  { %v7219_v29 = vpop.f32.mrb[51].mxu1  ;;  %8480 = vmatprep.subr.bf16.mxu1 %v11558_v56  ;;  %v11610_v56 = vld [vmem:[#allocation10 + $0x3e0] ss:$16 sps:$4 sm:$0xff]   ;;  %v11615_v0 = vld [vmem:[#allocation10 + $0x404] ss:$16 sps:$4 sm:$0xff]  }
 0x45b   :  { %v11618_v58 = vld [vmem:[#allocation10 + $0xc] ss:$16 sps:$4 sm:$0xff]   ;;  %v11613_v2 = vld [vmem:[#allocation10 + $0x400] ss:$16 sps:$4 sm:$0xff]   ;;  %v11621_v29 = vld [vmem:[#allocation10 + $0x424] ss:$16 sps:$4 sm:$0xff]  }
 0x45c   :  { %8440 = vmatpush1.bf16.msra.mxu0 %v11553_v39  ;;  %v11842_v50 = vpop.eup %11841 }
 0x45d   :  { %8481 = vmatpush1.bf16.msra.mxu1 %v11556_v6  ;;  %8441 = vmatprep.subr.bf16.mxu0 %v11561_v7  ;;  %v11844_v63 = vpop.eup %11843  ;;  %v12544_v5 = vpack.c.bf16 %v11842_v50, %v11842_v50  ;;  %v11616_v6 = vld [vmem:[#allocation10 + $0x8] ss:$16 sps:$4 sm:$0xff]   ;;  %v11672_v50 = vld [vmem:[#allocation10 + $0x12c] ss:$16 sps:$4 sm:$0xff]  }
 0x45e   :  { %8482 = vmatprep.subr.bf16.mxu1 %v11564_v13  ;;  %v12546_v7 = vpack.c.bf16 %v11844_v63, %v11844_v63  ;;  %v11670_v63 = vld [vmem:[#allocation10 + $0x128] ss:$16 sps:$4 sm:$0xff]  }
 0x460   :  { %8442 = vmatpush1.bf16.msra.mxu0 %v11559_v10  ;;  %v11624_v10 = vld [vmem:[#allocation10 + $0x2c] ss:$16 sps:$4 sm:$0xff]  }
 0x461   :  { %8483 = vmatpush1.bf16.msra.mxu1 %v11562_v3  ;;  %8443 = vmatprep.subr.bf16.mxu0 %v11567_v11  ;;  %v11846_v39 = vpop.eup %11845  ;;  %v11619_v3 = vld [vmem:[#allocation10 + $0x420] ss:$16 sps:$4 sm:$0xff]   ;;  %v11622_v11 = vld [vmem:[#allocation10 + $0x28] ss:$16 sps:$4 sm:$0xff]  }
 0x462   :  { %8484 = vmatprep.subr.bf16.mxu1 %v11570_v24  ;;  %v12548_v13 = vpack.c.bf16 %v11846_v39, %v11846_v39  ;;  %v11627_v24 = vld [vmem:[#allocation10 + $0x444] ss:$16 sps:$4 sm:$0xff]  }
 0x463   :  { %v11675_v39 = vld [vmem:[#allocation10 + $0x544] ss:$16 sps:$4 sm:$0xff]  }
 0x464   :  { %8444 = vmatpush1.bf16.msra.mxu0 %v11565_v42  ;;  %v11630_v42 = vld [vmem:[#allocation10 + $0x4c] ss:$16 sps:$4 sm:$0xff]  }
 0x465   :  { %8485 = vmatpush1.bf16.msra.mxu1 %v11568_v25  ;;  %8445 = vmatprep.subr.bf16.mxu0 %v11573_v12  ;;  %v11625_v25 = vld [vmem:[#allocation10 + $0x440] ss:$16 sps:$4 sm:$0xff]   ;;  %v11628_v12 = vld [vmem:[#allocation10 + $0x48] ss:$16 sps:$4 sm:$0xff]  }
 0x466   :  { %8486 = vmatprep.subr.bf16.mxu1 %v11576_v59  ;;  %v11633_v59 = vld [vmem:[#allocation10 + $0x464] ss:$16 sps:$4 sm:$0xff]  }
 0x468   :  { %8446 = vmatpush1.bf16.msra.mxu0 %v11571_v45  ;;  %v11636_v45 = vld [vmem:[#allocation10 + $0x6c] ss:$16 sps:$4 sm:$0xff]  }
 0x469   :  { %8487 = vmatpush1.bf16.msra.mxu1 %v11574_v62  ;;  %8447 = vmatprep.subr.bf16.mxu0 %v11579_v46  ;;  %v11631_v62 = vld [vmem:[#allocation10 + $0x460] ss:$16 sps:$4 sm:$0xff]   ;;  %v11634_v46 = vld [vmem:[#allocation10 + $0x68] ss:$16 sps:$4 sm:$0xff]  }
 0x46a   :  { %8488 = vmatprep.subr.bf16.mxu1 %v11582_v43  ;;  %v11639_v43 = vld [vmem:[#allocation10 + $0x484] ss:$16 sps:$4 sm:$0xff]  }
 0x46c   :  { %8448 = vmatpush1.bf16.msra.mxu0 %v11577_v18  ;;  %v11642_v18 = vld [vmem:[#allocation10 + $0x8c] ss:$16 sps:$4 sm:$0xff]  }
 0x46d   :  { %8489 = vmatpush1.bf16.msra.mxu1 %v11580_v53  ;;  %8449 = vmatprep.subr.bf16.mxu0 %v11585_v30  ;;  %v11640_v53 = vld [vmem:[#allocation10 + $0x88] ss:$16 sps:$4 sm:$0xff]   ;;  %v11645_v30 = vld [vmem:[#allocation10 + $0x4a4] ss:$16 sps:$4 sm:$0xff]  }
 0x46e   :  { %8490 = vmatprep.subr.bf16.mxu1 %v11588_v49  ;;  %v11648_v49 = vld [vmem:[#allocation10 + $0xac] ss:$16 sps:$4 sm:$0xff]  }
 0x470   :  { %8450 = vmatpush1.bf16.msra.mxu0 %v11583_v55  ;;  %v11646_v55 = vld [vmem:[#allocation10 + $0xa8] ss:$16 sps:$4 sm:$0xff]  }
 0x471   :  { %8491 = vmatpush1.bf16.msra.mxu1 %v11586_v51  ;;  %8451 = vmatprep.subr.bf16.mxu0 %v11591_v14  ;;  %v11654_v14 = vld [vmem:[#allocation10 + $0xcc] ss:$16 sps:$4 sm:$0xff]  }
 0x472   :  { %8492 = vmatprep.subr.bf16.mxu1 %v11594_v28 }
 0x474   :  { %8452 = vmatpush1.bf16.msra.mxu0 %v11589_v44 }
 0x475   :  { %8493 = vmatpush1.bf16.msra.mxu1 %v11592_v37  ;;  %8453 = vmatprep.subr.bf16.mxu0 %v11597_v38  ;;  %v11649_v38 = vld [vmem:[#allocation10 + $0x4c0] ss:$16 sps:$4 sm:$0xff]  }
 0x476   :  { %8494 = vmatprep.subr.bf16.mxu1 %v11600_v40 }
 0x478   :  { %8454 = vmatpush1.bf16.msra.mxu0 %v11595_v22 }
 0x479   :  { %8495 = vmatpush1.bf16.msra.mxu1 %v11598_v32  ;;  %8455 = vmatprep.subr.bf16.mxu0 %v11603_v21  ;;  %v11652_v32 = vld [vmem:[#allocation10 + $0xc8] ss:$16 sps:$4 sm:$0xff]   ;;  %v11657_v21 = vld [vmem:[#allocation10 + $0x4e4] ss:$16 sps:$4 sm:$0xff]  }
 0x47a   :  { %8496 = vmatprep.subr.bf16.mxu1 %v11606_v52 }
 0x47c   :  { %8456 = vmatpush1.bf16.msra.mxu0 %v11601_v23 }
 0x47d   :  { %8497 = vmatpush1.bf16.msra.mxu1 %v11604_v54  ;;  %8457 = vmatprep.subr.bf16.mxu0 %v11609_v19  ;;  %v11655_v54 = vld [vmem:[#allocation10 + $0x4e0] ss:$16 sps:$4 sm:$0xff]   ;;  %v11663_v19 = vld [vmem:[#allocation10 + $0x504] ss:$16 sps:$4 sm:$0xff]  }
 0x47e   :  { %8498 = vmatprep.subr.bf16.mxu1 %v11612_v31  ;;  %v11666_v31 = vld [vmem:[#allocation10 + $0x10c] ss:$16 sps:$4 sm:$0xff]  }
 0x480   :  { %8458 = vmatpush1.bf16.msra.mxu0 %v11607_v4  ;;  %v11661_v4 = vld [vmem:[#allocation10 + $0x500] ss:$16 sps:$4 sm:$0xff]  }
 0x481   :  { %8499 = vmatpush1.bf16.msra.mxu1 %v11610_v56  ;;  %8509 = vmatprep.subr.bf16.mxu0 %v11615_v0  ;;  %v11664_v56 = vld [vmem:[#allocation10 + $0x108] ss:$16 sps:$4 sm:$0xff]   ;;  %v11669_v0 = vld [vmem:[#allocation10 + $0x524] ss:$16 sps:$4 sm:$0xff]  }
 0x482   :  { %8550 = vmatprep.subr.bf16.mxu1 %v11618_v58  ;;  %v11667_v58 = vld [vmem:[#allocation10 + $0x520] ss:$16 sps:$4 sm:$0xff]  }
 0x483   :  { %8460 = vmatmul.mubr.bf16.vlgmr.msra.gmra.mrb[44].mxu0 %v12544_v5 }
 0x484   :  { %8501 = vmatmul.mubr.bf16.vlgmr.msra.gmra.mrb[64].mxu1 %v12546_v7  ;;  %8510 = vmatpush1.bf16.msra.mxu0 %v11613_v2  ;;  %v11678_v2 = vld [vmem:[#allocation10 + $0x14c] ss:$16 sps:$4 sm:$0xff]  }
 0x485   :  { %8541 = vmatprep.mubr.bf16.mxu0 %v12548_v13  ;;  %8551 = vmatpush1.bf16.msra.mxu1 %v11616_v6  ;;  %v11673_v6 = vld [vmem:[#allocation10 + $0x540] ss:$16 sps:$4 sm:$0xff]  }
 0x486   :  { %8582 = vmatprep.mubr.bf16.mxu1 %v12523_v17  ;;  %8511 = vmatprep.subr.bf16.mxu0 %v11621_v29  ;;  %v11637_v17 = vld [vmem:[#allocation10 + $0x480] ss:$16 sps:$4 sm:$0xff]   ;;  %v11676_v29 = vld [vmem:[#allocation10 + $0x148] ss:$16 sps:$4 sm:$0xff]  }
 0x487   :  { %8552 = vmatprep.subr.bf16.mxu1 %v11624_v10  ;;  %v11681_v10 = vld [vmem:[#allocation10 + $0x564] ss:$16 sps:$4 sm:$0xff]  }
 0x488   :  { %8512 = vmatpush1.bf16.msra.mxu0 %v11619_v3  ;;  %v11684_v3 = vld [vmem:[#allocation10 + $0x16c] ss:$16 sps:$4 sm:$0xff]  }
 0x489   :  { %8553 = vmatpush1.bf16.msra.mxu1 %v11622_v11  ;;  %8513 = vmatprep.subr.bf16.mxu0 %v11627_v24  ;;  %v464_v11 = vrot.slane %v12515_v57, %v12404_v27  ;;  %v11679_v24 = vld [vmem:[#allocation10 + $0x560] ss:$16 sps:$4 sm:$0xff]   ;;  %v11694_v57 = vld [vmem:[#allocation10 + $0x1a8] ss:$16 sps:$4 sm:$0xff]  }
 0x48a   :  { %8554 = vmatprep.subr.bf16.mxu1 %v11630_v42  ;;  %v11682_v42 = vld [vmem:[#allocation10 + $0x168] ss:$16 sps:$4 sm:$0xff]   ;;  %v11691_v27 = vld [vmem:[#allocation10 + $0x5a0] ss:$16 sps:$4 sm:$0xff]  }
 0x48c   :  { %8514 = vmatpush1.bf16.msra.mxu0 %v11625_v25  ;;  %v11687_v25 = vld [vmem:[#allocation10 + $0x584] ss:$16 sps:$4 sm:$0xff]  }
 0x48d   :  { %8555 = vmatpush1.bf16.msra.mxu1 %v11628_v12  ;;  %8515 = vmatprep.subr.bf16.mxu0 %v11633_v59  ;;  %v11690_v12 = vld [vmem:[#allocation10 + $0x18c] ss:$16 sps:$4 sm:$0xff]   ;;  %v10271_v59 = vadd.f32 %v12433_v20, %v464_v11  ;;  %v11700_v20 = vld [vmem:[#allocation10 + $0x1c8] ss:$16 sps:$4 sm:$0xff]  }
 0x48e   :  { %8556 = vmatprep.subr.bf16.mxu1 %v11636_v45  ;;  %v11685_v45 = vld [vmem:[#allocation10 + $0x580] ss:$16 sps:$4 sm:$0xff]   ;;  %v11745_v11 = vld [vmem:[#allocation10 + $0x2c8] ss:$16 sps:$4 sm:$0xff]  }
 0x48f   :  { %11847 = vtanh.f32 %v10271_v59  ;;  %v11753_v59 = vld [vmem:[#allocation10 + $0x2ec] ss:$16 sps:$4 sm:$0xff]  }
 0x490   :  { %8516 = vmatpush1.bf16.msra.mxu0 %v11631_v62  ;;  %v11688_v62 = vld [vmem:[#allocation10 + $0x188] ss:$16 sps:$4 sm:$0xff]  }
 0x491   :  { %8557 = vmatpush1.bf16.msra.mxu1 %v11634_v46  ;;  %8517 = vmatprep.subr.bf16.mxu0 %v11639_v43  ;;  %v11693_v46 = vld [vmem:[#allocation10 + $0x5a4] ss:$16 sps:$4 sm:$0xff]   ;;  %v11696_v43 = vld [vmem:[#allocation10 + $0x1ac] ss:$16 sps:$4 sm:$0xff]  }
 0x492   :  { %8558 = vmatprep.subr.bf16.mxu1 %v11642_v18  ;;  %v11699_v18 = vld [vmem:[#allocation10 + $0x5c4] ss:$16 sps:$4 sm:$0xff]  }
 0x494   :  { %8518 = vmatpush1.bf16.msra.mxu0 %v11637_v17  ;;  %v11702_v17 = vld [vmem:[#allocation10 + $0x1cc] ss:$16 sps:$4 sm:$0xff]  }
 0x495   :  { %8559 = vmatpush1.bf16.msra.mxu1 %v11640_v53  ;;  %8519 = vmatprep.subr.bf16.mxu0 %v11645_v30  ;;  %v11697_v53 = vld [vmem:[#allocation10 + $0x5c0] ss:$16 sps:$4 sm:$0xff]   ;;  %v11705_v30 = vld [vmem:[#allocation10 + $0x5e4] ss:$16 sps:$4 sm:$0xff]  }
 0x496   :  { %v7255_v51 = vpop.f32.mrb[32].mxu0  ;;  %8560 = vmatprep.subr.bf16.mxu1 %v11648_v49  ;;  %v11708_v49 = vld [vmem:[#allocation10 + $0x1ec] ss:$16 sps:$4 sm:$0xff]  }
 0x497   :  { %v7256_v16 = vadd.f32 %v7255_v51, %v12531_v1  ;;  %v7296_v28 = vpop.f32.mrb[52].mxu1  ;;  %v7257_v36 = vpop.f32.mrb[33].mxu0  ;;  %v11660_v1 = vld [vmem:[#allocation10 + $0xec] ss:$16 sps:$4 sm:$0xff]  }
 0x498   :  { %v7258_v44 = vadd.f32 %v7257_v36, %v12533_v33  ;;  %v7298_v8 = vpop.f32.mrb[53].mxu1  ;;  %v7259_v37 = vpop.f32.mrb[34].mxu0  ;;  %8520 = vmatpush1.bf16.msra.mxu0 %v11643_v9  ;;  %v11658_v33 = vld [vmem:[#allocation10 + $0xe8] ss:$16 sps:$4 sm:$0xff]   ;;  %v11703_v9 = vld [vmem:[#allocation10 + $0x5e0] ss:$16 sps:$4 sm:$0xff]  }
 0x499   :  { %v12556_v60 = vadd.f32 %v7296_v28, %v7256_v16  ;;  %v7300_v40 = vpop.f32.mrb[54].mxu1  ;;  %8561 = vmatpush1.bf16.msra.mxu1 %v11646_v55  ;;  %v7260_v22 = vpop.f32.mrb[35].mxu0  ;;  %8521 = vmatprep.subr.bf16.mxu0 %v11651_v35  ;;  %v11706_v55 = vld [vmem:[#allocation10 + $0x1e8] ss:$16 sps:$4 sm:$0xff]   ;;  %v11711_v35 = vld [vmem:[#allocation10 + $0x20c] ss:$16 sps:$4 sm:$0xff]  }
 0x49a   :  { %v12558_v52 = vadd.f32 %v7298_v8, %v7258_v44  ;;  %v7301_v23 = vpop.f32.mrb[55].mxu1  ;;  %8562 = vmatprep.subr.bf16.mxu1 %v11654_v14  ;;  %v11848_v51 = vpop.eup %11847  ;;  %v11714_v14 = vld [vmem:[#allocation10 + $0x40c] ss:$16 sps:$4 sm:$0xff]   ;;  %v11709_v16 = vld [vmem:[#allocation10 + $0x208] ss:$16 sps:$4 sm:$0xff]  }
 0x49b   :  { %v12563_v28 = vpack.c.bf16 %v11848_v51, %v11848_v51  ;;  %v11712_v36 = vld [vmem:[#allocation10 + $0x408] ss:$16 sps:$4 sm:$0xff]   ;;  %v11717_v44 = vld [vmem:[#allocation10 + $0x22c] ss:$16 sps:$4 sm:$0xff]  }
 0x49c   :  { %8522 = vmatpush1.bf16.msra.mxu0 %v11649_v38  ;;  %v11720_v8 = vld [vmem:[#allocation10 + $0x42c] ss:$16 sps:$4 sm:$0xff]   ;;  %v11715_v37 = vld [vmem:[#allocation10 + $0x228] ss:$16 sps:$4 sm:$0xff]  }
 0x49d   :  { %8563 = vmatpush1.bf16.msra.mxu1 %v11652_v32  ;;  %8523 = vmatprep.subr.bf16.mxu0 %v11657_v21  ;;  %v11718_v38 = vld [vmem:[#allocation10 + $0x428] ss:$16 sps:$4 sm:$0xff]   ;;  %v11723_v40 = vld [vmem:[#allocation10 + $0x24c] ss:$16 sps:$4 sm:$0xff]  }
 0x49e   :  { %8564 = vmatprep.subr.bf16.mxu1 %v11660_v1  ;;  %v11726_v22 = vld [vmem:[#allocation10 + $0x44c] ss:$16 sps:$4 sm:$0xff]   ;;  %v11721_v32 = vld [vmem:[#allocation10 + $0x248] ss:$16 sps:$4 sm:$0xff]  }
 0x49f   :  { %v11724_v21 = vld [vmem:[#allocation10 + $0x448] ss:$16 sps:$4 sm:$0xff]   ;;  %v11729_v23 = vld [vmem:[#allocation10 + $0x26c] ss:$16 sps:$4 sm:$0xff]  }
 0x4a0   :  { %8524 = vmatpush1.bf16.msra.mxu0 %v11655_v54  ;;  %v11727_v1 = vld [vmem:[#allocation10 + $0x268] ss:$16 sps:$4 sm:$0xff]   ;;  %v11735_v54 = vld [vmem:[#allocation10 + $0x28c] ss:$16 sps:$4 sm:$0xff]  }
 0x4a1   :  { %8565 = vmatpush1.bf16.msra.mxu1 %v11658_v33  ;;  %8525 = vmatprep.subr.bf16.mxu0 %v11663_v19  ;;  %v11738_v33 = vld [vmem:[#allocation10 + $0x48c] ss:$16 sps:$4 sm:$0xff]   ;;  %v11736_v19 = vld [vmem:[#allocation10 + $0x488] ss:$16 sps:$4 sm:$0xff]  }
 0x4a2   :  { %8566 = vmatprep.subr.bf16.mxu1 %v11666_v31  ;;  %v11741_v31 = vld [vmem:[#allocation10 + $0x2ac] ss:$16 sps:$4 sm:$0xff]  }
 0x4a3   :  { %v11777_v51 = vld [vmem:[#allocation10 + $0x36c] ss:$16 sps:$4 sm:$0xff]  }
 0x4a4   :  { %8526 = vmatpush1.bf16.msra.mxu0 %v11661_v4  ;;  %v11744_v4 = vld [vmem:[#allocation10 + $0x4ac] ss:$16 sps:$4 sm:$0xff]  }
 0x4a5   :  { %8567 = vmatpush1.bf16.msra.mxu1 %v11664_v56  ;;  %8527 = vmatprep.subr.bf16.mxu0 %v11669_v0  ;;  %v11739_v56 = vld [vmem:[#allocation10 + $0x2a8] ss:$16 sps:$4 sm:$0xff]  }
 0x4a6   :  { %8568 = vmatprep.subr.bf16.mxu1 %v11672_v50  ;;  %v11742_v0 = vld [vmem:[#allocation10 + $0x4a8] ss:$16 sps:$4 sm:$0xff]   ;;  %v11747_v50 = vld [vmem:[#allocation10 + $0x2cc] ss:$16 sps:$4 sm:$0xff]  }
 0x4a8   :  { %8528 = vmatpush1.bf16.msra.mxu0 %v11667_v58 }
 0x4a9   :  { %8569 = vmatpush1.bf16.msra.mxu1 %v11670_v63  ;;  %8529 = vmatprep.subr.bf16.mxu0 %v11675_v39  ;;  %v11750_v63 = vld [vmem:[#allocation10 + $0x4cc] ss:$16 sps:$4 sm:$0xff]  }
 0x4aa   :  { %8570 = vmatprep.subr.bf16.mxu1 %v11678_v2 }
 0x4ac   :  { %8530 = vmatpush1.bf16.msra.mxu0 %v11673_v6 }
 0x4ad   :  { %8571 = vmatpush1.bf16.msra.mxu1 %v11676_v29  ;;  %8531 = vmatprep.subr.bf16.mxu0 %v11681_v10 }
 0x4ae   :  { %8572 = vmatprep.subr.bf16.mxu1 %v11684_v3 }
 0x4b0   :  { %8532 = vmatpush1.bf16.msra.mxu0 %v11679_v24 }
 0x4b1   :  { %8573 = vmatpush1.bf16.msra.mxu1 %v11682_v42  ;;  %8533 = vmatprep.subr.bf16.mxu0 %v11687_v25 }
 0x4b2   :  { %8574 = vmatprep.subr.bf16.mxu1 %v11690_v12  ;;  %v11748_v12 = vld [vmem:[#allocation10 + $0x4c8] ss:$16 sps:$4 sm:$0xff]  }
 0x4b4   :  { %8534 = vmatpush1.bf16.msra.mxu0 %v11685_v45 }
 0x4b5   :  { %8575 = vmatpush1.bf16.msra.mxu1 %v11688_v62  ;;  %8535 = vmatprep.subr.bf16.mxu0 %v11693_v46  ;;  %v11751_v46 = vld [vmem:[#allocation10 + $0x2e8] ss:$16 sps:$4 sm:$0xff]  }
 0x4b6   :  { %8576 = vmatprep.subr.bf16.mxu1 %v11696_v43  ;;  %v11759_v43 = vld [vmem:[#allocation10 + $0x30c] ss:$16 sps:$4 sm:$0xff]  }
 0x4b8   :  { %8536 = vmatpush1.bf16.msra.mxu0 %v11691_v27  ;;  %v11762_v27 = vld [vmem:[#allocation10 + $0x50c] ss:$16 sps:$4 sm:$0xff]  }
 0x4b9   :  { %8577 = vmatpush1.bf16.msra.mxu1 %v11694_v57  ;;  %8537 = vmatprep.subr.bf16.mxu0 %v11699_v18  ;;  %v11757_v57 = vld [vmem:[#allocation10 + $0x308] ss:$16 sps:$4 sm:$0xff]  }
 0x4ba   :  { %8578 = vmatprep.subr.bf16.mxu1 %v11702_v17  ;;  %v11760_v18 = vld [vmem:[#allocation10 + $0x508] ss:$16 sps:$4 sm:$0xff]   ;;  %v11765_v17 = vld [vmem:[#allocation10 + $0x32c] ss:$16 sps:$4 sm:$0xff]  }
 0x4bc   :  { %8538 = vmatpush1.bf16.msra.mxu0 %v11697_v53  ;;  %v11768_v53 = vld [vmem:[#allocation10 + $0x52c] ss:$16 sps:$4 sm:$0xff]  }
 0x4bd   :  { %8579 = vmatpush1.bf16.msra.mxu1 %v11700_v20  ;;  %8539 = vmatprep.subr.bf16.mxu0 %v11705_v30  ;;  %v11763_v20 = vld [vmem:[#allocation10 + $0x328] ss:$16 sps:$4 sm:$0xff]  }
 0x4be   :  { %8580 = vmatprep.subr.bf16.mxu1 %v11708_v49  ;;  %v11766_v30 = vld [vmem:[#allocation10 + $0x528] ss:$16 sps:$4 sm:$0xff]   ;;  %v11771_v49 = vld [vmem:[#allocation10 + $0x34c] ss:$16 sps:$4 sm:$0xff]  }
 0x4c0   :  { %8540 = vmatpush1.bf16.msra.mxu0 %v11703_v9  ;;  %v11774_v9 = vld [vmem:[#allocation10 + $0x54c] ss:$16 sps:$4 sm:$0xff]  }
 0x4c1   :  { %8581 = vmatpush1.bf16.msra.mxu1 %v11706_v55  ;;  %8591 = vmatprep.subr.bf16.mxu0 %v11711_v35  ;;  %v11769_v55 = vld [vmem:[#allocation10 + $0x348] ss:$16 sps:$4 sm:$0xff]  }
 0x4c2   :  { %8632 = vmatprep.subr.bf16.mxu1 %v11714_v14  ;;  %v11772_v35 = vld [vmem:[#allocation10 + $0x548] ss:$16 sps:$4 sm:$0xff]   ;;  %v11780_v14 = vld [vmem:[#allocation10 + $0x56c] ss:$16 sps:$4 sm:$0xff]  }
 0x4c3   :  { %8542 = vmatmul.mubr.bf16.vlgmr.msra.gmra.mrb[48].mxu0 %v12563_v28 }
 0x4c4   :  { %8583 = vmatmul.mubr.bf16.vlgmr.msra.gmra.mrb[68].mxu1 %v12544_v5  ;;  %8592 = vmatpush1.bf16.msra.mxu0 %v11709_v16  ;;  %v11732_v5 = vld [vmem:[#allocation10 + $0x46c] ss:$16 sps:$4 sm:$0xff]   ;;  %v11775_v16 = vld [vmem:[#allocation10 + $0x368] ss:$16 sps:$4 sm:$0xff]  }
 0x4c5   :  { %8623 = vmatprep.mubr.bf16.mxu0 %v12526_v34  ;;  %8633 = vmatpush1.bf16.msra.mxu1 %v11712_v36  ;;  %v11730_v34 = vld [vmem:[#allocation10 + $0x468] ss:$16 sps:$4 sm:$0xff]  }
 0x4c6   :  { %8664 = vmatprep.mubr.bf16.mxu1 %v12548_v13  ;;  %8593 = vmatprep.subr.bf16.mxu0 %v11717_v44  ;;  %v11733_v13 = vld [vmem:[#allocation10 + $0x288] ss:$16 sps:$4 sm:$0xff]   ;;  %v11783_v44 = vld [vmem:[#allocation10 + $0x38c] ss:$16 sps:$4 sm:$0xff]  }
 0x4c7   :  { %8634 = vmatprep.subr.bf16.mxu1 %v11720_v8  ;;  %v11778_v36 = vld [vmem:[#allocation10 + $0x568] ss:$16 sps:$4 sm:$0xff]   ;;  %v11786_v8 = vld [vmem:[#allocation10 + $0x58c] ss:$16 sps:$4 sm:$0xff]  }
 0x4c8   :  { %8594 = vmatpush1.bf16.msra.mxu0 %v11715_v37  ;;  %v11781_v37 = vld [vmem:[#allocation10 + $0x388] ss:$16 sps:$4 sm:$0xff]  }
 0x4c9   :  { %8635 = vmatpush1.bf16.msra.mxu1 %v11718_v38  ;;  %8595 = vmatprep.subr.bf16.mxu0 %v11723_v40  ;;  %v11784_v38 = vld [vmem:[#allocation10 + $0x588] ss:$16 sps:$4 sm:$0xff]   ;;  %v11789_v40 = vld [vmem:[#allocation10 + $0x3ac] ss:$16 sps:$4 sm:$0xff]  }
 0x4ca   :  { %8636 = vmatprep.subr.bf16.mxu1 %v11726_v22  ;;  %v11792_v22 = vld [vmem:[#allocation10 + $0x5ac] ss:$16 sps:$4 sm:$0xff]  }
 0x4cc   :  { %8596 = vmatpush1.bf16.msra.mxu0 %v11721_v32  ;;  %v11787_v32 = vld [vmem:[#allocation10 + $0x3a8] ss:$16 sps:$4 sm:$0xff]  }
 0x4cd   :  { %8637 = vmatpush1.bf16.msra.mxu1 %v11724_v21  ;;  %8597 = vmatprep.subr.bf16.mxu0 %v11729_v23  ;;  %v11790_v21 = vld [vmem:[#allocation10 + $0x5a8] ss:$16 sps:$4 sm:$0xff]   ;;  %v11795_v23 = vld [vmem:[#allocation10 + $0x3cc] ss:$16 sps:$4 sm:$0xff]  }
 0x4ce   :  { %8638 = vmatprep.subr.bf16.mxu1 %v11732_v5  ;;  %v11798_v5 = vld [vmem:[#allocation10 + $0x5cc] ss:$16 sps:$4 sm:$0xff]  }
 0x4d0   :  { %8598 = vmatpush1.bf16.msra.mxu0 %v11727_v1  ;;  %v11793_v1 = vld [vmem:[#allocation10 + $0x3c8] ss:$16 sps:$4 sm:$0xff]  }
 0x4d1   :  { %8639 = vmatpush1.bf16.msra.mxu1 %v11730_v34  ;;  %8599 = vmatprep.subr.bf16.mxu0 %v11735_v54  ;;  %v11796_v34 = vld [vmem:[#allocation10 + $0x5c8] ss:$16 sps:$4 sm:$0xff]   ;;  %v11801_v54 = vld [vmem:[#allocation10 + $0x3ec] ss:$16 sps:$4 sm:$0xff]  }
 0x4d2   :  { %8640 = vmatprep.subr.bf16.mxu1 %v11738_v33  ;;  %v11804_v33 = vld [vmem:[#allocation10 + $0x5ec] ss:$16 sps:$4 sm:$0xff]  }
 0x4d4   :  { %8600 = vmatpush1.bf16.msra.mxu0 %v11733_v13  ;;  %v11799_v13 = vld [vmem:[#allocation10 + $0x3e8] ss:$16 sps:$4 sm:$0xff]  }
 0x4d5   :  { %8641 = vmatpush1.bf16.msra.mxu1 %v11736_v19  ;;  %8601 = vmatprep.subr.bf16.mxu0 %v11741_v31  ;;  %v11802_v19 = vld [vmem:[#allocation10 + $0x5e8] ss:$16 sps:$4 sm:$0xff]  }
 0x4d6   :  { %v7337_v58 = vpop.f32.mrb[36].mxu0  ;;  %8642 = vmatprep.subr.bf16.mxu1 %v11744_v4  ;;  %v11805_v31 = vld [vmem:[#allocation14 + $0x40] sm:$0xff]  }
 0x4d7   :  { %v7338_v39 = vadd.f32 %v7337_v58, %v12556_v60  ;;  %v7378_v2 = vpop.f32.mrb[56].mxu1  ;;  %v7339_v6 = vpop.f32.mrb[37].mxu0  ;;  %v11756_v60 = vld [vmem:[#allocation10 + $0x4ec] ss:$16 sps:$4 sm:$0xff]   ;;  %v11806_v4 = vld [vmem:[#allocation14] sm:$0xff]   ;;  %v11810_v58 = vld [vmem:[#allocation14 + $0x10] sm:$0xff]  }
 0x4d8   :  { %v7340_v29 = vadd.f32 %v7339_v6, %v12558_v52  ;;  %v7380_v10 = vpop.f32.mrb[57].mxu1  ;;  %v7341_v3 = vpop.f32.mrb[38].mxu0  ;;  %8602 = vmatpush1.bf16.msra.mxu0 %v11739_v56  ;;  %v11754_v52 = vld [vmem:[#allocation10 + $0x4e8] ss:$16 sps:$4 sm:$0xff]   ;;  %v11807_v56 = vld [vmem:[#allocation14 + $0x48] sm:$0xff]  }
 0x4d9   :  { %v12571_v24 = vadd.f32 %v7378_v2, %v7338_v39  ;;  %v7382_v42 = vpop.f32.mrb[58].mxu1  ;;  %8643 = vmatpush1.bf16.msra.mxu1 %v11742_v0  ;;  %v7342_v25 = vpop.f32.mrb[39].mxu0  ;;  %8603 = vmatprep.subr.bf16.mxu0 %v11747_v50  ;;  %v11808_v0 = vld [vmem:[#allocation14 + $0x8] sm:$0xff]   ;;  %v11809_v50 = vld [vmem:[#allocation14 + $0x50] sm:$0xff]   ;;  %v11812_v39 = vld [vmem:[#allocation14 + $0x18] sm:$0xff]  }
 0x4da   :  { %v12573_v45 = vadd.f32 %v7380_v10, %v7340_v29  ;;  %v7383_v62 = vpop.f32.mrb[59].mxu1  ;;  %8644 = vmatprep.subr.bf16.mxu1 %v11750_v63  ;;  %v11811_v63 = vld [vmem:[#allocation14 + $0x58] sm:$0xff]   ;;  %v11813_v2 = vld [vmem:[#allocation14 + $0x60] sm:$0xff]   ;;  %v11815_v29 = vld [vmem:[#allocation14 + $0x68] sm:$0xff]  }
 0x4db   :  { %v11814_v6 = vld [vmem:[#allocation14 + $0x20] sm:$0xff]  }
 0x4dc   :  { %8604 = vmatpush1.bf16.msra.mxu0 %v11745_v11 }
 0x4dd   :  { %8645 = vmatpush1.bf16.msra.mxu1 %v11748_v12  ;;  %8605 = vmatprep.subr.bf16.mxu0 %v11753_v59 }
 0x4de   :  { %8646 = vmatprep.subr.bf16.mxu1 %v11756_v60 }
 0x4e0   :  { %8606 = vmatpush1.bf16.msra.mxu0 %v11751_v46  ;;  %v11817_v46 = vld [vmem:[#allocation14 + $0x70] sm:$0xff]  }
 0x4e1   :  { %8647 = vmatpush1.bf16.msra.mxu1 %v11754_v52  ;;  %8607 = vmatprep.subr.bf16.mxu0 %v11759_v43 }
 0x4e2   :  { %8648 = vmatprep.subr.bf16.mxu1 %v11762_v27  ;;  %v11818_v27 = vld [vmem:[#allocation14 + $0x30] sm:$0xff]  }
 0x4e4   :  { %8608 = vmatpush1.bf16.msra.mxu0 %v11757_v57  ;;  %v11819_v57 = vld [vmem:[#allocation14 + $0x78] sm:$0xff]  }
 0x4e5   :  { %8649 = vmatpush1.bf16.msra.mxu1 %v11760_v18  ;;  %8609 = vmatprep.subr.bf16.mxu0 %v11765_v17  ;;  %v11821_v18 = vld [vmem:[#allocation14 + $0xc0] sm:$0xff]   ;;  %v11823_v17 = vld [vmem:[#allocation14 + $0xc8] sm:$0xff]  }
 0x4e6   :  { %8650 = vmatprep.subr.bf16.mxu1 %v11768_v53  ;;  %v11824_v53 = vld [vmem:[#allocation14 + $0x88] sm:$0xff]  }
 0x4e8   :  { %8610 = vmatpush1.bf16.msra.mxu0 %v11763_v20  ;;  %v11825_v20 = vld [vmem:[#allocation14 + $0xd0] sm:$0xff]  }
 0x4e9   :  { %8651 = vmatpush1.bf16.msra.mxu1 %v11766_v30  ;;  %8611 = vmatprep.subr.bf16.mxu0 %v11771_v49  ;;  %v11826_v30 = vld [vmem:[#allocation14 + $0x90] sm:$0xff]   ;;  %v11827_v49 = vld [vmem:[#allocation14 + $0xd8] sm:$0xff]  }
 0x4ea   :  { %8652 = vmatprep.subr.bf16.mxu1 %v11774_v9  ;;  %v11828_v9 = vld [vmem:[#allocation14 + $0x98] sm:$0xff]  }
 0x4ec   :  { %8612 = vmatpush1.bf16.msra.mxu0 %v11769_v55  ;;  %v11829_v55 = vld [vmem:[#allocation14 + $0xe0] sm:$0xff]  }
 0x4ed   :  { %8653 = vmatpush1.bf16.msra.mxu1 %v11772_v35  ;;  %8613 = vmatprep.subr.bf16.mxu0 %v11777_v51  ;;  %v11830_v35 = vld [vmem:[#allocation14 + $0xa0] sm:$0xff]  }
 0x4ee   :  { %8654 = vmatprep.subr.bf16.mxu1 %v11780_v14 }
 0x4f0   :  { %8614 = vmatpush1.bf16.msra.mxu0 %v11775_v16 }
 0x4f1   :  { %8655 = vmatpush1.bf16.msra.mxu1 %v11778_v36  ;;  %8615 = vmatprep.subr.bf16.mxu0 %v11783_v44  ;;  %v11831_v44 = vld [vmem:[#allocation14 + $0xe8] sm:$0xff]  }
 0x4f2   :  { %8656 = vmatprep.subr.bf16.mxu1 %v11786_v8 }
 0x4f4   :  { %8616 = vmatpush1.bf16.msra.mxu0 %v11781_v37 }
 0x4f5   :  { %8657 = vmatpush1.bf16.msra.mxu1 %v11784_v38  ;;  %8617 = vmatprep.subr.bf16.mxu0 %v11789_v40  ;;  %v11832_v40 = vld [vmem:[#allocation14 + $0xa8] sm:$0xff]  }
 0x4f6   :  { %8658 = vmatprep.subr.bf16.mxu1 %v11792_v22 }
 0x4f8   :  { %8618 = vmatpush1.bf16.msra.mxu0 %v11787_v32 }
 0x4f9   :  { %8659 = vmatpush1.bf16.msra.mxu1 %v11790_v21  ;;  %8619 = vmatprep.subr.bf16.mxu0 %v11795_v23 }
 0x4fa   :  { %8660 = vmatprep.subr.bf16.mxu1 %v11798_v5 }
 0x4fc   :  { %8620 = vmatpush1.bf16.msra.mxu0 %v11793_v1  ;;  %v11833_v1 = vld [vmem:[#allocation14 + $0xf0] sm:$0xff]  }
 0x4fd   :  { %8661 = vmatpush1.bf16.msra.mxu1 %v11796_v34  ;;  %8621 = vmatprep.subr.bf16.mxu0 %v11801_v54  ;;  %v11834_v34 = vld [vmem:[#allocation14 + $0xb0] sm:$0xff]   ;;  %v11836_v54 = vld [vmem:[#allocation14 + $0xb8] sm:$0xff]  }
 0x4fe   :  { %8662 = vmatprep.subr.bf16.mxu1 %v11804_v33  ;;  %v8673_v33 = vld [vmem:[#allocation13] sm:$0xf] }
 0x500   :  { %8622 = vmatpush1.bf16.msra.mxu0 %v11799_v13 }
 0x501   :  { %8663 = vmatpush1.bf16.msra.mxu1 %v11802_v19  ;;  %10223 = vmatprep.subr.bf16.mxu0 %v11805_v31  ;;  %v8682_v19 = vrot.slane %v8673_v33, %v12355_v61 }
 0x502   :  { %10245 = vmatprep.subr.bf16.mxu1 %v11821_v18 }
 0x503   :  { %8624 = vmatmul.mubr.bf16.vlgmr.msra.gmra.mrb[52].mxu0 %v12546_v7 }
 0x504   :  { %8665 = vmatmul.mubr.bf16.vlgmr.msra.gmra.mrb[72].mxu1 %v12563_v28  ;;  %10224 = vmatpush3.bf16.msra.mxu0 %v11806_v4  ;;  %v11816_v28 = vld [vmem:[#allocation14 + $0x28] sm:$0xff]  }
 0x505   :  { %10225 = vmatprep.subr.bf16.mxu0 %v11807_v56 }
 0x508   :  { %10226 = vmatpush3.bf16.msra.mxu0 %v11808_v0 }
 0x509   :  { %10227 = vmatprep.subr.bf16.mxu0 %v11809_v50 }
 0x50c   :  { %10228 = vmatpush3.bf16.msra.mxu0 %v11810_v58 }
 0x50d   :  { %10229 = vmatprep.subr.bf16.mxu0 %v11811_v63 }
 0x510   :  { %10230 = vmatpush3.bf16.msra.mxu0 %v11812_v39 }
 0x511   :  { %10231 = vmatprep.subr.bf16.mxu0 %v11813_v2 }
 0x514   :  { %10232 = vmatpush3.bf16.msra.mxu0 %v11814_v6 }
 0x515   :  { %10233 = vmatprep.subr.bf16.mxu0 %v11815_v29 }
 0x516   :  { %v7419_v7 = vpop.f32.mrb[40].mxu0 }
 0x517   :  { %v7420_v10 = vadd.f32 %v7419_v7, %v12571_v24  ;;  %v7460_v3 = vpop.f32.mrb[60].mxu1  ;;  %v7421_v11 = vpop.f32.mrb[41].mxu0  ;;  %v11820_v24 = vld [vmem:[#allocation14 + $0x38] sm:$0xff]  }
 0x518   :  { %v7422_v42 = vadd.f32 %v7421_v11, %v12573_v45  ;;  %v7462_v25 = vpop.f32.mrb[61].mxu1  ;;  %v7423_v12 = vpop.f32.mrb[42].mxu0  ;;  %10234 = vmatpush3.bf16.msra.mxu0 %v11816_v28  ;;  %v11822_v45 = vld [vmem:[#allocation14 + $0x80] sm:$0xff]  }
 0x519   :  { %v12579_v59 = vadd.f32 %v7460_v3, %v7420_v10  ;;  %v7464_v62 = vpop.f32.mrb[62].mxu1  ;;  %v7424_v60 = vpop.f32.mrb[43].mxu0  ;;  %10235 = vmatprep.subr.bf16.mxu0 %v11817_v46  ;;  %10246 = vmatpush3.bf16.msra.mxu1 %v11822_v45  ;;  %v8686_v12 = vrot.slane %v8673_v33, %v12373_v48  ;;  %v8690_v46 = vrot.slane %v8673_v33, %v12365_v41  ;;  %v10190_v41 = vld [vmem:[#allocation16] ss:$0 sm:$0xff] }
 0x51a   :  { %v12581_v52 = vadd.f32 %v7462_v25, %v7422_v42  ;;  %v7465_v43 = vpop.f32.mrb[63].mxu1  ;;  %10247 = vmatprep.subr.bf16.mxu1 %v11823_v17 }
 0x51c   :  { %10236 = vmatpush3.bf16.msra.mxu0 %v11818_v27 }
 0x51d   :  { %10237 = vmatprep.subr.bf16.mxu0 %v11819_v57  ;;  %10248 = vmatpush3.bf16.msra.mxu1 %v11824_v53 }
 0x51e   :  { %10249 = vmatprep.subr.bf16.mxu1 %v11825_v20 }
 0x520   :  { %10238 = vmatpush3.bf16.msra.mxu0 %v11820_v24 }
 0x521   :  { %10250 = vmatpush3.bf16.msra.mxu1 %v11826_v30 }
 0x522   :  { %10251 = vmatprep.subr.bf16.mxu1 %v11827_v49 }
 0x525   :  { %10252 = vmatpush3.bf16.msra.mxu1 %v11828_v9 }
 0x526   :  { %10253 = vmatprep.subr.bf16.mxu1 %v11829_v55 }
 0x529   :  { %10254 = vmatpush3.bf16.msra.mxu1 %v11830_v35 }
 0x52a   :  { %10255 = vmatprep.subr.bf16.mxu1 %v11831_v44 }
 0x52d   :  { %10256 = vmatpush3.bf16.msra.mxu1 %v11832_v40 }
 0x52e   :  { %10257 = vmatprep.subr.bf16.mxu1 %v11833_v1 }
 0x531   :  { %10258 = vmatpush3.bf16.msra.mxu1 %v11834_v34 }
 0x556   :  { %v8461_v51 = vpop.f32.mrb[44].mxu0 }
 0x557   :  { %v8462_v14 = vadd.f32 %v8461_v51, %v12511_v15  ;;  %v8502_v16 = vpop.f32.mrb[64].mxu1  ;;  %v8463_v36 = vpop.f32.mrb[45].mxu0  ;;  %v11835_v15 = vld [vmem:[#allocation14 + $0xf8] sm:$0xff]  }
 0x558   :  { %v8464_v8 = vadd.f32 %v8463_v36, %v12513_v26  ;;  %v8504_v37 = vpop.f32.mrb[65].mxu1  ;;  %v8465_v38 = vpop.f32.mrb[46].mxu0  ;;  %10259 = vmatprep.subr.bf16.mxu1 %v11835_v15  ;;  %v8678_v26 = vrot.slane %v8673_v33, %v12370_v47 }
 0x559   :  { %v8503_v22 = vadd.f32 %v8502_v16, %v8462_v14  ;;  %v8506_v32 = vpop.f32.mrb[66].mxu1  ;;  %v8466_v21 = vpop.f32.mrb[47].mxu0  ;;  %10260 = vmatpush3.bf16.msra.mxu1 %v11836_v54 }
 0x55a   :  { %v8505_v23 = vadd.f32 %v8504_v37, %v8464_v8  ;;  %v8507_v5 = vpop.f32.mrb[67].mxu1 }
 0x596   :  { %v8543_v13 = vpop.f32.mrb[48].mxu0 }
 0x597   :  { %v8544_v31 = vadd.f32 %v8543_v13, %v8503_v22  ;;  %v8584_v4 = vpop.f32.mrb[68].mxu1  ;;  %v8545_v56 = vpop.f32.mrb[49].mxu0 }
 0x598   :  { %v8585_v0 = vadd.f32 %v8584_v4, %v12579_v59  ;;  %v8546_v50 = vadd.f32 %v8545_v56, %v8505_v23  ;;  %v8586_v58 = vpop.f32.mrb[69].mxu1  ;;  %v8547_v63 = vpop.f32.mrb[50].mxu0 }
 0x599   :  { %v8695_v39 = vadd.f32 %v8678_v26, %v8544_v31  ;;  %v8587_v2 = vadd.f32 %v8586_v58, %v12581_v52  ;;  %v8588_v6 = vpop.f32.mrb[70].mxu1  ;;  %v8548_v29 = vpop.f32.mrb[51].mxu0 }
 0x59a   :  { %v8696_v7 = vadd.f32 %v8682_v19, %v8546_v50  ;;  %v8589_v28 = vpop.f32.mrb[71].mxu1 }
 0x59b   :  { %v8699_v10 = vmax.f32 %v8695_v39, 0.0 }
 0x59c   :  { %v8700_v47 = vmax.f32 %v8696_v7, 0.0 }
 0x59d   :  { %v8703_v11 = vpack.c.bf16 %v8699_v10, %v8699_v10 }
 0x59e   :  { %v8704_v3 = vpack.c.bf16 %v8700_v47, %v8700_v47 }
 0x5a0   :  { %9002 = vmatprep.mubr.bf16.mxu0 %v8704_v3 }
 0x5a1   :  { %9003 = vmatmul.mubr.bf16.vlgmr.msra.gmra.mrb[56].mxu0 %v8703_v11 }
 0x5d6   :  { %v8625_v61 = vpop.f32.mrb[52].mxu0 }
 0x5d7   :  { %v8626_v42 = vadd.f32 %v8625_v61, %v8585_v0  ;;  %v8666_v25 = vpop.f32.mrb[72].mxu1  ;;  %v8627_v59 = vpop.f32.mrb[53].mxu0 }
 0x5d8   :  { %v8628_v62 = vadd.f32 %v8627_v59, %v8587_v2  ;;  %v8668_v60 = vpop.f32.mrb[73].mxu1  ;;  %v8629_v52 = vpop.f32.mrb[54].mxu0 }
 0x5d9   :  { %v8667_v43 = vadd.f32 %v8666_v25, %v8626_v42  ;;  %v8670_v27 = vpop.f32.mrb[74].mxu1  ;;  %v8630_v57 = vpop.f32.mrb[55].mxu0 }
 0x5da   :  { %v8669_v24 = vadd.f32 %v8668_v60, %v8628_v62  ;;  %v8671_v18 = vpop.f32.mrb[75].mxu1 }
 0x5db   :  { %v8697_v45 = vadd.f32 %v8686_v12, %v8667_v43 }
 0x5dc   :  { %v8698_v17 = vadd.f32 %v8690_v46, %v8669_v24 }
 0x5dd   :  { %v8701_v53 = vmax.f32 %v8697_v45, 0.0 }
 0x5de   :  { %v8702_v20 = vmax.f32 %v8698_v17, 0.0 }
 0x5df   :  { %v8705_v49 = vpack.c.bf16 %v8701_v53, %v8701_v53 }
 0x5e0   :  { %v8706_v30 = vpack.c.bf16 %v8702_v20, %v8702_v20 }
 0x5e2   :  { %9042 = vmatprep.mubr.bf16.mxu1 %v8706_v30 }
 0x5e3   :  { %9043 = vmatmul.mubr.bf16.vlgmr.msra.gmra.mrb[76].mxu1 %v8705_v49 }
 0x674   :  { %v10239_v48 = vpop.f32.mrb[56].mxu0 }
 0x675   :  { %v10240_v9 = vpop.f32.mrb[57].mxu0 }
 0x676   :  { %v10241_v55 = vadd.f32 %v10240_v9, %v10239_v48  ;;  %v10242_v35 = vpop.f32.mrb[58].mxu0 }
 0x677   :  { %v10243_v51 = vpop.f32.mrb[59].mxu0 }
 0x678   :  { %v9005_v36 = vadd.f32 %v10241_v55, %v10190_v41 }
 0x6b6   :  { %v10261_v14 = vpop.f32.mrb[76].mxu1 }
 0x6b7   :  { %v10262_v16 = vpop.f32.mrb[77].mxu1 }
 0x6b8   :  { %v10263_v44 = vadd.f32 %v10262_v16, %v10261_v14  ;;  %v10264_v8 = vpop.f32.mrb[78].mxu1 }
 0x6b9   :  { %v10265_v37 = vpop.f32.mrb[79].mxu1 }
 0x6ba   :  { %v9045_v38 = vadd.f32 %v10263_v44, %v9005_v36 }
 0x6bc   :  { %9050 = vst [vmem:[#allocation17] sm:$0x3] %v9045_v38 }
 0x6bd   :  { %12059 = shalt.err (!%p12056_p6)
}
 0x6be   :  { %s12060_s13 = scalar_lea.hbm %s12614_s11, 32 }
 0x6bf   :  { %p12061_p7 = scmp.ne.s32.totalorder %s12614_s11, %s12060_s13  ;;  %p12064_p8 = scmp.lt.u32.totalorder %s12060_s13, %s12614_s11 }
 0x6c1   :  { %p12066_p9 = pnand %p12064_p8, %p12061_p7 }
 0x6c3   :  { %12069 = shalt.err (!%p12066_p9)
}
 0x6c4   :  { %9060 = dma.vmem_to_hbm [thread:$0]  %s9058_s27, 32, %s12614_s11, [#allocation4]  }
 0x6c5   :  { %12080 = dma.done.wait [#allocation4], 32  }
 0x6c6   :  { %12081 = vsyncadd [#allocation4], 4294967264 }
 0x6c7   :  { %9064 = vsyncpa [#allocation3], 1 }
 0x6c8   :  { %9065 = vsyncpa [#allocation6], 1 }
 0x6c9   :  { %9066 = vsyncpa [#allocation9], 1 }
 0x6ca   :  { %9067 = vsyncpa [#allocation12], 1 }
 0x6cb   :  { %9068 = vsyncpa [#allocation15], 1 }
 0x6cc   :  { %9069 = vsyncpa [#allocation4], 1 }

</bundles_post_ra>
